<compile_context>
chip_gen: v7x
topology: tpu7x:2x2x1
jax: 0.10.0
libtpu: 0.0.40
codegen_flags: <defaults>
</compile_context>

<pallas_src>
import functools

import jax
import jax.numpy as jnp
from jax.experimental import pallas as pl
from jax.experimental.pallas import tpu as pltpu

EPS = 1e-3


def conv_bn_kernel(w_ref, x_ref, gamma_ref, beta_ref, o_ref, *, m_valid):
    """One Cout tile of fused 1x1-conv + training-mode BatchNorm.

    w_ref     : (Ct, Cin)  tile of the conv weight (native PyTorch layout, no transpose)
    x_ref     : (Cin, M)   activations, channel-major (== flattened NCHW), resident across tiles
    gamma_ref : (Ct, 1)
    beta_ref  : (Ct, 1)
    o_ref     : (Ct, M)    channel-major output (== flattened NCHW) for this tile
    """
    # 1x1 conv == channel matmul on the MXU; Cout on sublanes, spatial on lanes.
    y = jnp.dot(w_ref[...], x_ref[...], preferred_element_type=jnp.float32)   # (Ct, M)

    inv_m = 1.0 / float(m_valid)
    # BatchNorm training statistics: per-channel (per-row) biased mean / var over N*H*W.
    mean = jnp.sum(y, axis=1, keepdims=True) * inv_m                          # (Ct, 1)
    diff = y - mean
    var = jnp.sum(diff * diff, axis=1, keepdims=True) * inv_m                 # (Ct, 1)

    # Fold the whole BN affine into one scale + one shift -> a single FMA per output vreg.
    a = jax.lax.rsqrt(var + EPS) * gamma_ref[...]                             # (Ct, 1)
    b = beta_ref[...] - mean * a                                              # (Ct, 1)
    o_ref[...] = (y * a + b).astype(o_ref.dtype)


def _pick_cout_tile(cout):
    # Two tiles -> natural "parallel" split across v7x's two TensorCores (BN stats are
    # per-channel, so a Cout split needs no cross-tile reduction).  The sublane dim of a
    # block must stay a multiple of 8; fall back to a single tile otherwise.
    half = cout // 2
    if cout % 2 == 0 and half % 8 == 0:
        return half
    return cout


@jax.jit
def conv2d_batchnorm(x_nchw, w_oc, gamma_c1, beta_c1):
    """x_nchw: (N, Cin, H, W); w_oc: (Cout, Cin); gamma_c1 / beta_c1: (Cout, 1)."""
    N, Cin, H, W = x_nchw.shape
    Cout = w_oc.shape[0]
    M = N * H * W

    # NCHW -> channel-major (Cin, N*H*W).  For N == 1 this is a pure reshape: no HBM
    # transpose pass on either side of the kernel.
    if N == 1:
        x2 = x_nchw.reshape(Cin, M)
    else:
        x2 = jnp.transpose(x_nchw, (1, 0, 2, 3)).reshape(Cin, M)

    ct = _pick_cout_tile(Cout)
    grid = (Cout // ct,)

    y = pl.pallas_call(
        functools.partial(conv_bn_kernel, m_valid=M),
        out_shape=jax.ShapeDtypeStruct((Cout, M), jnp.float32),
        grid=grid,
        in_specs=[
            pl.BlockSpec((ct, Cin), lambda i: (i, 0)),   # weight: tiled over Cout
            pl.BlockSpec((Cin, M), lambda i: (0, 0)),    # activations: resident across tiles
            pl.BlockSpec((ct, 1), lambda i: (i, 0)),     # gamma tile
            pl.BlockSpec((ct, 1), lambda i: (i, 0)),     # beta tile
        ],
        out_specs=pl.BlockSpec((ct, M), lambda i: (i, 0)),
        compiler_params=pltpu.CompilerParams(
            dimension_semantics=("parallel",),
        ),
    )(w_oc, x2, gamma_c1, beta_c1)

    # Channel-major (Cout, N*H*W) is already NCHW memory order when N == 1.
    if N == 1:
        return y.reshape(1, Cout, H, W)
    return jnp.transpose(y.reshape(Cout, N, H, W), (1, 0, 2, 3))


def reference(x_nchw, w_oc, gamma, beta):
    """Pure-JAX reference mirroring PyTorch conv1x1 + BatchNorm2d (train mode)."""
    N, Cin, H, W = x_nchw.shape
    Cout = w_oc.shape[0]
    x2 = jnp.transpose(x_nchw, (0, 2, 3, 1)).reshape(-1, Cin)
    y2 = x2 @ w_oc.T
    mean = jnp.mean(y2, axis=0, keepdims=True)
    var = jnp.mean((y2 - mean) ** 2, axis=0, keepdims=True)
    y2 = (y2 - mean) / jnp.sqrt(var + EPS) * gamma[None, :] + beta[None, :]
    return jnp.transpose(y2.reshape(N, H, W, Cout), (0, 3, 1, 2))


if __name__ == "__main__":
    key = jax.random.PRNGKey(0)
    k_x, k_w = jax.random.split(key)

    N, Cin, H, W = 1, 184, 7, 7
    Cout = 1104

    x = jax.random.normal(k_x, (N, Cin, H, W), dtype=jnp.float32)
    # Conv2d weight (Cout, Cin, 1, 1) with the 1x1 taps squeezed -> (Cout, Cin).
    conv_w = jax.random.normal(k_w, (Cout, Cin), dtype=jnp.float32) * 0.05
    # BatchNorm2d default init: weight=1, bias=0
    gamma = jnp.ones((Cout,), dtype=jnp.float32)
    beta = jnp.zeros((Cout,), dtype=jnp.float32)

    # One-time parameter layout, hoisted out of the steady-state call path:
    # weight stays in its native (Cout, Cin) orientation; gamma/beta become (Cout, 1).
    w_oc = conv_w.astype(jnp.float32)
    g_c1 = gamma.reshape(Cout, 1).astype(jnp.float32)
    b_c1 = beta.reshape(Cout, 1).astype(jnp.float32)

    out = conv2d_batchnorm(x, w_oc, g_c1, b_c1)
    out = jax.block_until_ready(out)

    ref = reference(x, conv_w, gamma, beta)
    assert out.shape == (N, Cout, H, W)
    assert jnp.allclose(out, ref, atol=1e-3, rtol=1e-3)

    print("KERNEL_OK")
</pallas_src>

<mosaic_0001>
module attributes {stable_mosaic.version = 11 : i64} {
  func.func @conv_bn_kernel(%arg0: i32, %arg1: memref<552x184xf32, #tpu.memory_space<vmem>>, %arg2: memref<184x49xf32, #tpu.memory_space<vmem>>, %arg3: memref<552x1xf32, #tpu.memory_space<vmem>>, %arg4: memref<552x1xf32, #tpu.memory_space<vmem>>, %arg5: memref<552x49xf32, #tpu.memory_space<vmem>>) attributes {dimension_semantics = [#tpu.dimension_semantics<parallel>], iteration_bounds = array<i64: 2>, scalar_prefetch = 0 : i64, scratch_operands = 0 : i64, tpu.core_type = #tpu.core_type<tc>, window_params = [{transform_indices = @transform_0, window_bounds = array<i64: 552, 184>}, {pipeline_mode = #tpu.pipeline_mode<synchronous>, transform_indices = @transform_1, window_bounds = array<i64: 184, 49>}, {transform_indices = @transform_2, window_bounds = array<i64: 552, 1>}, {transform_indices = @transform_3, window_bounds = array<i64: 552, 1>}, {transform_indices = @transform_4, window_bounds = array<i64: 552, 49>}]} {
    %c0 = arith.constant 0 : index
    %c0_0 = arith.constant 0 : index
    %0 = vector.load %arg1[%c0, %c0_0] : memref<552x184xf32, #tpu.memory_space<vmem>>, vector<552x184xf32>
    %c0_1 = arith.constant 0 : index
    %c0_2 = arith.constant 0 : index
    %1 = vector.load %arg2[%c0_1, %c0_2] : memref<184x49xf32, #tpu.memory_space<vmem>>, vector<184x49xf32>
    %cst = arith.constant dense<0.000000e+00> : vector<552x49xf32>
    %2 = tpu.matmul %0, %1, %cst {dimension_numbers = #tpu.dot_dimension_numbers<[1], [0], [0], [1], [0, 0, 1, 1], [], []>} : vector<552x184xf32>, vector<184x49xf32>, vector<552x49xf32> -> vector<552x49xf32>
    %cst_3 = arith.constant dense<0.000000e+00> : vector<552xf32>
    %3 = vector.multi_reduction <add>, %2, %cst_3 [1] : vector<552x49xf32> to vector<552xf32>
    %4 = vector.shape_cast %3 : vector<552xf32> to vector<552x1xf32>
    %cst_4 = arith.constant 0.0204081628 : f32
    %5 = vector.broadcast %cst_4 : f32 to vector<552x1xf32>
    %6 = arith.mulf %4, %5 : vector<552x1xf32>
    %7 = vector.broadcast %6 : vector<552x1xf32> to vector<552x49xf32>
    %8 = arith.subf %2, %7 : vector<552x49xf32>
    %9 = arith.mulf %8, %8 : vector<552x49xf32>
    %cst_5 = arith.constant dense<0.000000e+00> : vector<552xf32>
    %10 = vector.multi_reduction <add>, %9, %cst_5 [1] : vector<552x49xf32> to vector<552xf32>
    %11 = vector.shape_cast %10 : vector<552xf32> to vector<552x1xf32>
    %cst_6 = arith.constant 0.0204081628 : f32
    %12 = vector.broadcast %cst_6 : f32 to vector<552x1xf32>
    %13 = arith.mulf %11, %12 : vector<552x1xf32>
    %cst_7 = arith.constant 1.000000e-03 : f32
    %14 = vector.broadcast %cst_7 : f32 to vector<552x1xf32>
    %15 = arith.addf %13, %14 : vector<552x1xf32>
    %16 = math.rsqrt %15 : vector<552x1xf32>
    %c0_8 = arith.constant 0 : index
    %c0_9 = arith.constant 0 : index
    %17 = vector.load %arg3[%c0_8, %c0_9] : memref<552x1xf32, #tpu.memory_space<vmem>>, vector<552x1xf32>
    %18 = arith.mulf %16, %17 : vector<552x1xf32>
    %c0_10 = arith.constant 0 : index
    %c0_11 = arith.constant 0 : index
    %19 = vector.load %arg4[%c0_10, %c0_11] : memref<552x1xf32, #tpu.memory_space<vmem>>, vector<552x1xf32>
    %20 = arith.mulf %6, %18 : vector<552x1xf32>
    %21 = arith.subf %19, %20 : vector<552x1xf32>
    %22 = vector.broadcast %18 : vector<552x1xf32> to vector<552x49xf32>
    %23 = arith.mulf %2, %22 : vector<552x49xf32>
    %24 = vector.broadcast %21 : vector<552x1xf32> to vector<552x49xf32>
    %25 = arith.addf %23, %24 : vector<552x49xf32>
    %c0_12 = arith.constant 0 : index
    %c0_13 = arith.constant 0 : index
    %26 = vector.load %arg5[%c0_12, %c0_13] : memref<552x49xf32, #tpu.memory_space<vmem>>, vector<552x49xf32>
    tpu.vector_store %arg5[%c0_12, %c0_13], %25 {strides = array<i32>} : memref<552x49xf32, #tpu.memory_space<vmem>>, vector<552x49xf32>,
    return
  }
  func.func @transform_0(%arg0: i32) -> (i32, i32) {
    %c0_i32 = arith.constant 0 : i32
    %c0_i32_0 = arith.constant 0 : i32
    return %arg0, %c0_i32 : i32, i32
  }
  func.func @transform_1(%arg0: i32) -> (i32, i32) {
    %c0_i32 = arith.constant 0 : i32
    %c0_i32_0 = arith.constant 0 : i32
    %c0_i32_1 = arith.constant 0 : i32
    return %c0_i32, %c0_i32_0 : i32, i32
  }
  func.func @transform_2(%arg0: i32) -> (i32, i32) {
    %c0_i32 = arith.constant 0 : i32
    %c0_i32_0 = arith.constant 0 : i32
    return %arg0, %c0_i32 : i32, i32
  }
  func.func @transform_3(%arg0: i32) -> (i32, i32) {
    %c0_i32 = arith.constant 0 : i32
    %c0_i32_0 = arith.constant 0 : i32
    return %arg0, %c0_i32 : i32, i32
  }
  func.func @transform_4(%arg0: i32) -> (i32, i32) {
    %c0_i32 = arith.constant 0 : i32
    %c0_i32_0 = arith.constant 0 : i32
    return %arg0, %c0_i32 : i32, i32
  }
}

</mosaic_0001>

<bundles_post_ra>
// kernel: conv2d_batchnorm.1
= control target key start
LH: loop header
LB: loop body
LE: loop exit
PB: predicated region body
PF: predicated region fallthrough
CT: control target
= control target key end

     0   :  { %s3504_s15 = smov 0   ;;  %s5311_s0 = inlined_call_operand.vmem [shape: f32[1104,184], index: 0, kind: input, shape index: {}]   ;;  %s5312_s1 = inlined_call_operand.vmem [shape: f32[184,49], index: 1, kind: input, shape index: {}]   ;;  %s5313_s2 = inlined_call_operand.vmem [shape: f32[1104,1], index: 2, kind: input, shape index: {}]   ;;  %s5314_s3 = inlined_call_operand.vmem [shape: f32[1104,1], index: 3, kind: input, shape index: {}]   ;;  %s5315_s4 = inlined_call_operand.vmem [shape: f32[1104,49], index: 4, kind: output, shape index: {}]  }
   0x1 LB: > { %s3178_s16 = sadd.s32 4294967295, %s3474_s15   ;;  %p3182_p0 = scmp.ge.s32.totalorder %s3474_s15, 1  ;;  %s3474_s15 = sphi %s3504_s15, %s14_s15  }
   0x2   : > { %p186_p1 = scmp.lt.s32.totalorder %s3474_s15, 3 }
   0x4   : > { %p187_p2 = pnand %p3182_p0, %p186_p1 }
   0x6   : > { %190 = sbr.rel (%p187_p2) target bundleno = 1001 (0x3e9), region = 36 }
   0xd   : > { %v386_v0 = vld [vmem:[%s5312_s1] sm:$0xff]  ;;  %v387_v1 = vld [vmem:[%s5312_s1 + $0x8] sm:$0xff]  ;;  %v388_v2 = vld [vmem:[%s5312_s1 + $0x10] sm:$0xff]  ;;  %s223_s23 = smul.u32 69, %s3178_s16  ;;  %v3476_v3 = vmov 0.0|0.0   ;;  %vm409_vm0 = vcmask 457728  }
   0xe   : > { %3260 = vmatprep.subr.bf16.mxu0 %v3476_v3  ;;  %3293 = vmatprep.subr.bf16.mxu1 %v3476_v3  ;;  %v3261_v4 = vpack.c.bf16 %v387_v1, %v386_v0  ;;  %v389_v5 = vld [vmem:[%s5312_s1 + $0x18] sm:$0xff]  ;;  %v390_v7 = vld [vmem:[%s5312_s1 + $0x20] sm:$0xff]  ;;  %v391_v8 = vld [vmem:[%s5312_s1 + $0x28] sm:$0xff]  ;;  %v3477_v36 = vmov 0.0   ;;  %vm1027_vm1 = vcmask 400384  }
   0xf   : > { %p224_p3 = scmp.lt.s32.totalorder %s223_s23, 137  ;;  %v3264_v6 = vpack.c.bf16 %v389_v5, %v388_v2  ;;  %v3267_v9 = vpack.c.bf16 %v391_v8, %v390_v7  ;;  %v392_v10 = vld [vmem:[%s5312_s1 + $0x30] sm:$0xff]  ;;  %v393_v11 = vld [vmem:[%s5312_s1 + $0x38] sm:$0xff]  ;;  %v394_v15 = vld [vmem:[%s5312_s1 + $0x40] sm:$0xff] }
  0x10   : > { %3262 = vmatpush1.bf16.msra.mxu0 %v3261_v4  ;;  %3305 = vmatpush1.bf16.msra.mxu1 %v3261_v4  ;;  %v3270_v14 = vpack.c.bf16 %v393_v11, %v392_v10  ;;  %v395_v16 = vld [vmem:[%s5312_s1 + $0x48] sm:$0xff]  ;;  %v396_v18 = vld [vmem:[%s5312_s1 + $0x50] sm:$0xff]  ;;  %v397_v19 = vld [vmem:[%s5312_s1 + $0x58] sm:$0xff] }
  0x11   : > { %3263 = vmatprep.subr.bf16.mxu0 %v3476_v3  ;;  %3294 = vmatprep.subr.bf16.mxu1 %v3476_v3  ;;  %s5656_s23 = smov (!%p224_p3, %s223_s23), 137  ;;  %v3273_v17 = vpack.c.bf16 %v395_v16, %v394_v15  ;;  %v3276_v20 = vpack.c.bf16 %v397_v19, %v396_v18  ;;  %v398_v21 = vld [vmem:[%s5312_s1 + $0x60] sm:$0xff]  ;;  %v399_v22 = vld [vmem:[%s5312_s1 + $0x68] sm:$0xff]  ;;  %v400_v24 = vld [vmem:[%s5312_s1 + $0x70] sm:$0xff] }
  0x12   : > { %s3259_s30 = sshll.u32 %s5656_s23, 4  ;;  %v3279_v23 = vpack.c.bf16 %v399_v22, %v398_v21  ;;  %v401_v25 = vld [vmem:[%s5312_s1 + $0x78] sm:$0xff]  ;;  %v402_v27 = vld [vmem:[%s5312_s1 + $0x80] sm:$0xff]  ;;  %v403_v28 = vld [vmem:[%s5312_s1 + $0x88] sm:$0xff] }
  0x13   : > { %s3543_s9 = scalar_lea.vmem %s5311_s0, %s3259_s30  ;;  %v3282_v26 = vpack.c.bf16 %v401_v25, %v400_v24  ;;  %v3285_v29 = vpack.c.bf16 %v403_v28, %v402_v27  ;;  %v404_v30 = vld [vmem:[%s5312_s1 + $0x90] sm:$0xff]  ;;  %v405_v31 = vld [vmem:[%s5312_s1 + $0x98] sm:$0xff]  ;;  %v406_v33 = vld [vmem:[%s5312_s1 + $0xa0] sm:$0xff] }
  0x14   : > { %3265 = vmatpush1.bf16.msra.mxu0 %v3264_v6  ;;  %3306 = vmatpush1.bf16.msra.mxu1 %v3264_v6  ;;  %v249_v12 = vld [vmem:[%s3543_s9 + $0x8] sm:$0xff]  ;;  %v319_v13 = vld [vmem:[%s3543_s9 + $0x238] sm:$0xff]  ;;  %v3288_v32 = vpack.c.bf16 %v405_v31, %v404_v30  ;;  %v408_v37 = vld [vmem:[%s5312_s1 + $0xb0] sm:$0xff] }
  0x15   : > { %3266 = vmatprep.subr.bf16.mxu0 %v3476_v3  ;;  %3295 = vmatprep.subr.bf16.mxu1 %v3476_v3  ;;  %v407_v34 = vld [vmem:[%s5312_s1 + $0xa8] sm:$0xff]  ;;  %v248_v38 = vld [vmem:[%s3543_s9] sm:$0xff]  ;;  %v318_v39 = vld [vmem:[%s3543_s9 + $0x230] sm:$0xff] }
  0x16   : > { %3188 = vmatprep.mubr.msk.f32.mxu0 %vm409_vm0, %v249_v12  ;;  %3223 = vmatprep.mubr.msk.f32.mxu1 %vm409_vm0, %v319_v13  ;;  %v3291_v35 = vpack.c.bf16 %v407_v34, %v406_v33  ;;  %v251_v40 = vld [vmem:[%s3543_s9 + $0x18] sm:$0xff]  ;;  %v321_v41 = vld [vmem:[%s3543_s9 + $0x248] sm:$0xff]  ;;  %v250_v42 = vld [vmem:[%s3543_s9 + $0x10] sm:$0xff] }
  0x17   : > { %v320_v43 = vld [vmem:[%s3543_s9 + $0x240] sm:$0xff]  ;;  %v253_v44 = vld [vmem:[%s3543_s9 + $0x28] sm:$0xff]  ;;  %v323_v45 = vld [vmem:[%s3543_s9 + $0x258] sm:$0xff] }
  0x18   : > { %3268 = vmatpush1.bf16.msra.mxu0 %v3267_v9  ;;  %3307 = vmatpush1.bf16.msra.mxu1 %v3267_v9  ;;  %v252_v46 = vld [vmem:[%s3543_s9 + $0x20] sm:$0xff]  ;;  %v322_v47 = vld [vmem:[%s3543_s9 + $0x250] sm:$0xff]  ;;  %v255_v48 = vld [vmem:[%s3543_s9 + $0x38] sm:$0xff] }
  0x19   : > { %3269 = vmatprep.subr.bf16.mxu0 %v3476_v3  ;;  %3296 = vmatprep.subr.bf16.mxu1 %v3476_v3  ;;  %v325_v49 = vld [vmem:[%s3543_s9 + $0x268] sm:$0xff]  ;;  %v254_v50 = vld [vmem:[%s3543_s9 + $0x30] sm:$0xff]  ;;  %v324_v51 = vld [vmem:[%s3543_s9 + $0x260] sm:$0xff] }
  0x1a   : > { %v257_v52 = vld [vmem:[%s3543_s9 + $0x48] sm:$0xff]  ;;  %v327_v53 = vld [vmem:[%s3543_s9 + $0x278] sm:$0xff]  ;;  %v256_v54 = vld [vmem:[%s3543_s9 + $0x40] sm:$0xff] }
  0x1b   : > { %v326_v55 = vld [vmem:[%s3543_s9 + $0x270] sm:$0xff]  ;;  %v259_v56 = vld [vmem:[%s3543_s9 + $0x58] sm:$0xff]  ;;  %v329_v57 = vld [vmem:[%s3543_s9 + $0x288] sm:$0xff] }
  0x1c   : > { %3271 = vmatpush1.bf16.msra.mxu0 %v3270_v14  ;;  %3308 = vmatpush1.bf16.msra.mxu1 %v3270_v14  ;;  %v258_v58 = vld [vmem:[%s3543_s9 + $0x50] sm:$0xff]  ;;  %v328_v59 = vld [vmem:[%s3543_s9 + $0x280] sm:$0xff]  ;;  %v261_v60 = vld [vmem:[%s3543_s9 + $0x68] sm:$0xff] }
  0x1d   : > { %3272 = vmatprep.subr.bf16.mxu0 %v3476_v3  ;;  %3297 = vmatprep.subr.bf16.mxu1 %v3476_v3  ;;  %v331_v61 = vld [vmem:[%s3543_s9 + $0x298] sm:$0xff]  ;;  %v260_v62 = vld [vmem:[%s3543_s9 + $0x60] sm:$0xff]  ;;  %v330_v63 = vld [vmem:[%s3543_s9 + $0x290] sm:$0xff] }
  0x1e   : > { %v263_v0 = vld [vmem:[%s3543_s9 + $0x78] sm:$0xff]  ;;  %v333_v1 = vld [vmem:[%s3543_s9 + $0x2a8] sm:$0xff]  ;;  %v262_v2 = vld [vmem:[%s3543_s9 + $0x70] sm:$0xff] }
  0x1f   : > { %v265_v4 = vld [vmem:[%s3543_s9 + $0x88] sm:$0xff]  ;;  %v335_v5 = vld [vmem:[%s3543_s9 + $0x2b8] sm:$0xff]  ;;  %v264_v6 = vld [vmem:[%s3543_s9 + $0x80] sm:$0xff] }
  0x20   : > { %3274 = vmatpush1.bf16.msra.mxu0 %v3273_v17  ;;  %3309 = vmatpush1.bf16.msra.mxu1 %v3273_v17  ;;  %v334_v7 = vld [vmem:[%s3543_s9 + $0x2b0] sm:$0xff]  ;;  %v267_v8 = vld [vmem:[%s3543_s9 + $0x98] sm:$0xff]  ;;  %v337_v9 = vld [vmem:[%s3543_s9 + $0x2c8] sm:$0xff] }
  0x21   : > { %3275 = vmatprep.subr.bf16.mxu0 %v3476_v3  ;;  %3298 = vmatprep.subr.bf16.mxu1 %v3476_v3  ;;  %v266_v10 = vld [vmem:[%s3543_s9 + $0x90] sm:$0xff]  ;;  %v336_v11 = vld [vmem:[%s3543_s9 + $0x2c0] sm:$0xff]  ;;  %v269_v12 = vld [vmem:[%s3543_s9 + $0xa8] sm:$0xff] }
  0x22   : > { %v339_v13 = vld [vmem:[%s3543_s9 + $0x2d8] sm:$0xff]  ;;  %v268_v14 = vld [vmem:[%s3543_s9 + $0xa0] sm:$0xff]  ;;  %v338_v15 = vld [vmem:[%s3543_s9 + $0x2d0] sm:$0xff] }
  0x23   : > { %v271_v16 = vld [vmem:[%s3543_s9 + $0xb8] sm:$0xff]  ;;  %v341_v17 = vld [vmem:[%s3543_s9 + $0x2e8] sm:$0xff]  ;;  %v270_v18 = vld [vmem:[%s3543_s9 + $0xb0] sm:$0xff] }
  0x24   : > { %3277 = vmatpush1.bf16.msra.mxu0 %v3276_v20  ;;  %3310 = vmatpush1.bf16.msra.mxu1 %v3276_v20  ;;  %v340_v19 = vld [vmem:[%s3543_s9 + $0x2e0] sm:$0xff]  ;;  %v273_v20 = vld [vmem:[%s3543_s9 + $0xc8] sm:$0xff]  ;;  %v343_v21 = vld [vmem:[%s3543_s9 + $0x2f8] sm:$0xff] }
  0x25   : > { %3278 = vmatprep.subr.bf16.mxu0 %v3476_v3  ;;  %3299 = vmatprep.subr.bf16.mxu1 %v3476_v3  ;;  %v272_v22 = vld [vmem:[%s3543_s9 + $0xc0] sm:$0xff]  ;;  %v275_v24 = vld [vmem:[%s3543_s9 + $0xd8] sm:$0xff]  ;;  %v345_v25 = vld [vmem:[%s3543_s9 + $0x308] sm:$0xff] }
  0x26   : > { %v344_v27 = vld [vmem:[%s3543_s9 + $0x300] sm:$0xff]  ;;  %v277_v28 = vld [vmem:[%s3543_s9 + $0xe8] sm:$0xff]  ;;  %v346_v31 = vld [vmem:[%s3543_s9 + $0x310] sm:$0xff] }
  0x27   : > { %v276_v30 = vld [vmem:[%s3543_s9 + $0xe0] sm:$0xff]  ;;  %v349_v33 = vld [vmem:[%s3543_s9 + $0x328] sm:$0xff]  ;;  %v278_v34 = vld [vmem:[%s3543_s9 + $0xf0] sm:$0xff] }
  0x28   : > { %3280 = vmatpush1.bf16.msra.mxu0 %v3279_v23  ;;  %3311 = vmatpush1.bf16.msra.mxu1 %v3279_v23  ;;  %v342_v23 = vld [vmem:[%s3543_s9 + $0x2f0] sm:$0xff] }
  0x29   : > { %3281 = vmatprep.subr.bf16.mxu0 %v3476_v3  ;;  %3300 = vmatprep.subr.bf16.mxu1 %v3476_v3 }
  0x2c   : > { %3283 = vmatpush1.bf16.msra.mxu0 %v3282_v26  ;;  %3312 = vmatpush1.bf16.msra.mxu1 %v3282_v26  ;;  %v274_v26 = vld [vmem:[%s3543_s9 + $0xd0] sm:$0xff] }
  0x2d   : > { %3284 = vmatprep.subr.bf16.mxu0 %v3476_v3  ;;  %3301 = vmatprep.subr.bf16.mxu1 %v3476_v3 }
  0x30   : > { %3286 = vmatpush1.bf16.msra.mxu0 %v3285_v29  ;;  %3313 = vmatpush1.bf16.msra.mxu1 %v3285_v29  ;;  %v347_v29 = vld [vmem:[%s3543_s9 + $0x318] sm:$0xff] }
  0x31   : > { %3287 = vmatprep.subr.bf16.mxu0 %v3476_v3  ;;  %3302 = vmatprep.subr.bf16.mxu1 %v3476_v3 }
  0x34   : > { %3289 = vmatpush1.bf16.msra.mxu0 %v3288_v32  ;;  %3314 = vmatpush1.bf16.msra.mxu1 %v3288_v32  ;;  %v279_v32 = vld [vmem:[%s3543_s9 + $0xf8] sm:$0xff] }
  0x35   : > { %3290 = vmatprep.subr.bf16.mxu0 %v3476_v3  ;;  %3303 = vmatprep.subr.bf16.mxu1 %v3476_v3  ;;  %v332_v3 = vld [vmem:[%s3543_s9 + $0x2a0] sm:$0xff] }
  0x38   : > { %3292 = vmatpush1.bf16.msra.mxu0 %v3291_v35  ;;  %3315 = vmatpush1.bf16.msra.mxu1 %v3291_v35  ;;  %v348_v35 = vld [vmem:[%s3543_s9 + $0x320] sm:$0xff] }
  0x39   : > { %661 = vmatprep.subr.mxu0 %v3477_v36  ;;  %3304 = vmatprep.subr.mxu1 %v3477_v36  ;;  %v281_v36 = vld [vmem:[%s3543_s9 + $0x108] sm:$0xff] }
  0x3c   : > { %662 = vmatpush1.msra.mxu0 %v408_v37  ;;  %3316 = vmatpush1.msra.mxu1 %v408_v37  ;;  %v351_v37 = vld [vmem:[%s3543_s9 + $0x338] sm:$0xff] }
  0x3d   : > { %682 = vmatmul.mubr.f32.vlgmr.msra.gmra.mrb[0].mxu0 %v248_v38  ;;  %857 = vmatmul.mubr.f32.vlgmr.msra.gmra.mrb[0].mxu1 %v318_v39  ;;  %v280_v38 = vld [vmem:[%s3543_s9 + $0x100] sm:$0xff]  ;;  %v350_v39 = vld [vmem:[%s3543_s9 + $0x330] sm:$0xff] }
  0x3e   : > { %3189 = vmatprep.mubr.msk.f32.mxu0 %vm409_vm0, %v251_v40  ;;  %3224 = vmatprep.mubr.msk.f32.mxu1 %vm409_vm0, %v321_v41  ;;  %v283_v40 = vld [vmem:[%s3543_s9 + $0x118] sm:$0xff]  ;;  %v353_v41 = vld [vmem:[%s3543_s9 + $0x348] sm:$0xff] }
  0x41   : > { %687 = vmatmul.mubr.f32.gmra.mrb[2].mxu0 %v250_v42  ;;  %862 = vmatmul.mubr.f32.gmra.mrb[2].mxu1 %v320_v43  ;;  %v282_v42 = vld [vmem:[%s3543_s9 + $0x110] sm:$0xff]  ;;  %v352_v43 = vld [vmem:[%s3543_s9 + $0x340] sm:$0xff] }
  0x42   : > { %3190 = vmatprep.mubr.msk.f32.mxu0 %vm409_vm0, %v253_v44  ;;  %3225 = vmatprep.mubr.msk.f32.mxu1 %vm409_vm0, %v323_v45  ;;  %v285_v44 = vld [vmem:[%s3543_s9 + $0x128] sm:$0xff]  ;;  %v355_v45 = vld [vmem:[%s3543_s9 + $0x358] sm:$0xff] }
  0x45   : > { %692 = vmatmul.mubr.f32.gmra.mrb[4].mxu0 %v252_v46  ;;  %867 = vmatmul.mubr.f32.gmra.mrb[4].mxu1 %v322_v47  ;;  %v284_v46 = vld [vmem:[%s3543_s9 + $0x120] sm:$0xff]  ;;  %v354_v47 = vld [vmem:[%s3543_s9 + $0x350] sm:$0xff] }
  0x46   : > { %3191 = vmatprep.mubr.msk.f32.mxu0 %vm409_vm0, %v255_v48  ;;  %3226 = vmatprep.mubr.msk.f32.mxu1 %vm409_vm0, %v325_v49  ;;  %v287_v48 = vld [vmem:[%s3543_s9 + $0x138] sm:$0xff]  ;;  %v357_v49 = vld [vmem:[%s3543_s9 + $0x368] sm:$0xff] }
  0x49   : > { %697 = vmatmul.mubr.f32.gmra.mrb[6].mxu0 %v254_v50  ;;  %872 = vmatmul.mubr.f32.gmra.mrb[6].mxu1 %v324_v51  ;;  %v286_v50 = vld [vmem:[%s3543_s9 + $0x130] sm:$0xff]  ;;  %v356_v51 = vld [vmem:[%s3543_s9 + $0x360] sm:$0xff] }
  0x4a   : > { %3192 = vmatprep.mubr.msk.f32.mxu0 %vm409_vm0, %v257_v52  ;;  %3227 = vmatprep.mubr.msk.f32.mxu1 %vm409_vm0, %v327_v53  ;;  %v289_v52 = vld [vmem:[%s3543_s9 + $0x148] sm:$0xff]  ;;  %v359_v53 = vld [vmem:[%s3543_s9 + $0x378] sm:$0xff] }
  0x4d   : > { %702 = vmatmul.mubr.f32.gmra.mrb[8].mxu0 %v256_v54  ;;  %877 = vmatmul.mubr.f32.gmra.mrb[8].mxu1 %v326_v55  ;;  %v288_v54 = vld [vmem:[%s3543_s9 + $0x140] sm:$0xff]  ;;  %v358_v55 = vld [vmem:[%s3543_s9 + $0x370] sm:$0xff] }
  0x4e   : > { %3193 = vmatprep.mubr.msk.f32.mxu0 %vm409_vm0, %v259_v56  ;;  %3228 = vmatprep.mubr.msk.f32.mxu1 %vm409_vm0, %v329_v57  ;;  %v291_v56 = vld [vmem:[%s3543_s9 + $0x158] sm:$0xff]  ;;  %v361_v57 = vld [vmem:[%s3543_s9 + $0x388] sm:$0xff] }
  0x51   : > { %707 = vmatmul.mubr.f32.gmra.mrb[10].mxu0 %v258_v58  ;;  %882 = vmatmul.mubr.f32.gmra.mrb[10].mxu1 %v328_v59  ;;  %v290_v58 = vld [vmem:[%s3543_s9 + $0x150] sm:$0xff]  ;;  %v360_v59 = vld [vmem:[%s3543_s9 + $0x380] sm:$0xff] }
  0x52   : > { %3194 = vmatprep.mubr.msk.f32.mxu0 %vm409_vm0, %v261_v60  ;;  %3229 = vmatprep.mubr.msk.f32.mxu1 %vm409_vm0, %v331_v61  ;;  %v293_v60 = vld [vmem:[%s3543_s9 + $0x168] sm:$0xff]  ;;  %v363_v61 = vld [vmem:[%s3543_s9 + $0x398] sm:$0xff] }
  0x55   : > { %712 = vmatmul.mubr.f32.gmra.mrb[12].mxu0 %v260_v62  ;;  %887 = vmatmul.mubr.f32.gmra.mrb[12].mxu1 %v330_v63  ;;  %v292_v62 = vld [vmem:[%s3543_s9 + $0x160] sm:$0xff]  ;;  %v362_v63 = vld [vmem:[%s3543_s9 + $0x390] sm:$0xff] }
  0x56   : > { %3195 = vmatprep.mubr.msk.f32.mxu0 %vm409_vm0, %v263_v0  ;;  %3230 = vmatprep.mubr.msk.f32.mxu1 %vm409_vm0, %v333_v1  ;;  %v295_v0 = vld [vmem:[%s3543_s9 + $0x178] sm:$0xff]  ;;  %v365_v1 = vld [vmem:[%s3543_s9 + $0x3a8] sm:$0xff] }
  0x59   : > { %717 = vmatmul.mubr.f32.gmra.mrb[14].mxu0 %v262_v2  ;;  %892 = vmatmul.mubr.f32.gmra.mrb[14].mxu1 %v332_v3  ;;  %v294_v2 = vld [vmem:[%s3543_s9 + $0x170] sm:$0xff]  ;;  %v364_v3 = vld [vmem:[%s3543_s9 + $0x3a0] sm:$0xff] }
  0x5a   : > { %3196 = vmatprep.mubr.msk.f32.mxu0 %vm409_vm0, %v265_v4  ;;  %3231 = vmatprep.mubr.msk.f32.mxu1 %vm409_vm0, %v335_v5  ;;  %v297_v4 = vld [vmem:[%s3543_s9 + $0x188] sm:$0xff]  ;;  %v367_v5 = vld [vmem:[%s3543_s9 + $0x3b8] sm:$0xff] }
  0x5d   : > { %722 = vmatmul.mubr.f32.gmra.mrb[16].mxu0 %v264_v6  ;;  %897 = vmatmul.mubr.f32.gmra.mrb[16].mxu1 %v334_v7  ;;  %v296_v6 = vld [vmem:[%s3543_s9 + $0x180] sm:$0xff]  ;;  %v366_v7 = vld [vmem:[%s3543_s9 + $0x3b0] sm:$0xff] }
  0x5e   : > { %3197 = vmatprep.mubr.msk.f32.mxu0 %vm409_vm0, %v267_v8  ;;  %3232 = vmatprep.mubr.msk.f32.mxu1 %vm409_vm0, %v337_v9  ;;  %v299_v8 = vld [vmem:[%s3543_s9 + $0x198] sm:$0xff]  ;;  %v369_v9 = vld [vmem:[%s3543_s9 + $0x3c8] sm:$0xff] }
  0x61   : > { %727 = vmatmul.mubr.f32.gmra.mrb[18].mxu0 %v266_v10  ;;  %902 = vmatmul.mubr.f32.gmra.mrb[18].mxu1 %v336_v11  ;;  %v298_v10 = vld [vmem:[%s3543_s9 + $0x190] sm:$0xff]  ;;  %v368_v11 = vld [vmem:[%s3543_s9 + $0x3c0] sm:$0xff] }
  0x62   : > { %3198 = vmatprep.mubr.msk.f32.mxu0 %vm409_vm0, %v269_v12  ;;  %3233 = vmatprep.mubr.msk.f32.mxu1 %vm409_vm0, %v339_v13  ;;  %v301_v12 = vld [vmem:[%s3543_s9 + $0x1a8] sm:$0xff]  ;;  %v371_v13 = vld [vmem:[%s3543_s9 + $0x3d8] sm:$0xff] }
  0x65   : > { %732 = vmatmul.mubr.f32.gmra.mrb[20].mxu0 %v268_v14  ;;  %907 = vmatmul.mubr.f32.gmra.mrb[20].mxu1 %v338_v15  ;;  %v300_v14 = vld [vmem:[%s3543_s9 + $0x1a0] sm:$0xff]  ;;  %v370_v15 = vld [vmem:[%s3543_s9 + $0x3d0] sm:$0xff] }
  0x66   : > { %3199 = vmatprep.mubr.msk.f32.mxu0 %vm409_vm0, %v271_v16  ;;  %3234 = vmatprep.mubr.msk.f32.mxu1 %vm409_vm0, %v341_v17  ;;  %v303_v16 = vld [vmem:[%s3543_s9 + $0x1b8] sm:$0xff]  ;;  %v373_v17 = vld [vmem:[%s3543_s9 + $0x3e8] sm:$0xff] }
  0x69   : > { %737 = vmatmul.mubr.f32.gmra.mrb[22].mxu0 %v270_v18  ;;  %912 = vmatmul.mubr.f32.gmra.mrb[22].mxu1 %v340_v19  ;;  %v302_v18 = vld [vmem:[%s3543_s9 + $0x1b0] sm:$0xff]  ;;  %v372_v19 = vld [vmem:[%s3543_s9 + $0x3e0] sm:$0xff] }
  0x6a   : > { %3200 = vmatprep.mubr.msk.f32.mxu0 %vm409_vm0, %v273_v20  ;;  %3235 = vmatprep.mubr.msk.f32.mxu1 %vm409_vm0, %v343_v21  ;;  %v305_v20 = vld [vmem:[%s3543_s9 + $0x1c8] sm:$0xff]  ;;  %v375_v21 = vld [vmem:[%s3543_s9 + $0x3f8] sm:$0xff] }
  0x6d   : > { %742 = vmatmul.mubr.f32.gmra.mrb[24].mxu0 %v272_v22  ;;  %917 = vmatmul.mubr.f32.gmra.mrb[24].mxu1 %v342_v23  ;;  %v304_v22 = vld [vmem:[%s3543_s9 + $0x1c0] sm:$0xff]  ;;  %v374_v23 = vld [vmem:[%s3543_s9 + $0x3f0] sm:$0xff] }
  0x6e   : > { %3201 = vmatprep.mubr.msk.f32.mxu0 %vm409_vm0, %v275_v24  ;;  %3236 = vmatprep.mubr.msk.f32.mxu1 %vm409_vm0, %v345_v25  ;;  %v307_v24 = vld [vmem:[%s3543_s9 + $0x1d8] sm:$0xff]  ;;  %v377_v25 = vld [vmem:[%s3543_s9 + $0x408] sm:$0xff] }
  0x71   : > { %747 = vmatmul.mubr.f32.gmra.mrb[26].mxu0 %v274_v26  ;;  %922 = vmatmul.mubr.f32.gmra.mrb[26].mxu1 %v344_v27  ;;  %v306_v26 = vld [vmem:[%s3543_s9 + $0x1d0] sm:$0xff]  ;;  %v376_v27 = vld [vmem:[%s3543_s9 + $0x400] sm:$0xff] }
  0x72   : > { %3202 = vmatprep.mubr.msk.f32.mxu0 %vm409_vm0, %v277_v28  ;;  %3237 = vmatprep.mubr.msk.f32.mxu1 %vm409_vm0, %v347_v29  ;;  %v309_v28 = vld [vmem:[%s3543_s9 + $0x1e8] sm:$0xff]  ;;  %v379_v29 = vld [vmem:[%s3543_s9 + $0x418] sm:$0xff] }
  0x75   : > { %752 = vmatmul.mubr.f32.gmra.mrb[28].mxu0 %v276_v30  ;;  %927 = vmatmul.mubr.f32.gmra.mrb[28].mxu1 %v346_v31  ;;  %v308_v30 = vld [vmem:[%s3543_s9 + $0x1e0] sm:$0xff]  ;;  %v378_v31 = vld [vmem:[%s3543_s9 + $0x410] sm:$0xff] }
  0x76   : > { %3203 = vmatprep.mubr.msk.f32.mxu0 %vm409_vm0, %v279_v32  ;;  %3238 = vmatprep.mubr.msk.f32.mxu1 %vm409_vm0, %v349_v33  ;;  %v311_v32 = vld [vmem:[%s3543_s9 + $0x1f8] sm:$0xff]  ;;  %v381_v33 = vld [vmem:[%s3543_s9 + $0x428] sm:$0xff] }
  0x79   : > { %757 = vmatmul.mubr.f32.gmra.mrb[30].mxu0 %v278_v34  ;;  %932 = vmatmul.mubr.f32.gmra.mrb[30].mxu1 %v348_v35  ;;  %v310_v34 = vld [vmem:[%s3543_s9 + $0x1f0] sm:$0xff]  ;;  %v380_v35 = vld [vmem:[%s3543_s9 + $0x420] sm:$0xff] }
  0x7a   : > { %3204 = vmatprep.mubr.msk.f32.mxu0 %vm409_vm0, %v281_v36  ;;  %3239 = vmatprep.mubr.msk.f32.mxu1 %vm409_vm0, %v351_v37  ;;  %v313_v36 = vld [vmem:[%s3543_s9 + $0x208] sm:$0xff]  ;;  %v383_v37 = vld [vmem:[%s3543_s9 + $0x438] sm:$0xff] }
  0x7d   : > { %762 = vmatmul.mubr.f32.gmra.mrb[32].mxu0 %v280_v38  ;;  %937 = vmatmul.mubr.f32.gmra.mrb[32].mxu1 %v350_v39  ;;  %v312_v38 = vld [vmem:[%s3543_s9 + $0x200] sm:$0xff]  ;;  %v382_v39 = vld [vmem:[%s3543_s9 + $0x430] sm:$0xff] }
  0x7e   : > { %3205 = vmatprep.mubr.msk.f32.mxu0 %vm409_vm0, %v283_v40  ;;  %3240 = vmatprep.mubr.msk.f32.mxu1 %vm409_vm0, %v353_v41  ;;  %v315_v40 = vld [vmem:[%s3543_s9 + $0x218] sm:$0xff]  ;;  %v385_v41 = vld [vmem:[%s3543_s9 + $0x448] sm:$0xff] }
  0x81   : > { %767 = vmatmul.mubr.f32.gmra.mrb[34].mxu0 %v282_v42  ;;  %942 = vmatmul.mubr.f32.gmra.mrb[34].mxu1 %v352_v43  ;;  %v314_v42 = vld [vmem:[%s3543_s9 + $0x210] sm:$0xff]  ;;  %v384_v43 = vld [vmem:[%s3543_s9 + $0x440] sm:$0xff] }
  0x82   : > { %3206 = vmatprep.mubr.msk.f32.mxu0 %vm409_vm0, %v285_v44  ;;  %3241 = vmatprep.mubr.msk.f32.mxu1 %vm409_vm0, %v355_v45  ;;  %v317_v44 = vld [vmem:[%s3543_s9 + $0x228] sm:$0xff]  ;;  %v316_v45 = vld [vmem:[%s3543_s9 + $0x220] sm:$0xff]  ;;  %s4440_s9 = sshll.u32 %s5656_s23, 3 }
  0x83   : > { %s4446_s22 = scalar_lea.vmem %s5313_s2, %s4440_s9  ;;  %s4455_s25 = scalar_lea.vmem %s5314_s3, %s4440_s9 }
  0x84   : > { %s4782_s28 = scalar_lea.vmem %s5315_s4, %s4440_s9 }
  0x85   : > { %772 = vmatmul.mubr.f32.gmra.mrb[36].mxu0 %v284_v46  ;;  %947 = vmatmul.mubr.f32.gmra.mrb[36].mxu1 %v354_v47 }
  0x86   : > { %3207 = vmatprep.mubr.msk.f32.mxu0 %vm409_vm0, %v287_v48  ;;  %3242 = vmatprep.mubr.msk.f32.mxu1 %vm409_vm0, %v357_v49 }
  0x89   : > { %777 = vmatmul.mubr.f32.gmra.mrb[38].mxu0 %v286_v50  ;;  %952 = vmatmul.mubr.f32.gmra.mrb[38].mxu1 %v356_v51 }
  0x8a   : > { %3208 = vmatprep.mubr.msk.f32.mxu0 %vm409_vm0, %v289_v52  ;;  %3243 = vmatprep.mubr.msk.f32.mxu1 %vm409_vm0, %v359_v53 }
  0x8d   : > { %782 = vmatmul.mubr.f32.gmra.mrb[40].mxu0 %v288_v54  ;;  %957 = vmatmul.mubr.f32.gmra.mrb[40].mxu1 %v358_v55 }
  0x8e   : > { %3209 = vmatprep.mubr.msk.f32.mxu0 %vm409_vm0, %v291_v56  ;;  %3244 = vmatprep.mubr.msk.f32.mxu1 %vm409_vm0, %v361_v57 }
  0x91   : > { %787 = vmatmul.mubr.f32.gmra.mrb[42].mxu0 %v290_v58  ;;  %962 = vmatmul.mubr.f32.gmra.mrb[42].mxu1 %v360_v59 }
  0x92   : > { %3210 = vmatprep.mubr.msk.f32.mxu0 %vm409_vm0, %v293_v60  ;;  %3245 = vmatprep.mubr.msk.f32.mxu1 %vm409_vm0, %v363_v61 }
  0x95   : > { %792 = vmatmul.mubr.f32.gmra.mrb[44].mxu0 %v292_v62  ;;  %967 = vmatmul.mubr.f32.gmra.mrb[44].mxu1 %v362_v63 }
  0x96   : > { %3211 = vmatprep.mubr.msk.f32.mxu0 %vm409_vm0, %v295_v0  ;;  %3246 = vmatprep.mubr.msk.f32.mxu1 %vm409_vm0, %v365_v1 }
  0x99   : > { %797 = vmatmul.mubr.f32.gmra.mrb[46].mxu0 %v294_v2  ;;  %972 = vmatmul.mubr.f32.gmra.mrb[46].mxu1 %v364_v3 }
  0x9a   : > { %3212 = vmatprep.mubr.msk.f32.mxu0 %vm409_vm0, %v297_v4  ;;  %3247 = vmatprep.mubr.msk.f32.mxu1 %vm409_vm0, %v367_v5 }
  0x9d   : > { %802 = vmatmul.mubr.f32.gmra.mrb[48].mxu0 %v296_v6  ;;  %977 = vmatmul.mubr.f32.gmra.mrb[48].mxu1 %v366_v7 }
  0x9e   : > { %3213 = vmatprep.mubr.msk.f32.mxu0 %vm409_vm0, %v299_v8  ;;  %3248 = vmatprep.mubr.msk.f32.mxu1 %vm409_vm0, %v369_v9 }
  0xa1   : > { %807 = vmatmul.mubr.f32.gmra.mrb[50].mxu0 %v298_v10  ;;  %982 = vmatmul.mubr.f32.gmra.mrb[50].mxu1 %v368_v11 }
  0xa2   : > { %3214 = vmatprep.mubr.msk.f32.mxu0 %vm409_vm0, %v301_v12  ;;  %3249 = vmatprep.mubr.msk.f32.mxu1 %vm409_vm0, %v371_v13 }
  0xa5   : > { %812 = vmatmul.mubr.f32.gmra.mrb[52].mxu0 %v300_v14  ;;  %987 = vmatmul.mubr.f32.gmra.mrb[52].mxu1 %v370_v15 }
  0xa6   : > { %3215 = vmatprep.mubr.msk.f32.mxu0 %vm409_vm0, %v303_v16  ;;  %3250 = vmatprep.mubr.msk.f32.mxu1 %vm409_vm0, %v373_v17 }
  0xa9   : > { %817 = vmatmul.mubr.f32.gmra.mrb[54].mxu0 %v302_v18  ;;  %992 = vmatmul.mubr.f32.gmra.mrb[54].mxu1 %v372_v19 }
  0xaa   : > { %3216 = vmatprep.mubr.msk.f32.mxu0 %vm409_vm0, %v305_v20  ;;  %3251 = vmatprep.mubr.msk.f32.mxu1 %vm409_vm0, %v375_v21 }
  0xad   : > { %822 = vmatmul.mubr.f32.gmra.mrb[56].mxu0 %v304_v22  ;;  %997 = vmatmul.mubr.f32.gmra.mrb[56].mxu1 %v374_v23 }
  0xae   : > { %3217 = vmatprep.mubr.msk.f32.mxu0 %vm409_vm0, %v307_v24  ;;  %3252 = vmatprep.mubr.msk.f32.mxu1 %vm409_vm0, %v377_v25 }
  0xb1   : > { %827 = vmatmul.mubr.f32.gmra.mrb[58].mxu0 %v306_v26  ;;  %1002 = vmatmul.mubr.f32.gmra.mrb[58].mxu1 %v376_v27 }
  0xb2   : > { %3218 = vmatprep.mubr.msk.f32.mxu0 %vm409_vm0, %v309_v28  ;;  %3253 = vmatprep.mubr.msk.f32.mxu1 %vm409_vm0, %v379_v29 }
  0xb5   : > { %832 = vmatmul.mubr.f32.gmra.mrb[60].mxu0 %v308_v30  ;;  %1007 = vmatmul.mubr.f32.gmra.mrb[60].mxu1 %v378_v31 }
  0xb6   : > { %3219 = vmatprep.mubr.msk.f32.mxu0 %vm409_vm0, %v311_v32  ;;  %3254 = vmatprep.mubr.msk.f32.mxu1 %vm409_vm0, %v381_v33 }
  0xb9   : > { %837 = vmatmul.mubr.f32.gmra.mrb[62].mxu0 %v310_v34  ;;  %1012 = vmatmul.mubr.f32.gmra.mrb[62].mxu1 %v380_v35 }
  0xba   : > { %3220 = vmatprep.mubr.msk.f32.mxu0 %vm409_vm0, %v313_v36  ;;  %3255 = vmatprep.mubr.msk.f32.mxu1 %vm409_vm0, %v383_v37 }
  0xbd   : > { %842 = vmatmul.mubr.f32.gmra.mrb[64].mxu0 %v312_v38  ;;  %1017 = vmatmul.mubr.f32.gmra.mrb[64].mxu1 %v382_v39 }
  0xbe   : > { %3221 = vmatprep.mubr.msk.f32.mxu0 %vm409_vm0, %v315_v40  ;;  %3256 = vmatprep.mubr.msk.f32.mxu1 %vm409_vm0, %v385_v41 }
  0xc1   : > { %847 = vmatmul.mubr.f32.gmra.mrb[66].mxu0 %v314_v42  ;;  %1022 = vmatmul.mubr.f32.gmra.mrb[66].mxu1 %v384_v43 }
  0xc2   : > { %3222 = vmatprep.mubr.msk.f32.mxu0 %vm409_vm0, %v317_v44 }
  0xc5   : > { %852 = vmatmul.mubr.f32.gmra.mrb[68].mxu0 %v316_v45 }
 0x110   : > { %v3818_v46 = vpop.f32.mrb[0].mxu0  ;;  %v3820_v47 = vpop.f32.mrb[0].mxu1 }
 0x111   : > { %5435 = vst [vmem:[#allocation2_spill] sm:$0xff] %v3818_v46  ;;  %5436 = vst [vmem:[#allocation3_spill] sm:$0xff] %v3820_v47  ;;  %v685_v48 = vpop.f32.mrb[1].mxu0  ;;  %v860_v49 = vpop.f32.mrb[1].mxu1  ;;  %v1133_v50 = vsel %vm1027_vm1, %v3820_v47, 0.0  ;;  %v1028_v51 = vsel %vm1027_vm1, %v3818_v46, 0.0 }
 0x112   : > { %1134 = vadd.xlane.f32.xlu1 %v1133_v50  ;;  %1029 = vadd.xlane.f32.xlu0 %v1028_v51 }
 0x114   : > { %v3826_v52 = vpop.f32.mrb[2].mxu0  ;;  %v3828_v53 = vpop.f32.mrb[2].mxu1 }
 0x115   : > { %5437 = vst [vmem:[#allocation4_spill] sm:$0xff] %v3826_v52  ;;  %5438 = vst [vmem:[#allocation5_spill] sm:$0xff] %v3828_v53  ;;  %v690_v54 = vpop.f32.mrb[3].mxu0  ;;  %v1031_v55 = vsel %vm1027_vm1, %v3826_v52, 0.0  ;;  %v865_v56 = vpop.f32.mrb[3].mxu1  ;;  %v1136_v57 = vsel %vm1027_vm1, %v3828_v53, 0.0 }
 0x116   : > { %1032 = vadd.xlane.f32.xlu0 %v1031_v55 }
 0x118   : > { %v3834_v58 = vpop.f32.mrb[4].mxu0  ;;  %v3836_v59 = vpop.f32.mrb[4].mxu1 }
 0x119   : > { %5439 = vst [vmem:[#allocation6_spill] sm:$0xff] %v3834_v58  ;;  %5440 = vst [vmem:[#allocation7_spill] sm:$0xff] %v3836_v59  ;;  %v1034_v60 = vsel %vm1027_vm1, %v3834_v58, 0.0  ;;  %v870_v61 = vpop.f32.mrb[5].mxu1  ;;  %v695_v62 = vpop.f32.mrb[5].mxu0  ;;  %v1139_v63 = vsel %vm1027_vm1, %v3836_v59, 0.0 }
 0x11a   : > { %1137 = vadd.xlane.f32.xlu0 %v1136_v57  ;;  %1035 = vadd.xlane.f32.xlu1 %v1034_v60 }
 0x11c   : > { %v3842_v0 = vpop.f32.mrb[6].mxu1  ;;  %v3844_v1 = vpop.f32.mrb[6].mxu0 }
 0x11d   : > { %5441 = vst [vmem:[#allocation8_spill] sm:$0xff] %v3842_v0  ;;  %5442 = vst [vmem:[#allocation9_spill] sm:$0xff] %v3844_v1  ;;  %v1142_v2 = vsel %vm1027_vm1, %v3842_v0, 0.0  ;;  %v700_v3 = vpop.f32.mrb[7].mxu0  ;;  %v875_v4 = vpop.f32.mrb[7].mxu1  ;;  %v1037_v5 = vsel %vm1027_vm1, %v3844_v1, 0.0 }
 0x11e   : > { %1143 = vadd.xlane.f32.xlu0 %v1142_v2  ;;  %1140 = vadd.xlane.f32.xlu1 %v1139_v63 }
 0x120   : > { %v3850_v6 = vpop.f32.mrb[8].mxu0  ;;  %v3852_v7 = vpop.f32.mrb[8].mxu1 }
 0x121   : > { %5443 = vst [vmem:[#allocation10_spill] sm:$0xff] %v3850_v6  ;;  %5444 = vst [vmem:[#allocation11_spill] sm:$0xff] %v3852_v7  ;;  %v1040_v8 = vsel %vm1027_vm1, %v3850_v6, 0.0  ;;  %v880_v9 = vpop.f32.mrb[9].mxu1  ;;  %v705_v10 = vpop.f32.mrb[9].mxu0  ;;  %v1145_v11 = vsel %vm1027_vm1, %v3852_v7, 0.0 }
 0x122   : > { %1038 = vadd.xlane.f32.xlu1 %v1037_v5  ;;  %1041 = vadd.xlane.f32.xlu0 %v1040_v8 }
 0x124   : > { %v3858_v12 = vpop.f32.mrb[10].mxu1  ;;  %v3860_v13 = vpop.f32.mrb[10].mxu0 }
 0x125   : > { %5445 = vst [vmem:[#allocation12_spill] sm:$0xff] %v3858_v12  ;;  %5446 = vst [vmem:[#allocation13_spill] sm:$0xff] %v3860_v13  ;;  %v1148_v14 = vsel %vm1027_vm1, %v3858_v12, 0.0  ;;  %v710_v15 = vpop.f32.mrb[11].mxu0  ;;  %v885_v16 = vpop.f32.mrb[11].mxu1  ;;  %v1043_v17 = vsel %vm1027_vm1, %v3860_v13, 0.0 }
 0x126   : > { %1146 = vadd.xlane.f32.xlu1 %v1145_v11  ;;  %1149 = vadd.xlane.f32.xlu0 %v1148_v14 }
 0x128   : > { %v3866_v18 = vpop.f32.mrb[12].mxu0  ;;  %v3868_v19 = vpop.f32.mrb[12].mxu1 }
 0x129   : > { %5447 = vst [vmem:[#allocation14_spill] sm:$0xff] %v3866_v18  ;;  %5448 = vst [vmem:[#allocation15_spill] sm:$0xff] %v3868_v19  ;;  %v1046_v20 = vsel %vm1027_vm1, %v3866_v18, 0.0  ;;  %v890_v21 = vpop.f32.mrb[13].mxu1  ;;  %v715_v22 = vpop.f32.mrb[13].mxu0  ;;  %v1151_v23 = vsel %vm1027_vm1, %v3868_v19, 0.0 }
 0x12a   : > { %1044 = vadd.xlane.f32.xlu1 %v1043_v17  ;;  %1047 = vadd.xlane.f32.xlu0 %v1046_v20 }
 0x12c   : > { %v3874_v24 = vpop.f32.mrb[14].mxu1  ;;  %v3876_v25 = vpop.f32.mrb[14].mxu0 }
 0x12d   : > { %5449 = vst [vmem:[#allocation16_spill] sm:$0xff] %v3874_v24  ;;  %5450 = vst [vmem:[#allocation17_spill] sm:$0xff] %v3876_v25  ;;  %v1154_v26 = vsel %vm1027_vm1, %v3874_v24, 0.0  ;;  %v720_v27 = vpop.f32.mrb[15].mxu0  ;;  %v895_v28 = vpop.f32.mrb[15].mxu1  ;;  %v1049_v29 = vsel %vm1027_vm1, %v3876_v25, 0.0 }
 0x12e   : > { %1152 = vadd.xlane.f32.xlu1 %v1151_v23  ;;  %1155 = vadd.xlane.f32.xlu0 %v1154_v26 }
 0x130   : > { %v3882_v30 = vpop.f32.mrb[16].mxu0  ;;  %v3884_v31 = vpop.f32.mrb[16].mxu1 }
 0x131   : > { %5451 = vst [vmem:[#allocation18_spill] sm:$0xff] %v3882_v30  ;;  %5452 = vst [vmem:[#allocation19_spill] sm:$0xff] %v3884_v31  ;;  %v1052_v32 = vsel %vm1027_vm1, %v3882_v30, 0.0  ;;  %v900_v33 = vpop.f32.mrb[17].mxu1  ;;  %v725_v34 = vpop.f32.mrb[17].mxu0  ;;  %v1157_v35 = vsel %vm1027_vm1, %v3884_v31, 0.0 }
 0x132   : > { %1050 = vadd.xlane.f32.xlu1 %v1049_v29  ;;  %1053 = vadd.xlane.f32.xlu0 %v1052_v32 }
 0x134   : > { %v3890_v36 = vpop.f32.mrb[18].mxu1  ;;  %v3892_v37 = vpop.f32.mrb[18].mxu0 }
 0x135   : > { %5453 = vst [vmem:[#allocation20_spill] sm:$0xff] %v3890_v36  ;;  %5454 = vst [vmem:[#allocation21_spill] sm:$0xff] %v3892_v37  ;;  %v1160_v38 = vsel %vm1027_vm1, %v3890_v36, 0.0  ;;  %v730_v39 = vpop.f32.mrb[19].mxu0  ;;  %v905_v40 = vpop.f32.mrb[19].mxu1  ;;  %v1055_v41 = vsel %vm1027_vm1, %v3892_v37, 0.0 }
 0x136   : > { %1158 = vadd.xlane.f32.xlu1 %v1157_v35  ;;  %1161 = vadd.xlane.f32.xlu0 %v1160_v38 }
 0x138   : > { %v3898_v42 = vpop.f32.mrb[20].mxu0  ;;  %v3900_v43 = vpop.f32.mrb[20].mxu1 }
 0x139   : > { %5455 = vst [vmem:[#allocation22_spill] sm:$0xff] %v3898_v42  ;;  %5456 = vst [vmem:[#allocation23_spill] sm:$0xff] %v3900_v43  ;;  %v1058_v44 = vsel %vm1027_vm1, %v3898_v42, 0.0  ;;  %v910_v45 = vpop.f32.mrb[21].mxu1  ;;  %v735_v48 = vpop.f32.mrb[21].mxu0  ;;  %v1163_v49 = vsel %vm1027_vm1, %v3900_v43, 0.0 }
 0x13a   : > { %1056 = vadd.xlane.f32.xlu1 %v1055_v41  ;;  %1059 = vadd.xlane.f32.xlu0 %v1058_v44 }
 0x13c   : > { %v3906_v50 = vpop.f32.mrb[22].mxu1  ;;  %v3908_v51 = vpop.f32.mrb[22].mxu0 }
 0x13d   : > { %5457 = vst [vmem:[#allocation24_spill] sm:$0xff] %v3906_v50  ;;  %5458 = vst [vmem:[#allocation25_spill] sm:$0xff] %v3908_v51  ;;  %v1166_v54 = vsel %vm1027_vm1, %v3906_v50, 0.0  ;;  %v740_v55 = vpop.f32.mrb[23].mxu0  ;;  %v915_v56 = vpop.f32.mrb[23].mxu1  ;;  %v1061_v57 = vsel %vm1027_vm1, %v3908_v51, 0.0 }
 0x13e   : > { %1164 = vadd.xlane.f32.xlu1 %v1163_v49  ;;  %1167 = vadd.xlane.f32.xlu0 %v1166_v54 }
 0x140   : > { %v3914_v60 = vpop.f32.mrb[24].mxu0  ;;  %v3916_v61 = vpop.f32.mrb[24].mxu1 }
 0x141   : > { %5459 = vst [vmem:[#allocation26_spill] sm:$0xff] %v3914_v60  ;;  %5460 = vst [vmem:[#allocation27_spill] sm:$0xff] %v3916_v61  ;;  %v1064_v62 = vsel %vm1027_vm1, %v3914_v60, 0.0  ;;  %v920_v63 = vpop.f32.mrb[25].mxu1  ;;  %v745_v2 = vpop.f32.mrb[25].mxu0  ;;  %v1169_v3 = vsel %vm1027_vm1, %v3916_v61, 0.0 }
 0x142   : > { %1062 = vadd.xlane.f32.xlu1 %v1061_v57  ;;  %1065 = vadd.xlane.f32.xlu0 %v1064_v62 }
 0x144   : > { %v3922_v4 = vpop.f32.mrb[26].mxu1  ;;  %v3924_v5 = vpop.f32.mrb[26].mxu0 }
 0x145   : > { %5461 = vst [vmem:[#allocation28_spill] sm:$0xff] %v3922_v4  ;;  %5462 = vst [vmem:[#allocation29_spill] sm:$0xff] %v3924_v5  ;;  %v1172_v8 = vsel %vm1027_vm1, %v3922_v4, 0.0  ;;  %v750_v9 = vpop.f32.mrb[27].mxu0  ;;  %v925_v10 = vpop.f32.mrb[27].mxu1  ;;  %v1067_v11 = vsel %vm1027_vm1, %v3924_v5, 0.0 }
 0x146   : > { %1170 = vadd.xlane.f32.xlu1 %v1169_v3  ;;  %1173 = vadd.xlane.f32.xlu0 %v1172_v8 }
 0x148   : > { %v3930_v14 = vpop.f32.mrb[28].mxu0  ;;  %v3932_v15 = vpop.f32.mrb[28].mxu1 }
 0x149   : > { %5463 = vst [vmem:[#allocation30_spill] sm:$0xff] %v3930_v14  ;;  %5464 = vst [vmem:[#allocation31_spill] sm:$0xff] %v3932_v15  ;;  %v1070_v16 = vsel %vm1027_vm1, %v3930_v14, 0.0  ;;  %v930_v17 = vpop.f32.mrb[29].mxu1  ;;  %v755_v20 = vpop.f32.mrb[29].mxu0  ;;  %v1175_v21 = vsel %vm1027_vm1, %v3932_v15, 0.0 }
 0x14a   : > { %1068 = vadd.xlane.f32.xlu1 %v1067_v11  ;;  %1071 = vadd.xlane.f32.xlu0 %v1070_v16 }
 0x14c   : > { %v3938_v22 = vpop.f32.mrb[30].mxu1  ;;  %v3940_v23 = vpop.f32.mrb[30].mxu0 }
 0x14d   : > { %5465 = vst [vmem:[#allocation32_spill] sm:$0xff] %v3938_v22  ;;  %5466 = vst [vmem:[#allocation33_spill] sm:$0xff] %v3940_v23  ;;  %v1178_v26 = vsel %vm1027_vm1, %v3938_v22, 0.0  ;;  %v760_v27 = vpop.f32.mrb[31].mxu0  ;;  %v935_v28 = vpop.f32.mrb[31].mxu1  ;;  %v1073_v29 = vsel %vm1027_vm1, %v3940_v23, 0.0 }
 0x14e   : > { %1176 = vadd.xlane.f32.xlu1 %v1175_v21  ;;  %1179 = vadd.xlane.f32.xlu0 %v1178_v26 }
 0x150   : > { %v3946_v32 = vpop.f32.mrb[32].mxu0  ;;  %v3948_v33 = vpop.f32.mrb[32].mxu1 }
 0x151   : > { %5467 = vst [vmem:[#allocation34_spill] sm:$0xff] %v3946_v32  ;;  %5468 = vst [vmem:[#allocation35_spill] sm:$0xff] %v3948_v33  ;;  %v1076_v34 = vsel %vm1027_vm1, %v3946_v32, 0.0  ;;  %v940_v35 = vpop.f32.mrb[33].mxu1  ;;  %v765_v38 = vpop.f32.mrb[33].mxu0  ;;  %v1181_v39 = vsel %vm1027_vm1, %v3948_v33, 0.0 }
 0x152   : > { %1074 = vadd.xlane.f32.xlu1 %v1073_v29  ;;  %1077 = vadd.xlane.f32.xlu0 %v1076_v34 }
 0x154   : > { %v3954_v40 = vpop.f32.mrb[34].mxu1  ;;  %v3956_v41 = vpop.f32.mrb[34].mxu0 }
 0x155   : > { %5469 = vst [vmem:[#allocation36_spill] sm:$0xff] %v3954_v40  ;;  %5470 = vst [vmem:[#allocation37_spill] sm:$0xff] %v3956_v41  ;;  %v1184_v44 = vsel %vm1027_vm1, %v3954_v40, 0.0  ;;  %v770_v45 = vpop.f32.mrb[35].mxu0  ;;  %v945_v48 = vpop.f32.mrb[35].mxu1  ;;  %v1079_v49 = vsel %vm1027_vm1, %v3956_v41, 0.0 }
 0x156   : > { %1182 = vadd.xlane.f32.xlu1 %v1181_v39  ;;  %1185 = vadd.xlane.f32.xlu0 %v1184_v44 }
 0x158   : > { %v3962_v54 = vpop.f32.mrb[36].mxu0  ;;  %v3964_v55 = vpop.f32.mrb[36].mxu1 }
 0x159   : > { %5471 = vst [vmem:[#allocation38_spill] sm:$0xff] %v3962_v54  ;;  %5472 = vst [vmem:[#allocation39_spill] sm:$0xff] %v3964_v55  ;;  %v1082_v56 = vsel %vm1027_vm1, %v3962_v54, 0.0  ;;  %v950_v57 = vpop.f32.mrb[37].mxu1  ;;  %v775_v62 = vpop.f32.mrb[37].mxu0  ;;  %v1187_v63 = vsel %vm1027_vm1, %v3964_v55, 0.0 }
 0x15a   : > { %1080 = vadd.xlane.f32.xlu1 %v1079_v49  ;;  %1083 = vadd.xlane.f32.xlu0 %v1082_v56 }
 0x15c   : > { %v3970_v2 = vpop.f32.mrb[38].mxu1  ;;  %v3972_v3 = vpop.f32.mrb[38].mxu0 }
 0x15d   : > { %5473 = vst [vmem:[#allocation40_spill] sm:$0xff] %v3970_v2  ;;  %5474 = vst [vmem:[#allocation41_spill] sm:$0xff] %v3972_v3  ;;  %v1190_v8 = vsel %vm1027_vm1, %v3970_v2, 0.0  ;;  %v780_v9 = vpop.f32.mrb[39].mxu0  ;;  %v955_v10 = vpop.f32.mrb[39].mxu1  ;;  %v1085_v11 = vsel %vm1027_vm1, %v3972_v3, 0.0 }
 0x15e   : > { %1188 = vadd.xlane.f32.xlu1 %v1187_v63  ;;  %1191 = vadd.xlane.f32.xlu0 %v1190_v8 }
 0x160   : > { %v3978_v16 = vpop.f32.mrb[40].mxu0  ;;  %v3980_v17 = vpop.f32.mrb[40].mxu1 }
 0x161   : > { %5475 = vst [vmem:[#allocation42_spill] sm:$0xff] %v3978_v16  ;;  %5476 = vst [vmem:[#allocation43_spill] sm:$0xff] %v3980_v17  ;;  %v1088_v20 = vsel %vm1027_vm1, %v3978_v16, 0.0  ;;  %v960_v21 = vpop.f32.mrb[41].mxu1  ;;  %v785_v26 = vpop.f32.mrb[41].mxu0  ;;  %v1193_v27 = vsel %vm1027_vm1, %v3980_v17, 0.0 }
 0x162   : > { %1086 = vadd.xlane.f32.xlu1 %v1085_v11  ;;  %1089 = vadd.xlane.f32.xlu0 %v1088_v20 }
 0x164   : > { %v3986_v28 = vpop.f32.mrb[42].mxu1  ;;  %v3988_v29 = vpop.f32.mrb[42].mxu0 }
 0x165   : > { %5477 = vst [vmem:[#allocation44_spill] sm:$0xff] %v3986_v28  ;;  %5478 = vst [vmem:[#allocation45_spill] sm:$0xff] %v3988_v29  ;;  %v1196_v34 = vsel %vm1027_vm1, %v3986_v28, 0.0  ;;  %v790_v35 = vpop.f32.mrb[43].mxu0  ;;  %v965_v38 = vpop.f32.mrb[43].mxu1  ;;  %v1091_v39 = vsel %vm1027_vm1, %v3988_v29, 0.0 }
 0x166   : > { %1194 = vadd.xlane.f32.xlu1 %v1193_v27  ;;  %1197 = vadd.xlane.f32.xlu0 %v1196_v34 }
 0x168   : > { %v3994_v44 = vpop.f32.mrb[44].mxu0  ;;  %v3996_v45 = vpop.f32.mrb[44].mxu1 }
 0x169   : > { %5479 = vst [vmem:[#allocation46_spill] sm:$0xff] %v3994_v44  ;;  %5480 = vst [vmem:[#allocation47_spill] sm:$0xff] %v3996_v45  ;;  %v1094_v48 = vsel %vm1027_vm1, %v3994_v44, 0.0  ;;  %v970_v49 = vpop.f32.mrb[45].mxu1  ;;  %v795_v56 = vpop.f32.mrb[45].mxu0  ;;  %v1199_v57 = vsel %vm1027_vm1, %v3996_v45, 0.0 }
 0x16a   : > { %1092 = vadd.xlane.f32.xlu1 %v1091_v39  ;;  %1095 = vadd.xlane.f32.xlu0 %v1094_v48 }
 0x16c   : > { %v4002_v62 = vpop.f32.mrb[46].mxu1  ;;  %v4004_v63 = vpop.f32.mrb[46].mxu0 }
 0x16d   : > { %5481 = vst [vmem:[#allocation48_spill] sm:$0xff] %v4002_v62  ;;  %5482 = vst [vmem:[#allocation49_spill] sm:$0xff] %v4004_v63  ;;  %v1202_v8 = vsel %vm1027_vm1, %v4002_v62, 0.0  ;;  %v800_v9 = vpop.f32.mrb[47].mxu0  ;;  %v975_v10 = vpop.f32.mrb[47].mxu1  ;;  %v1097_v11 = vsel %vm1027_vm1, %v4004_v63, 0.0 }
 0x16e   : > { %1200 = vadd.xlane.f32.xlu1 %v1199_v57  ;;  %1203 = vadd.xlane.f32.xlu0 %v1202_v8 }
 0x170   : > { %v4010_v20 = vpop.f32.mrb[48].mxu0  ;;  %v4012_v21 = vpop.f32.mrb[48].mxu1 }
 0x171   : > { %5483 = vst [vmem:[#allocation50_spill] sm:$0xff] %v4010_v20  ;;  %5484 = vst [vmem:[#allocation51_spill] sm:$0xff] %v4012_v21  ;;  %v1100_v26 = vsel %vm1027_vm1, %v4010_v20, 0.0  ;;  %v980_v27 = vpop.f32.mrb[49].mxu1  ;;  %v805_v34 = vpop.f32.mrb[49].mxu0  ;;  %v1205_v35 = vsel %vm1027_vm1, %v4012_v21, 0.0 }
 0x172   : > { %1098 = vadd.xlane.f32.xlu1 %v1097_v11  ;;  %1101 = vadd.xlane.f32.xlu0 %v1100_v26 }
 0x174   : > { %v4018_v38 = vpop.f32.mrb[50].mxu1  ;;  %v4020_v39 = vpop.f32.mrb[50].mxu0 }
 0x175   : > { %5485 = vst [vmem:[#allocation52_spill] sm:$0xff] %v4018_v38  ;;  %5486 = vst [vmem:[#allocation53_spill] sm:$0xff] %v4020_v39  ;;  %v1208_v48 = vsel %vm1027_vm1, %v4018_v38, 0.0  ;;  %v810_v49 = vpop.f32.mrb[51].mxu0  ;;  %v985_v56 = vpop.f32.mrb[51].mxu1  ;;  %v1103_v57 = vsel %vm1027_vm1, %v4020_v39, 0.0 }
 0x176   : > { %1206 = vadd.xlane.f32.xlu1 %v1205_v35  ;;  %1209 = vadd.xlane.f32.xlu0 %v1208_v48 }
 0x178   : > { %v4026_v8 = vpop.f32.mrb[52].mxu0  ;;  %v4028_v9 = vpop.f32.mrb[52].mxu1 }
 0x179   : > { %5487 = vst [vmem:[#allocation54_spill] sm:$0xff] %v4026_v8  ;;  %5488 = vst [vmem:[#allocation55_spill] sm:$0xff] %v4028_v9  ;;  %v1106_v10 = vsel %vm1027_vm1, %v4026_v8, 0.0  ;;  %v990_v11 = vpop.f32.mrb[53].mxu1  ;;  %v815_v26 = vpop.f32.mrb[53].mxu0  ;;  %v1211_v27 = vsel %vm1027_vm1, %v4028_v9, 0.0 }
 0x17a   : > { %1104 = vadd.xlane.f32.xlu1 %v1103_v57  ;;  %1107 = vadd.xlane.f32.xlu0 %v1106_v10 }
 0x17c   : > { %v4034_v34 = vpop.f32.mrb[54].mxu1  ;;  %v4036_v35 = vpop.f32.mrb[54].mxu0 }
 0x17d   : > { %5489 = vst [vmem:[#allocation56_spill] sm:$0xff] %v4034_v34  ;;  %5490 = vst [vmem:[#allocation57_spill] sm:$0xff] %v4036_v35  ;;  %v1214_v48 = vsel %vm1027_vm1, %v4034_v34, 0.0  ;;  %v820_v49 = vpop.f32.mrb[55].mxu0  ;;  %v995_v56 = vpop.f32.mrb[55].mxu1  ;;  %v1109_v11 = vsel %vm1027_vm1, %v4036_v35, 0.0 }
 0x17e   : > { %1212 = vadd.xlane.f32.xlu1 %v1211_v27  ;;  %1215 = vadd.xlane.f32.xlu0 %v1214_v48 }
 0x180   : > { %v4042_v26 = vpop.f32.mrb[56].mxu0  ;;  %v4044_v57 = vpop.f32.mrb[56].mxu1 }
 0x181   : > { %5491 = vst [vmem:[#allocation58_spill] sm:$0xff] %v4042_v26  ;;  %5492 = vst [vmem:[#allocation59_spill] sm:$0xff] %v4044_v57  ;;  %v1112_v10 = vsel %vm1027_vm1, %v4042_v26, 0.0  ;;  %v1000_v9 = vpop.f32.mrb[57].mxu1  ;;  %v825_v8 = vpop.f32.mrb[57].mxu0  ;;  %v1217_v49 = vsel %vm1027_vm1, %v4044_v57, 0.0 }
 0x182   : > { %1110 = vadd.xlane.f32.xlu1 %v1109_v11  ;;  %1113 = vadd.xlane.f32.xlu0 %v1112_v10 }
 0x184   : > { %v4050_v56 = vpop.f32.mrb[58].mxu1  ;;  %v4052_v27 = vpop.f32.mrb[58].mxu0 }
 0x185   : > { %5493 = vst [vmem:[#allocation60_spill] sm:$0xff] %v4050_v56  ;;  %5494 = vst [vmem:[#allocation61_spill] sm:$0xff] %v4052_v27  ;;  %v1220_v48 = vsel %vm1027_vm1, %v4050_v56, 0.0  ;;  %v830_v35 = vpop.f32.mrb[59].mxu0  ;;  %v1005_v34 = vpop.f32.mrb[59].mxu1  ;;  %v1115_v9 = vsel %vm1027_vm1, %v4052_v27, 0.0 }
 0x186   : > { %1218 = vadd.xlane.f32.xlu1 %v1217_v49  ;;  %1221 = vadd.xlane.f32.xlu0 %v1220_v48 }
 0x188   : > { %v4058_v8 = vpop.f32.mrb[60].mxu0  ;;  %v4060_v11 = vpop.f32.mrb[60].mxu1 }
 0x189   : > { %5495 = vst [vmem:[#allocation62_spill] sm:$0xff] %v4058_v8  ;;  %5496 = vst [vmem:[#allocation63_spill] sm:$0xff] %v4060_v11  ;;  %v1118_v10 = vsel %vm1027_vm1, %v4058_v8, 0.0  ;;  %v1010_v57 = vpop.f32.mrb[61].mxu1  ;;  %v835_v26 = vpop.f32.mrb[61].mxu0  ;;  %v1223_v35 = vsel %vm1027_vm1, %v4060_v11, 0.0 }
 0x18a   : > { %1116 = vadd.xlane.f32.xlu1 %v1115_v9  ;;  %1119 = vadd.xlane.f32.xlu0 %v1118_v10 }
 0x18c   : > { %v4066_v34 = vpop.f32.mrb[62].mxu1  ;;  %v4068_v49 = vpop.f32.mrb[62].mxu0 }
 0x18d   : > { %5497 = vst [vmem:[#allocation64_spill] sm:$0xff] %v4066_v34  ;;  %5498 = vst [vmem:[#allocation65_spill] sm:$0xff] %v4068_v49  ;;  %v1226_v48 = vsel %vm1027_vm1, %v4066_v34, 0.0  ;;  %v840_v27 = vpop.f32.mrb[63].mxu0  ;;  %v1015_v56 = vpop.f32.mrb[63].mxu1  ;;  %v1121_v57 = vsel %vm1027_vm1, %v4068_v49, 0.0 }
 0x18e   : > { %1224 = vadd.xlane.f32.xlu1 %v1223_v35  ;;  %1227 = vadd.xlane.f32.xlu0 %v1226_v48 }
 0x190   : > { %v4074_v26 = vpop.f32.mrb[64].mxu0  ;;  %v4076_v9 = vpop.f32.mrb[64].mxu1 }
 0x191   : > { %5499 = vst [vmem:[#allocation66_spill] sm:$0xff] %v4074_v26  ;;  %5500 = vst [vmem:[#allocation67_spill] sm:$0xff] %v4076_v9  ;;  %v1124_v10 = vsel %vm1027_vm1, %v4074_v26, 0.0  ;;  %v1020_v11 = vpop.f32.mrb[65].mxu1  ;;  %v845_v8 = vpop.f32.mrb[65].mxu0  ;;  %v1229_v27 = vsel %vm1027_vm1, %v4076_v9, 0.0 }
 0x192   : > { %1122 = vadd.xlane.f32.xlu1 %v1121_v57  ;;  %1125 = vadd.xlane.f32.xlu0 %v1124_v10 }
 0x194   : > { %v4082_v56 = vpop.f32.mrb[66].mxu1  ;;  %v4084_v35 = vpop.f32.mrb[66].mxu0 }
 0x195   : > { %5501 = vst [vmem:[#allocation68_spill] sm:$0xff] %v4082_v56  ;;  %5502 = vst [vmem:[#allocation69_spill] sm:$0xff] %v4084_v35  ;;  %v1232_v48 = vsel %vm1027_vm1, %v4082_v56, 0.0  ;;  %v850_v49 = vpop.f32.mrb[67].mxu0  ;;  %v1025_v34 = vpop.f32.mrb[67].mxu1  ;;  %v1127_v11 = vsel %vm1027_vm1, %v4084_v35, 0.0 }
 0x196   : > { %1230 = vadd.xlane.f32.xlu1 %v1229_v27  ;;  %1233 = vadd.xlane.f32.xlu0 %v1232_v48 }
 0x198   : > { %v4090_v8 = vpop.f32.mrb[68].mxu0 }
 0x199   : > { %5503 = vst [vmem:[#allocation70_spill] sm:$0xff] %v4090_v8  ;;  %v1130_v57 = vsel %vm1027_vm1, %v4090_v8, 0.0  ;;  %v855_v10 = vpop.f32.mrb[69].mxu0 }
 0x19a   : > { %1128 = vadd.xlane.f32.xlu1 %v1127_v11  ;;  %1131 = vadd.xlane.f32.xlu0 %v1130_v57 }
 0x19f   : > { %v1135_v9 = vpop.xlane.xlu1 %1134  ;;  %v1030_v26 = vpop.xlane.xlu0 %1029 }
 0x1a0   : > { %v4094_v39 = vmul.f32 0.020408163, %v1135_v9  ;;  %v4096_v56 = vmul.f32 0.020408163, %v1030_v26 }
 0x1a2   : > { %5504 = vst [vmem:[#allocation71_spill] sm:$0xff] %v4096_v56  ;;  %v1304_v34 = vsub.f32 %v3818_v46, %v4096_v56  ;;  %v1339_v49 = vsub.f32 %v3820_v47, %v4094_v39 }
 0x1a3   : > { %v1033_v27 = vpop.xlane.xlu0 %1032 }
 0x1a4   : > { %v4102_v48 = vmul.f32 0.020408163, %v1033_v27  ;;  %v1373_v35 = vmul.f32 %v1304_v34, %v1304_v34  ;;  %v1408_v8 = vmul.f32 %v1339_v49, %v1339_v49 }
 0x1a6   : > { %5505 = vst [vmem:[#allocation72_spill] sm:$0xff] %v4102_v48  ;;  %v1442_v11 = vsel %vm1027_vm1, %v1373_v35, 0.0  ;;  %v1547_v57 = vsel %vm1027_vm1, %v1408_v8, 0.0  ;;  %v1305_v9 = vsub.f32 %v3826_v52, %v4102_v48 }
 0x1a7   : > { %v1138_v26 = vpop.xlane.xlu0 %1137  ;;  %v1036_v10 = vpop.xlane.xlu1 %1035  ;;  %1443 = vadd.xlane.f32.xlu1 %v1442_v11  ;;  %1548 = vadd.xlane.f32.xlu0 %v1547_v57 }
 0x1a8   : > { %v4108_v46 = vmul.f32 0.020408163, %v1138_v26  ;;  %v4110_v56 = vmul.f32 0.020408163, %v1036_v10  ;;  %v1374_v47 = vmul.f32 %v1305_v9, %v1305_v9 }
 0x1aa   : > { %v1445_v27 = vsel %vm1027_vm1, %v1374_v47, 0.0  ;;  %v1340_v34 = vsub.f32 %v3828_v53, %v4108_v46  ;;  %v1306_v35 = vsub.f32 %v3834_v58, %v4110_v56 }
 0x1ab   : > { %v1144_v8 = vpop.xlane.xlu0 %1143  ;;  %v1141_v49 = vpop.xlane.xlu1 %1140  ;;  %1446 = vadd.xlane.f32.xlu0 %v1445_v27 }
 0x1ac   : > { %v4117_v52 = vmul.f32 0.020408163, %v1144_v8  ;;  %v4119_v11 = vmul.f32 0.020408163, %v1141_v49  ;;  %v1409_v57 = vmul.f32 %v1340_v34, %v1340_v34  ;;  %v1375_v26 = vmul.f32 %v1306_v35, %v1306_v35 }
 0x1ae   : > { %5506 = vst [vmem:[#allocation73_spill] sm:$0xff] %v4119_v11  ;;  %v1550_v10 = vsel %vm1027_vm1, %v1409_v57, 0.0  ;;  %v1341_v47 = vsub.f32 %v3836_v59, %v4119_v11  ;;  %v1342_v9 = vsub.f32 %v3842_v0, %v4117_v52  ;;  %v1448_v49 = vsel %vm1027_vm1, %v1375_v26, 0.0 }
 0x1af   : > { %v1039_v53 = vpop.xlane.xlu1 %1038  ;;  %v1042_v48 = vpop.xlane.xlu0 %1041  ;;  %1551 = vadd.xlane.f32.xlu1 %v1550_v10 }
 0x1b0   : > { %v4126_v58 = vmul.f32 0.020408163, %v1039_v53  ;;  %v4128_v27 = vmul.f32 0.020408163, %v1042_v48  ;;  %v1410_v8 = vmul.f32 %v1341_v47, %v1341_v47  ;;  %v1411_v35 = vmul.f32 %v1342_v9, %v1342_v9 }
 0x1b2   : > { %5507 = vst [vmem:[#allocation74_spill] sm:$0xff] %v4126_v58  ;;  %v1553_v34 = vsel %vm1027_vm1, %v1410_v8, 0.0  ;;  %v1307_v57 = vsub.f32 %v3844_v1, %v4126_v58  ;;  %v1308_v59 = vsub.f32 %v3850_v6, %v4128_v27  ;;  %v1556_v26 = vsel %vm1027_vm1, %v1411_v35, 0.0 }
 0x1b3   : > { %v1147_v0 = vpop.xlane.xlu1 %1146  ;;  %v1150_v11 = vpop.xlane.xlu0 %1149  ;;  %1449 = vadd.xlane.f32.xlu1 %v1448_v49  ;;  %1554 = vadd.xlane.f32.xlu0 %v1553_v34 }
 0x1b4   : > { %v4136_v53 = vmul.f32 0.020408163, %v1147_v0  ;;  %v4138_v48 = vmul.f32 0.020408163, %v1150_v11  ;;  %v1376_v10 = vmul.f32 %v1307_v57, %v1307_v57  ;;  %v1377_v47 = vmul.f32 %v1308_v59, %v1308_v59 }
 0x1b6   : > { %v1451_v9 = vsel %vm1027_vm1, %v1376_v10, 0.0  ;;  %v1343_v8 = vsub.f32 %v3852_v7, %v4136_v53  ;;  %v1344_v1 = vsub.f32 %v3858_v12, %v4138_v48  ;;  %v1454_v59 = vsel %vm1027_vm1, %v1377_v47, 0.0 }
 0x1b7   : > { %v1045_v6 = vpop.xlane.xlu1 %1044  ;;  %v1048_v58 = vpop.xlane.xlu0 %1047  ;;  %1557 = vadd.xlane.f32.xlu1 %v1556_v26  ;;  %1452 = vadd.xlane.f32.xlu0 %v1451_v9 }
 0x1b8   : > { %v4146_v0 = vmul.f32 0.020408163, %v1045_v6  ;;  %v4148_v11 = vmul.f32 0.020408163, %v1048_v58  ;;  %v1412_v49 = vmul.f32 %v1343_v8, %v1343_v8  ;;  %v1413_v35 = vmul.f32 %v1344_v1, %v1344_v1 }
 0x1ba   : > { %v1559_v34 = vsel %vm1027_vm1, %v1412_v49, 0.0  ;;  %v1309_v57 = vsub.f32 %v3860_v13, %v4146_v0  ;;  %v1310_v10 = vsub.f32 %v3866_v18, %v4148_v11  ;;  %v1562_v47 = vsel %vm1027_vm1, %v1413_v35, 0.0 }
 0x1bb   : > { %v1153_v7 = vpop.xlane.xlu1 %1152  ;;  %v1156_v12 = vpop.xlane.xlu0 %1155  ;;  %1455 = vadd.xlane.f32.xlu1 %v1454_v59  ;;  %1560 = vadd.xlane.f32.xlu0 %v1559_v34 }
 0x1bc   : > { %v4156_v6 = vmul.f32 0.020408163, %v1153_v7  ;;  %v4158_v58 = vmul.f32 0.020408163, %v1156_v12  ;;  %v1378_v26 = vmul.f32 %v1309_v57, %v1309_v57  ;;  %v1379_v9 = vmul.f32 %v1310_v10, %v1310_v10 }
 0x1be   : > { %v1457_v1 = vsel %vm1027_vm1, %v1378_v26, 0.0  ;;  %v1345_v8 = vsub.f32 %v3868_v19, %v4156_v6  ;;  %v1346_v49 = vsub.f32 %v3874_v24, %v4158_v58  ;;  %v1460_v34 = vsel %vm1027_vm1, %v1379_v9, 0.0 }
 0x1bf   : > { %v1051_v13 = vpop.xlane.xlu1 %1050  ;;  %v1054_v18 = vpop.xlane.xlu0 %1053  ;;  %1563 = vadd.xlane.f32.xlu1 %v1562_v47  ;;  %1458 = vadd.xlane.f32.xlu0 %v1457_v1 }
 0x1c0   : > { %v4166_v7 = vmul.f32 0.020408163, %v1051_v13  ;;  %v4168_v12 = vmul.f32 0.020408163, %v1054_v18  ;;  %v1414_v59 = vmul.f32 %v1345_v8, %v1345_v8  ;;  %v1415_v57 = vmul.f32 %v1346_v49, %v1346_v49 }
 0x1c2   : > { %v1565_v35 = vsel %vm1027_vm1, %v1414_v59, 0.0  ;;  %v1311_v10 = vsub.f32 %v3876_v25, %v4166_v7  ;;  %v1312_v26 = vsub.f32 %v3882_v30, %v4168_v12  ;;  %v1568_v9 = vsel %vm1027_vm1, %v1415_v57, 0.0 }
 0x1c3   : > { %v1159_v19 = vpop.xlane.xlu1 %1158  ;;  %v1162_v24 = vpop.xlane.xlu0 %1161  ;;  %1461 = vadd.xlane.f32.xlu1 %v1460_v34  ;;  %1566 = vadd.xlane.f32.xlu0 %v1565_v35  ;;  %v3478_v25 = vmov 0  }
 0x1c4   : > { %v4176_v13 = vmul.f32 0.020408163, %v1159_v19  ;;  %v4178_v18 = vmul.f32 0.020408163, %v1162_v24  ;;  %v1380_v47 = vmul.f32 %v1311_v10, %v1311_v10  ;;  %v1381_v1 = vmul.f32 %v1312_v26, %v1312_v26  ;;  %3328 = vset.pattern.permute.xlu0 %v3478_v25  ;;  %3329 = vset.pattern.permute.xlu1 %v3478_v25 }
 0x1c6   : > { %v1463_v8 = vsel %vm1027_vm1, %v1380_v47, 0.0  ;;  %v1347_v49 = vsub.f32 %v3884_v31, %v4176_v13  ;;  %v1348_v59 = vsub.f32 %v3890_v36, %v4178_v18  ;;  %v1466_v10 = vsel %vm1027_vm1, %v1381_v1, 0.0 }
 0x1c7   : > { %v1057_v34 = vpop.xlane.xlu1 %1056  ;;  %v1060_v19 = vpop.xlane.xlu0 %1059  ;;  %1569 = vadd.xlane.f32.xlu1 %v1568_v9  ;;  %1464 = vadd.xlane.f32.xlu0 %v1463_v8 }
 0x1c8   : > { %v4186_v24 = vmul.f32 0.020408163, %v1057_v34  ;;  %v4188_v35 = vmul.f32 0.020408163, %v1060_v19  ;;  %v1416_v57 = vmul.f32 %v1347_v49, %v1347_v49  ;;  %v1417_v47 = vmul.f32 %v1348_v59, %v1348_v59 }
 0x1ca   : > { %v1571_v26 = vsel %vm1027_vm1, %v1416_v57, 0.0  ;;  %v1313_v31 = vsub.f32 %v3892_v37, %v4186_v24  ;;  %v1314_v25 = vsub.f32 %v3898_v42, %v4188_v35  ;;  %v1574_v1 = vsel %vm1027_vm1, %v1417_v47, 0.0 }
 0x1cb   : > { %v1165_v36 = vpop.xlane.xlu1 %1164  ;;  %v1168_v30 = vpop.xlane.xlu0 %1167  ;;  %1467 = vadd.xlane.f32.xlu1 %v1466_v10  ;;  %1572 = vadd.xlane.f32.xlu0 %v1571_v26 }
 0x1cc   : > { %v4196_v9 = vmul.f32 0.020408163, %v1165_v36  ;;  %v4198_v8 = vmul.f32 0.020408163, %v1168_v30  ;;  %v1382_v49 = vmul.f32 %v1313_v31, %v1313_v31  ;;  %v1383_v34 = vmul.f32 %v1314_v25, %v1314_v25 }
 0x1ce   : > { %v1469_v59 = vsel %vm1027_vm1, %v1382_v49, 0.0  ;;  %v1349_v19 = vsub.f32 %v3900_v43, %v4196_v9  ;;  %v1350_v57 = vsub.f32 %v3906_v50, %v4198_v8  ;;  %v1472_v10 = vsel %vm1027_vm1, %v1383_v34, 0.0 }
 0x1cf   : > { %v1063_v37 = vpop.xlane.xlu1 %1062  ;;  %v1066_v42 = vpop.xlane.xlu0 %1065  ;;  %1575 = vadd.xlane.f32.xlu1 %v1574_v1  ;;  %1470 = vadd.xlane.f32.xlu0 %v1469_v59 }
 0x1d0   : > { %v4206_v36 = vmul.f32 0.020408163, %v1063_v37  ;;  %v4208_v30 = vmul.f32 0.020408163, %v1066_v42  ;;  %v1418_v31 = vmul.f32 %v1349_v19, %v1349_v19  ;;  %v1419_v47 = vmul.f32 %v1350_v57, %v1350_v57 }
 0x1d2   : > { %v1577_v26 = vsel %vm1027_vm1, %v1418_v31, 0.0  ;;  %v1315_v25 = vsub.f32 %v3908_v51, %v4206_v36  ;;  %v1316_v49 = vsub.f32 %v3914_v60, %v4208_v30  ;;  %v1580_v34 = vsel %vm1027_vm1, %v1419_v47, 0.0 }
 0x1d3   : > { %v1171_v43 = vpop.xlane.xlu1 %1170  ;;  %v1174_v50 = vpop.xlane.xlu0 %1173  ;;  %1473 = vadd.xlane.f32.xlu1 %v1472_v10  ;;  %1578 = vadd.xlane.f32.xlu0 %v1577_v26 }
 0x1d4   : > { %v4216_v37 = vmul.f32 0.020408163, %v1171_v43  ;;  %v4218_v42 = vmul.f32 0.020408163, %v1174_v50  ;;  %v1384_v1 = vmul.f32 %v1315_v25, %v1315_v25  ;;  %v1385_v59 = vmul.f32 %v1316_v49, %v1316_v49 }
 0x1d6   : > { %v1475_v19 = vsel %vm1027_vm1, %v1384_v1, 0.0  ;;  %v1351_v57 = vsub.f32 %v3916_v61, %v4216_v37  ;;  %v1352_v31 = vsub.f32 %v3922_v4, %v4218_v42  ;;  %v1478_v26 = vsel %vm1027_vm1, %v1385_v59, 0.0 }
 0x1d7   : > { %v1069_v51 = vpop.xlane.xlu1 %1068  ;;  %v1072_v60 = vpop.xlane.xlu0 %1071  ;;  %1581 = vadd.xlane.f32.xlu1 %v1580_v34  ;;  %1476 = vadd.xlane.f32.xlu0 %v1475_v19 }
 0x1d8   : > { %v4226_v43 = vmul.f32 0.020408163, %v1069_v51  ;;  %v4228_v50 = vmul.f32 0.020408163, %v1072_v60  ;;  %v1420_v10 = vmul.f32 %v1351_v57, %v1351_v57  ;;  %v1421_v25 = vmul.f32 %v1352_v31, %v1352_v31 }
 0x1da   : > { %v1583_v47 = vsel %vm1027_vm1, %v1420_v10, 0.0  ;;  %v1317_v49 = vsub.f32 %v3924_v5, %v4226_v43  ;;  %v1318_v1 = vsub.f32 %v3930_v14, %v4228_v50  ;;  %v1586_v31 = vsel %vm1027_vm1, %v1421_v25, 0.0 }
 0x1db   : > { %v1177_v61 = vpop.xlane.xlu1 %1176  ;;  %v1180_v4 = vpop.xlane.xlu0 %1179  ;;  %1479 = vadd.xlane.f32.xlu1 %v1478_v26  ;;  %1584 = vadd.xlane.f32.xlu0 %v1583_v47 }
 0x1dc   : > { %v4236_v51 = vmul.f32 0.020408163, %v1177_v61  ;;  %v4238_v60 = vmul.f32 0.020408163, %v1180_v4  ;;  %v1386_v34 = vmul.f32 %v1317_v49, %v1317_v49  ;;  %v1387_v19 = vmul.f32 %v1318_v1, %v1318_v1 }
 0x1de   : > { %v1353_v59 = vsub.f32 %v3932_v15, %v4236_v51  ;;  %v1354_v57 = vsub.f32 %v3938_v22, %v4238_v60  ;;  %v1481_v10 = vsel %vm1027_vm1, %v1386_v34, 0.0  ;;  %v1484_v47 = vsel %vm1027_vm1, %v1387_v19, 0.0 }
 0x1df   : > { %v1075_v5 = vpop.xlane.xlu1 %1074  ;;  %v1078_v14 = vpop.xlane.xlu0 %1077  ;;  %1587 = vadd.xlane.f32.xlu1 %v1586_v31  ;;  %1482 = vadd.xlane.f32.xlu0 %v1481_v10 }
 0x1e0   : > { %v4246_v61 = vmul.f32 0.020408163, %v1075_v5  ;;  %v4248_v4 = vmul.f32 0.020408163, %v1078_v14  ;;  %v1422_v26 = vmul.f32 %v1353_v59, %v1353_v59  ;;  %v1423_v34 = vmul.f32 %v1354_v57, %v1354_v57 }
 0x1e2   : > { %v1319_v49 = vsub.f32 %v3940_v23, %v4246_v61  ;;  %v1320_v1 = vsub.f32 %v3946_v32, %v4248_v4  ;;  %v1589_v25 = vsel %vm1027_vm1, %v1422_v26, 0.0  ;;  %v1592_v23 = vsel %vm1027_vm1, %v1423_v34, 0.0 }
 0x1e3   : > { %v1183_v15 = vpop.xlane.xlu1 %1182  ;;  %v1186_v22 = vpop.xlane.xlu0 %1185  ;;  %1485 = vadd.xlane.f32.xlu1 %v1484_v47  ;;  %1590 = vadd.xlane.f32.xlu0 %v1589_v25 }
 0x1e4   : > { %v4256_v5 = vmul.f32 0.020408163, %v1183_v15  ;;  %v4258_v14 = vmul.f32 0.020408163, %v1186_v22  ;;  %v1388_v59 = vmul.f32 %v1319_v49, %v1319_v49  ;;  %v1389_v31 = vmul.f32 %v1320_v1, %v1320_v1 }
 0x1e6   : > { %v1355_v19 = vsub.f32 %v3948_v33, %v4256_v5  ;;  %v1356_v10 = vsub.f32 %v3954_v40, %v4258_v14  ;;  %v1487_v57 = vsel %vm1027_vm1, %v1388_v59, 0.0  ;;  %v1490_v49 = vsel %vm1027_vm1, %v1389_v31, 0.0 }
 0x1e7   : > { %v1081_v26 = vpop.xlane.xlu1 %1080  ;;  %v1084_v32 = vpop.xlane.xlu0 %1083  ;;  %1593 = vadd.xlane.f32.xlu1 %v1592_v23  ;;  %1488 = vadd.xlane.f32.xlu0 %v1487_v57 }
 0x1e8   : > { %v4266_v15 = vmul.f32 0.020408163, %v1081_v26  ;;  %v4268_v22 = vmul.f32 0.020408163, %v1084_v32  ;;  %v1424_v47 = vmul.f32 %v1355_v19, %v1355_v19  ;;  %v1425_v59 = vmul.f32 %v1356_v10, %v1356_v10 }
 0x1ea   : > { %v1321_v1 = vsub.f32 %v3956_v41, %v4266_v15  ;;  %v1322_v25 = vsub.f32 %v3962_v54, %v4268_v22  ;;  %v1595_v34 = vsel %vm1027_vm1, %v1424_v47, 0.0  ;;  %v1598_v41 = vsel %vm1027_vm1, %v1425_v59, 0.0 }
 0x1eb   : > { %v1189_v33 = vpop.xlane.xlu1 %1188  ;;  %v1192_v40 = vpop.xlane.xlu0 %1191  ;;  %1491 = vadd.xlane.f32.xlu1 %v1490_v49  ;;  %1596 = vadd.xlane.f32.xlu0 %v1595_v34 }
 0x1ec   : > { %v4276_v23 = vmul.f32 0.020408163, %v1189_v33  ;;  %v4278_v32 = vmul.f32 0.020408163, %v1192_v40  ;;  %v1390_v19 = vmul.f32 %v1321_v1, %v1321_v1  ;;  %v1391_v57 = vmul.f32 %v1322_v25, %v1322_v25 }
 0x1ee   : > { %v1357_v31 = vsub.f32 %v3964_v55, %v4276_v23  ;;  %v1358_v26 = vsub.f32 %v3970_v2, %v4278_v32  ;;  %v1493_v10 = vsel %vm1027_vm1, %v1390_v19, 0.0  ;;  %v1496_v1 = vsel %vm1027_vm1, %v1391_v57, 0.0 }
 0x1ef   : > { %v1087_v47 = vpop.xlane.xlu1 %1086  ;;  %v1090_v54 = vpop.xlane.xlu0 %1089  ;;  %1599 = vadd.xlane.f32.xlu1 %v1598_v41  ;;  %1494 = vadd.xlane.f32.xlu0 %v1493_v10 }
 0x1f0   : > { %v4286_v33 = vmul.f32 0.020408163, %v1087_v47  ;;  %v4288_v40 = vmul.f32 0.020408163, %v1090_v54  ;;  %v1426_v49 = vmul.f32 %v1357_v31, %v1357_v31  ;;  %v1427_v19 = vmul.f32 %v1358_v26, %v1358_v26 }
 0x1f2   : > { %5508 = vst [vmem:[#allocation75_spill] sm:$0xff] %v4286_v33  ;;  %v1323_v25 = vsub.f32 %v3972_v3, %v4286_v33  ;;  %v1324_v34 = vsub.f32 %v3978_v16, %v4288_v40  ;;  %v1601_v59 = vsel %vm1027_vm1, %v1426_v49, 0.0  ;;  %v1604_v3 = vsel %vm1027_vm1, %v1427_v19, 0.0 }
 0x1f3   : > { %v1195_v55 = vpop.xlane.xlu1 %1194  ;;  %v1198_v2 = vpop.xlane.xlu0 %1197  ;;  %1497 = vadd.xlane.f32.xlu1 %v1496_v1  ;;  %1602 = vadd.xlane.f32.xlu0 %v1601_v59 }
 0x1f4   : > { %v4296_v41 = vmul.f32 0.020408163, %v1195_v55  ;;  %v4298_v54 = vmul.f32 0.020408163, %v1198_v2  ;;  %v1392_v31 = vmul.f32 %v1323_v25, %v1323_v25  ;;  %v1393_v10 = vmul.f32 %v1324_v34, %v1324_v34 }
 0x1f6   : > { %5509 = vst [vmem:[#allocation76_spill] sm:$0xff] %v4296_v41  ;;  %v1359_v57 = vsub.f32 %v3980_v17, %v4296_v41  ;;  %v1360_v47 = vsub.f32 %v3986_v28, %v4298_v54  ;;  %v1499_v26 = vsel %vm1027_vm1, %v1392_v31, 0.0  ;;  %v1502_v25 = vsel %vm1027_vm1, %v1393_v10, 0.0 }
 0x1f7   : > { %v1093_v49 = vpop.xlane.xlu1 %1092  ;;  %v1096_v16 = vpop.xlane.xlu0 %1095  ;;  %1605 = vadd.xlane.f32.xlu1 %v1604_v3  ;;  %1500 = vadd.xlane.f32.xlu0 %v1499_v26 }
 0x1f8   : > { %v4306_v55 = vmul.f32 0.020408163, %v1093_v49  ;;  %v4308_v2 = vmul.f32 0.020408163, %v1096_v16  ;;  %v1428_v1 = vmul.f32 %v1359_v57, %v1359_v57  ;;  %v1429_v31 = vmul.f32 %v1360_v47, %v1360_v47 }
 0x1fa   : > { %5510 = vst [vmem:[#allocation77_spill] sm:$0xff] %v4306_v55  ;;  %5511 = vst [vmem:[#allocation78_spill] sm:$0xff] %v4308_v2  ;;  %v1325_v34 = vsub.f32 %v3988_v29, %v4306_v55  ;;  %v1326_v59 = vsub.f32 %v3994_v44, %v4308_v2  ;;  %v1607_v19 = vsel %vm1027_vm1, %v1428_v1, 0.0  ;;  %v1610_v29 = vsel %vm1027_vm1, %v1429_v31, 0.0 }
 0x1fb   : > { %v1201_v17 = vpop.xlane.xlu1 %1200  ;;  %v1204_v28 = vpop.xlane.xlu0 %1203  ;;  %1503 = vadd.xlane.f32.xlu1 %v1502_v25  ;;  %1608 = vadd.xlane.f32.xlu0 %v1607_v19 }
 0x1fc   : > { %v4316_v3 = vmul.f32 0.020408163, %v1201_v17  ;;  %v4318_v16 = vmul.f32 0.020408163, %v1204_v28  ;;  %v1394_v57 = vmul.f32 %v1325_v34, %v1325_v34  ;;  %v1395_v26 = vmul.f32 %v1326_v59, %v1326_v59 }
 0x1fe   : > { %5512 = vst [vmem:[#allocation79_spill] sm:$0xff] %v4316_v3  ;;  %5513 = vst [vmem:[#allocation80_spill] sm:$0xff] %v4318_v16  ;;  %v1361_v10 = vsub.f32 %v3996_v45, %v4316_v3  ;;  %v1362_v49 = vsub.f32 %v4002_v62, %v4318_v16  ;;  %v1505_v47 = vsel %vm1027_vm1, %v1394_v57, 0.0  ;;  %v1508_v34 = vsel %vm1027_vm1, %v1395_v26, 0.0  ;;  %v1995_v16 = vld [vmem:[%s4455_s25 + $0x8] sm:$0xff] }
 0x1ff   : > { %v1099_v1 = vpop.xlane.xlu1 %1098  ;;  %v1102_v44 = vpop.xlane.xlu0 %1101  ;;  %1611 = vadd.xlane.f32.xlu1 %v1610_v29  ;;  %1506 = vadd.xlane.f32.xlu0 %v1505_v47 }
 0x200   : > { %v4326_v17 = vmul.f32 0.020408163, %v1099_v1  ;;  %v4328_v28 = vmul.f32 0.020408163, %v1102_v44  ;;  %v1430_v25 = vmul.f32 %v1361_v10, %v1361_v10  ;;  %v1431_v57 = vmul.f32 %v1362_v49, %v1362_v49 }
 0x202   : > { %5514 = vst [vmem:[#allocation81_spill] sm:$0xff] %v4326_v17  ;;  %5515 = vst [vmem:[#allocation82_spill] sm:$0xff] %v4328_v28  ;;  %v1327_v59 = vsub.f32 %v4004_v63, %v4326_v17  ;;  %v1328_v19 = vsub.f32 %v4010_v20, %v4328_v28  ;;  %v1613_v31 = vsel %vm1027_vm1, %v1430_v25, 0.0  ;;  %v1616_v63 = vsel %vm1027_vm1, %v1431_v57, 0.0 }
 0x203   : > { %v1207_v45 = vpop.xlane.xlu1 %1206  ;;  %v1210_v62 = vpop.xlane.xlu0 %1209  ;;  %1509 = vadd.xlane.f32.xlu1 %v1508_v34  ;;  %1614 = vadd.xlane.f32.xlu0 %v1613_v31 }
 0x204   : > { %v4336_v29 = vmul.f32 0.020408163, %v1207_v45  ;;  %v4338_v44 = vmul.f32 0.020408163, %v1210_v62  ;;  %v1396_v10 = vmul.f32 %v1327_v59, %v1327_v59  ;;  %v1397_v47 = vmul.f32 %v1328_v19, %v1328_v19  ;;  %v5520_v19 = vld [vmem:[#allocation53_spill] sm:$0xff] }
 0x206   : > { %5516 = vst [vmem:[#allocation83_spill] sm:$0xff] %v4336_v29  ;;  %5517 = vst [vmem:[#allocation84_spill] sm:$0xff] %v4338_v44  ;;  %v1363_v26 = vsub.f32 %v4012_v21, %v4336_v29  ;;  %v1364_v1 = vsub.f32 %v4018_v38, %v4338_v44  ;;  %v1511_v49 = vsel %vm1027_vm1, %v1396_v10, 0.0  ;;  %v1514_v59 = vsel %vm1027_vm1, %v1397_v47, 0.0  ;;  %v5521_v21 = vld [vmem:[#allocation54_spill] sm:$0xff]  ;;  %v5524_v47 = vld [vmem:[#allocation55_spill] sm:$0xff] }
 0x207   : > { %v1105_v25 = vpop.xlane.xlu1 %1104  ;;  %v1108_v20 = vpop.xlane.xlu0 %1107  ;;  %1617 = vadd.xlane.f32.xlu1 %v1616_v63  ;;  %1512 = vadd.xlane.f32.xlu0 %v1511_v49 }
 0x208   : > { %v4346_v45 = vmul.f32 0.020408163, %v1105_v25  ;;  %v4348_v62 = vmul.f32 0.020408163, %v1108_v20  ;;  %v1432_v34 = vmul.f32 %v1363_v26, %v1363_v26  ;;  %v1433_v10 = vmul.f32 %v1364_v1, %v1364_v1 }
 0x20a   : > { %5518 = vst [vmem:[#allocation85_spill] sm:$0xff] %v4346_v45  ;;  %5519 = vst [vmem:[#allocation86_spill] sm:$0xff] %v4348_v62  ;;  %v1329_v31 = vsub.f32 %v5520_v19, %v4346_v45  ;;  %v1330_v38 = vsub.f32 %v5521_v21, %v4348_v62  ;;  %v1619_v57 = vsel %vm1027_vm1, %v1432_v34, 0.0  ;;  %v5525_v19 = vld [vmem:[#allocation56_spill] sm:$0xff]  ;;  %v1622_v21 = vsel %vm1027_vm1, %v1433_v10, 0.0 }
 0x20b   : > { %v1213_v29 = vpop.xlane.xlu1 %1212  ;;  %v1216_v17 = vpop.xlane.xlu0 %1215  ;;  %1515 = vadd.xlane.f32.xlu1 %v1514_v59  ;;  %1620 = vadd.xlane.f32.xlu0 %v1619_v57 }
 0x20c   : > { %v4356_v63 = vmul.f32 0.020408163, %v1213_v29  ;;  %v4358_v20 = vmul.f32 0.020408163, %v1216_v17  ;;  %v1398_v26 = vmul.f32 %v1329_v31, %v1329_v31  ;;  %v1399_v49 = vmul.f32 %v1330_v38, %v1330_v38  ;;  %v5528_v31 = vld [vmem:[#allocation57_spill] sm:$0xff] }
 0x20e   : > { %5522 = vst [vmem:[#allocation87_spill] sm:$0xff] %v4356_v63  ;;  %5523 = vst [vmem:[#allocation88_spill] sm:$0xff] %v4358_v20  ;;  %v1365_v25 = vsub.f32 %v5524_v47, %v4356_v63  ;;  %v1366_v45 = vsub.f32 %v5525_v19, %v4358_v20  ;;  %v1517_v1 = vsel %vm1027_vm1, %v1398_v26, 0.0  ;;  %v1520_v38 = vsel %vm1027_vm1, %v1399_v49, 0.0  ;;  %v5529_v47 = vld [vmem:[#allocation58_spill] sm:$0xff]  ;;  %v5532_v49 = vld [vmem:[#allocation59_spill] sm:$0xff] }
 0x20f   : > { %v1111_v34 = vpop.xlane.xlu1 %1110  ;;  %v1114_v62 = vpop.xlane.xlu0 %1113  ;;  %1623 = vadd.xlane.f32.xlu1 %v1622_v21  ;;  %1518 = vadd.xlane.f32.xlu0 %v1517_v1 }
 0x210   : > { %v4366_v29 = vmul.f32 0.020408163, %v1111_v34  ;;  %v4368_v17 = vmul.f32 0.020408163, %v1114_v62  ;;  %v1434_v59 = vmul.f32 %v1365_v25, %v1365_v25  ;;  %v1435_v26 = vmul.f32 %v1366_v45, %v1366_v45 }
 0x212   : > { %5526 = vst [vmem:[#allocation89_spill] sm:$0xff] %v4366_v29  ;;  %5527 = vst [vmem:[#allocation90_spill] sm:$0xff] %v4368_v17  ;;  %v1331_v57 = vsub.f32 %v5528_v31, %v4366_v29  ;;  %v1332_v19 = vsub.f32 %v5529_v47, %v4368_v17  ;;  %v1625_v10 = vsel %vm1027_vm1, %v1434_v59, 0.0  ;;  %v5533_v31 = vld [vmem:[#allocation60_spill] sm:$0xff]  ;;  %v1628_v47 = vsel %vm1027_vm1, %v1435_v26, 0.0 }
 0x213   : > { %v1219_v63 = vpop.xlane.xlu1 %1218  ;;  %v1222_v20 = vpop.xlane.xlu0 %1221  ;;  %1521 = vadd.xlane.f32.xlu1 %v1520_v38  ;;  %1626 = vadd.xlane.f32.xlu0 %v1625_v10 }
 0x214   : > { %v4376_v21 = vmul.f32 0.020408163, %v1219_v63  ;;  %v4378_v62 = vmul.f32 0.020408163, %v1222_v20  ;;  %v1400_v25 = vmul.f32 %v1331_v57, %v1331_v57  ;;  %v1401_v1 = vmul.f32 %v1332_v19, %v1332_v19  ;;  %v5536_v57 = vld [vmem:[#allocation61_spill] sm:$0xff] }
 0x216   : > { %5530 = vst [vmem:[#allocation91_spill] sm:$0xff] %v4376_v21  ;;  %5531 = vst [vmem:[#allocation92_spill] sm:$0xff] %v4378_v62  ;;  %v1367_v34 = vsub.f32 %v5532_v49, %v4376_v21  ;;  %v1368_v29 = vsub.f32 %v5533_v31, %v4378_v62  ;;  %v1523_v45 = vsel %vm1027_vm1, %v1400_v25, 0.0  ;;  %v1526_v19 = vsel %vm1027_vm1, %v1401_v1, 0.0  ;;  %v5537_v49 = vld [vmem:[#allocation62_spill] sm:$0xff]  ;;  %v5540_v1 = vld [vmem:[#allocation63_spill] sm:$0xff] }
 0x217   : > { %v1117_v59 = vpop.xlane.xlu1 %1116  ;;  %v1120_v17 = vpop.xlane.xlu0 %1119  ;;  %1629 = vadd.xlane.f32.xlu1 %v1628_v47  ;;  %1524 = vadd.xlane.f32.xlu0 %v1523_v45 }
 0x218   : > { %v4386_v63 = vmul.f32 0.020408163, %v1117_v59  ;;  %v4388_v20 = vmul.f32 0.020408163, %v1120_v17  ;;  %v1436_v38 = vmul.f32 %v1367_v34, %v1367_v34  ;;  %v1437_v25 = vmul.f32 %v1368_v29, %v1368_v29 }
 0x21a   : > { %5534 = vst [vmem:[#allocation93_spill] sm:$0xff] %v4386_v63  ;;  %5535 = vst [vmem:[#allocation94_spill] sm:$0xff] %v4388_v20  ;;  %v1333_v10 = vsub.f32 %v5536_v57, %v4386_v63  ;;  %v1334_v31 = vsub.f32 %v5537_v49, %v4388_v20  ;;  %v1631_v26 = vsel %vm1027_vm1, %v1436_v38, 0.0  ;;  %v5541_v57 = vld [vmem:[#allocation64_spill] sm:$0xff]  ;;  %v1634_v49 = vsel %vm1027_vm1, %v1437_v25, 0.0 }
 0x21b   : > { %v1225_v21 = vpop.xlane.xlu1 %1224  ;;  %v1228_v62 = vpop.xlane.xlu0 %1227  ;;  %1527 = vadd.xlane.f32.xlu1 %v1526_v19  ;;  %1632 = vadd.xlane.f32.xlu0 %v1631_v26 }
 0x21c   : > { %v4396_v47 = vmul.f32 0.020408163, %v1225_v21  ;;  %v4398_v17 = vmul.f32 0.020408163, %v1228_v62  ;;  %v1402_v34 = vmul.f32 %v1333_v10, %v1333_v10  ;;  %v1403_v45 = vmul.f32 %v1334_v31, %v1334_v31  ;;  %v5544_v10 = vld [vmem:[#allocation65_spill] sm:$0xff] }
 0x21e   : > { %5538 = vst [vmem:[#allocation95_spill] sm:$0xff] %v4396_v47  ;;  %5539 = vst [vmem:[#allocation96_spill] sm:$0xff] %v4398_v17  ;;  %v1369_v59 = vsub.f32 %v5540_v1, %v4396_v47  ;;  %v1370_v63 = vsub.f32 %v5541_v57, %v4398_v17  ;;  %v1529_v29 = vsel %vm1027_vm1, %v1402_v34, 0.0  ;;  %v1532_v31 = vsel %vm1027_vm1, %v1403_v45, 0.0  ;;  %v5545_v1 = vld [vmem:[#allocation66_spill] sm:$0xff]  ;;  %v5548_v45 = vld [vmem:[#allocation67_spill] sm:$0xff] }
 0x21f   : > { %v1123_v38 = vpop.xlane.xlu1 %1122  ;;  %v1126_v20 = vpop.xlane.xlu0 %1125  ;;  %1635 = vadd.xlane.f32.xlu1 %v1634_v49  ;;  %1530 = vadd.xlane.f32.xlu0 %v1529_v29 }
 0x220   : > { %v4406_v21 = vmul.f32 0.020408163, %v1123_v38  ;;  %v4408_v62 = vmul.f32 0.020408163, %v1126_v20  ;;  %v1438_v19 = vmul.f32 %v1369_v59, %v1369_v59  ;;  %v1439_v34 = vmul.f32 %v1370_v63, %v1370_v63 }
 0x222   : > { %5542 = vst [vmem:[#allocation97_spill] sm:$0xff] %v4406_v21  ;;  %5543 = vst [vmem:[#allocation98_spill] sm:$0xff] %v4408_v62  ;;  %v1335_v26 = vsub.f32 %v5544_v10, %v4406_v21  ;;  %v1336_v57 = vsub.f32 %v5545_v1, %v4408_v62  ;;  %v1637_v25 = vsel %vm1027_vm1, %v1438_v19, 0.0  ;;  %v5549_v10 = vld [vmem:[#allocation68_spill] sm:$0xff]  ;;  %v1640_v1 = vsel %vm1027_vm1, %v1439_v34, 0.0 }
 0x223   : > { %v1231_v47 = vpop.xlane.xlu1 %1230  ;;  %v1234_v17 = vpop.xlane.xlu0 %1233  ;;  %1533 = vadd.xlane.f32.xlu1 %v1532_v31  ;;  %1638 = vadd.xlane.f32.xlu0 %v1637_v25  ;;  %v5552_v25 = vld [vmem:[#allocation69_spill] sm:$0xff] }
 0x224   : > { %v4416_v49 = vmul.f32 0.020408163, %v1231_v47  ;;  %v4418_v20 = vmul.f32 0.020408163, %v1234_v17  ;;  %v1404_v59 = vmul.f32 %v1335_v26, %v1335_v26  ;;  %v1405_v29 = vmul.f32 %v1336_v57, %v1336_v57 }
 0x226   : > { %5546 = vst [vmem:[#allocation99_spill] sm:$0xff] %v4416_v49  ;;  %5547 = vst [vmem:[#allocation100_spill] sm:$0xff] %v4418_v20  ;;  %v1371_v38 = vsub.f32 %v5548_v45, %v4416_v49  ;;  %v1372_v21 = vsub.f32 %v5549_v10, %v4418_v20  ;;  %v1535_v63 = vsel %vm1027_vm1, %v1404_v59, 0.0  ;;  %v1538_v57 = vsel %vm1027_vm1, %v1405_v29, 0.0  ;;  %v5553_v10 = vld [vmem:[#allocation70_spill] sm:$0xff] }
 0x227   : > { %1641 = vadd.xlane.f32.xlu1 %v1640_v1  ;;  %v1129_v19 = vpop.xlane.xlu1 %1128  ;;  %1536 = vadd.xlane.f32.xlu0 %v1535_v63  ;;  %v1132_v31 = vpop.xlane.xlu0 %1131 }
 0x228   : > { %v4426_v47 = vmul.f32 0.020408163, %v1129_v19  ;;  %v4428_v17 = vmul.f32 0.020408163, %v1132_v31  ;;  %v1440_v26 = vmul.f32 %v1371_v38, %v1371_v38  ;;  %v1441_v59 = vmul.f32 %v1372_v21, %v1372_v21 }
 0x22a   : > { %5550 = vst [vmem:[#allocation101_spill] sm:$0xff] %v4426_v47  ;;  %5551 = vst [vmem:[#allocation102_spill] sm:$0xff] %v4428_v17  ;;  %v1337_v45 = vsub.f32 %v5552_v25, %v4426_v47  ;;  %v1338_v49 = vsub.f32 %v5553_v10, %v4428_v17  ;;  %v1643_v34 = vsel %vm1027_vm1, %v1440_v26, 0.0  ;;  %v1646_v63 = vsel %vm1027_vm1, %v1441_v59, 0.0 }
 0x22b   : > { %1539 = vadd.xlane.f32.xlu1 %v1538_v57  ;;  %1644 = vadd.xlane.f32.xlu0 %v1643_v34 }
 0x22c   : > { %v1406_v1 = vmul.f32 %v1337_v45, %v1337_v45  ;;  %v1407_v31 = vmul.f32 %v1338_v49, %v1338_v49 }
 0x22e   : > { %v1541_v19 = vsel %vm1027_vm1, %v1406_v1, 0.0  ;;  %v1544_v29 = vsel %vm1027_vm1, %v1407_v31, 0.0 }
 0x22f   : > { %1647 = vadd.xlane.f32.xlu1 %v1646_v63  ;;  %1542 = vadd.xlane.f32.xlu0 %v1541_v19  ;;  %v1856_v19 = vld [vmem:[%s4446_s22] sm:$0xff] }
 0x233   : > { %1545 = vadd.xlane.f32.xlu1 %v1544_v29 }
 0x234   : > { %v1444_v38 = vpop.xlane.xlu1 %1443  ;;  %v1549_v25 = vpop.xlane.xlu0 %1548 }
 0x235   : > { %v1649_v10 = vmul.f32 0.020408163, %v1444_v38  ;;  %v1684_v47 = vmul.f32 0.020408163, %v1549_v25 }
 0x237   : > { %v1718_v26 = vadd.f32 0.001, %v1649_v10  ;;  %v1753_v21 = vadd.f32 0.001, %v1684_v47 }
 0x238   : > { %v1447_v57 = vpop.xlane.xlu0 %1446 }
 0x239   : > { %3330 = vrsqrt.f32 %v1718_v26  ;;  %v1650_v45 = vmul.f32 0.020408163, %v1447_v57 }
 0x23a   : > { %3332 = vrsqrt.f32 %v1753_v21 }
 0x23b   : > { %v1719_v34 = vadd.f32 0.001, %v1650_v45 }
 0x23c   : > { %v1552_v49 = vpop.xlane.xlu1 %1551 }
 0x23d   : > { %3334 = vrsqrt.f32 %v1719_v34  ;;  %v1685_v59 = vmul.f32 0.020408163, %v1552_v49  ;;  %v1891_v34 = vld [vmem:[%s4446_s22 + $0x118] sm:$0xff] }
 0x23f   : > { %v1754_v10 = vadd.f32 0.001, %v1685_v59  ;;  %v1857_v59 = vld [vmem:[%s4446_s22 + $0x8] sm:$0xff] }
 0x240   : > { %v1450_v47 = vpop.xlane.xlu1 %1449  ;;  %v1555_v25 = vpop.xlane.xlu0 %1554 }
 0x241   : > { %3336 = vrsqrt.f32 %v1754_v10  ;;  %v1651_v1 = vmul.f32 0.020408163, %v1450_v47  ;;  %v1686_v63 = vmul.f32 0.020408163, %v1555_v25 }
 0x243   : > { %v3331_v31 = vpop.eup %3330  ;;  %v1720_v29 = vadd.f32 0.001, %v1651_v1  ;;  %v1755_v38 = vadd.f32 0.001, %v1686_v63 }
 0x244   : > { %v3333_v26 = vpop.eup %3332  ;;  %v1558_v21 = vpop.xlane.xlu1 %1557  ;;  %v1925_v45 = vmul.f32 %v3331_v31, %v1856_v19  ;;  %v5554_v31 = vld [vmem:[#allocation71_spill] sm:$0xff] }
 0x245   : > { %v1453_v57 = vpop.xlane.xlu0 %1452  ;;  %3338 = vrsqrt.f32 %v1720_v29  ;;  %v1687_v49 = vmul.f32 0.020408163, %v1558_v21  ;;  %v1960_v47 = vmul.f32 %v3333_v26, %v1891_v34 }
 0x246   : > { %3340 = vrsqrt.f32 %v1755_v38  ;;  %v1652_v20 = vmul.f32 0.020408163, %v1453_v57  ;;  %2203 = vperm.xlu0 %3328, %v1925_v45   ;;  %v2063_v29 = vmul.f32 %v1925_v45, %v5554_v31  ;;  %v1994_v38 = vld [vmem:[%s4455_s25] sm:$0xff] }
 0x247   : > { %v3335_v10 = vpop.eup %3334  ;;  %v1756_v25 = vadd.f32 0.001, %v1687_v49  ;;  %v1892_v57 = vld [vmem:[%s4446_s22 + $0x120] sm:$0xff]  ;;  %v2098_v26 = vmul.f32 %v1960_v47, %v4094_v39 }
 0x248   : > { %v1456_v1 = vpop.xlane.xlu1 %1455  ;;  %v1926_v19 = vmul.f32 %v3335_v10, %v1857_v59  ;;  %v1721_v62 = vadd.f32 0.001, %v1652_v20  ;;  %v2132_v10 = vsub.f32 %v1994_v38, %v2063_v29  ;;  %v1893_v20 = vld [vmem:[%s4446_s22 + $0x128] sm:$0xff] }
 0x249   : > { %v1561_v63 = vpop.xlane.xlu0 %1560  ;;  %v1653_v21 = vmul.f32 0.020408163, %v1456_v1  ;;  %3342 = vrsqrt.f32 %v1756_v25  ;;  %v2029_v1 = vld [vmem:[%s4455_s25 + $0x118] sm:$0xff] }
 0x24a   : > { %v1688_v17 = vmul.f32 0.020408163, %v1561_v63  ;;  %2378 = vperm.xlu0 %3328, %v1960_v47   ;;  %2208 = vperm.xlu1 %3329, %v1926_v19   ;;  %3344 = vrsqrt.f32 %v1721_v62  ;;  %v1858_v63 = vld [vmem:[%s4446_s22 + $0x10] sm:$0xff]  ;;  %v2030_v62 = vld [vmem:[%s4455_s25 + $0x120] sm:$0xff] }
 0x24b   : > { %v3337_v3 = vpop.eup %3336  ;;  %v1722_v44 = vadd.f32 0.001, %v1653_v21 }
 0x24c   : > { %v1757_v34 = vadd.f32 0.001, %v1688_v17  ;;  %v1564_v49 = vpop.xlane.xlu1 %1563  ;;  %v1961_v45 = vmul.f32 %v3337_v3, %v1892_v57  ;;  %v2167_v17 = vsub.f32 %v2029_v1, %v2098_v26 }
 0x24d   : > { %v1459_v59 = vpop.xlane.xlu0 %1458  ;;  %3346 = vrsqrt.f32 %v1722_v44  ;;  %v1689_v21 = vmul.f32 0.020408163, %v1564_v49 }
 0x24e   : > { %2617 = vperm.xlu0 %3328, %v2132_v10   ;;  %2383 = vperm.xlu1 %3329, %v1961_v45   ;;  %3348 = vrsqrt.f32 %v1757_v34  ;;  %v2099_v3 = vmul.f32 %v1961_v45, %v4108_v46  ;;  %v5555_v34 = vld [vmem:[#allocation72_spill] sm:$0xff] }
 0x24f   : > { %v3339_v31 = vpop.eup %3338  ;;  %v1758_v38 = vadd.f32 0.001, %v1689_v21  ;;  %v2064_v49 = vmul.f32 %v1926_v19, %v5555_v34  ;;  %v1996_v46 = vld [vmem:[%s4455_s25 + $0x10] sm:$0xff]  ;;  %v1654_v34 = vmul.f32 0.020408163, %v1459_v59 }
 0x250   : > { %v3341_v55 = vpop.eup %3340  ;;  %v1462_v28 = vpop.xlane.xlu1 %1461  ;;  %v1927_v25 = vmul.f32 %v3339_v31, %v1858_v63  ;;  %v2168_v41 = vsub.f32 %v2030_v62, %v2099_v3  ;;  %v1894_v45 = vld [vmem:[%s4446_s22 + $0x130] sm:$0xff] }
 0x251   : > { %v1567_v39 = vpop.xlane.xlu0 %1566  ;;  %v1962_v47 = vmul.f32 %v3341_v55, %v1893_v20  ;;  %v1655_v29 = vmul.f32 0.020408163, %v1462_v28  ;;  %3350 = vrsqrt.f32 %v1758_v38  ;;  %v2133_v21 = vsub.f32 %v1995_v16, %v2064_v49 }
 0x252   : > { %2792 = vperm.xlu1 %3329, %v2167_v17   ;;  %v1690_v57 = vmul.f32 0.020408163, %v1567_v39  ;;  %v2065_v55 = vmul.f32 %v1927_v25, %v4110_v56  ;;  %v1859_v17 = vld [vmem:[%s4446_s22 + $0x18] sm:$0xff] }
 0x253   : > { %2388 = vperm.xlu0 %3328, %v1962_v47   ;;  %v3343_v26 = vpop.eup %3342  ;;  %v1724_v28 = vadd.f32 0.001, %v1655_v29  ;;  %v1895_v56 = vld [vmem:[%s4446_s22 + $0x138] sm:$0xff] }
 0x254   : > { %v1570_v44 = vpop.xlane.xlu1 %1569  ;;  %v3345_v1 = vpop.eup %3344  ;;  %v1759_v20 = vadd.f32 0.001, %v1690_v57  ;;  %v2134_v39 = vsub.f32 %v1996_v46, %v2065_v55  ;;  %v1963_v3 = vmul.f32 %v3343_v26, %v1894_v45  ;;  %v2032_v55 = vld [vmem:[%s4455_s25 + $0x130] sm:$0xff]  ;;  %v1723_v26 = vadd.f32 0.001, %v1654_v34 }
 0x255   : > { %v4466_v10 = vpop.xlane.xlu0 %1464  ;;  %3352 = vrsqrt.f32 %v1724_v28  ;;  %v1928_v57 = vmul.f32 %v3345_v1, %v1859_v17  ;;  %v5556_v28 = vld [vmem:[#allocation73_spill] sm:$0xff]  ;;  %v1896_v17 = vld [vmem:[%s4446_s22 + $0x140] sm:$0xff] }
 0x256   : > { %2213 = vperm.xlu1 %3329, %v1927_v25   ;;  %v1860_v25 = vld [vmem:[%s4446_s22 + $0x20] sm:$0xff]  ;;  %3354 = vrsqrt.f32 %v1759_v20  ;;  %v2101_v16 = vmul.f32 %v1963_v3, %v4117_v52  ;;  %v2100_v20 = vmul.f32 %v1962_v47, %v5556_v28 }
 0x257   : > { %2797 = vperm.xlu0 %3328, %v2168_v41   ;;  %v3347_v19 = vpop.eup %3346  ;;  %v1691_v41 = vmul.f32 0.020408163, %v1570_v44  ;;  %3356 = vrsqrt.f32 %v1723_v26  ;;  %v5557_v28 = vld [vmem:[#allocation74_spill] sm:$0xff] }
 0x258   : > { %v1468_v63 = vpop.xlane.xlu1 %1467  ;;  %v3349_v62 = vpop.eup %3348  ;;  %v1929_v49 = vmul.f32 %v3347_v19, %v1860_v25  ;;  %v2170_v1 = vsub.f32 %v2032_v55, %v2101_v16  ;;  %v1998_v19 = vld [vmem:[%s4455_s25 + $0x20] sm:$0xff]  ;;  %v1862_v55 = vld [vmem:[%s4446_s22 + $0x30] sm:$0xff] }
 0x259   : > { %v1573_v31 = vpop.xlane.xlu0 %1572  ;;  %v4476_v33 = vmul.f32 %v3349_v62, %v1895_v56  ;;  %v1760_v59 = vadd.f32 0.001, %v1691_v41  ;;  %v1657_v62 = vmul.f32 0.020408163, %v1468_v63 }
 0x25a   : > { %2622 = vperm.xlu1 %3329, %v2133_v21   ;;  %v1692_v46 = vmul.f32 0.020408163, %v1573_v31  ;;  %v2031_v21 = vld [vmem:[%s4455_s25 + $0x128] sm:$0xff] }
 0x25b   : > { %2627 = vperm.xlu0 %3328, %v2134_v39   ;;  %v2067_v39 = vmul.f32 %v1929_v49, %v4128_v27  ;;  %v3351_v52 = vpop.eup %3350  ;;  %3358 = vrsqrt.f32 %v1760_v59  ;;  %v2169_v47 = vsub.f32 %v2031_v21, %v2100_v20  ;;  %v1726_v26 = vadd.f32 0.001, %v1657_v62  ;;  %v1997_v21 = vld [vmem:[%s4455_s25 + $0x18] sm:$0xff] }
 0x25c   : > { %v1576_v29 = vpop.xlane.xlu1 %1575  ;;  %v1761_v31 = vadd.f32 0.001, %v1692_v46  ;;  %v1965_v27 = vmul.f32 %v3351_v52, %v1896_v17 }
 0x25d   : > { %v1471_v38 = vpop.xlane.xlu0 %1470  ;;  %v2136_v41 = vsub.f32 %v1998_v19, %v2067_v39  ;;  %v2034_v19 = vld [vmem:[%s4455_s25 + $0x140] sm:$0xff] }
 0x25e   : > { %2218 = vperm.xlu1 %3329, %v1928_v57   ;;  %3360 = vrsqrt.f32 %v1761_v31  ;;  %v1658_v59 = vmul.f32 0.020408163, %v1471_v38  ;;  %v2103_v39 = vmul.f32 %v1965_v27, %v4138_v48  ;;  %v1693_v38 = vmul.f32 0.020408163, %v1576_v29 }
 0x25f   : > { %2398 = vperm.xlu0 %3328, %v4476_v33   ;;  %v3353_v34 = vpop.eup %3352  ;;  %3362 = vrsqrt.f32 %v1726_v26 }
 0x260   : > { %v4481_v45 = vpop.xlane.xlu1 %1473  ;;  %v3355_v16 = vpop.eup %3354  ;;  %v4503_v52 = vmul.f32 %v3353_v34, %v1862_v55  ;;  %v1727_v17 = vadd.f32 0.001, %v1658_v59  ;;  %v1656_v55 = vmul.f32 0.020408163, %v4466_v10  ;;  %v1762_v29 = vadd.f32 0.001, %v1693_v38 }
 0x261   : > { %v1579_v44 = vpop.xlane.xlu0 %1578  ;;  %v1659_v10 = vmul.f32 0.020408163, %v4481_v45 }
 0x262   : > { %2393 = vperm.xlu1 %3329, %v1963_v3   ;;  %v1897_v3 = vld [vmem:[%s4446_s22 + $0x148] sm:$0xff]  ;;  %v2069_v48 = vmul.f32 %v4503_v52, %v4148_v11  ;;  %3364 = vrsqrt.f32 %v1727_v17  ;;  %v1694_v26 = vmul.f32 0.020408163, %v1579_v44 }
 0x263   : > { %2807 = vperm.xlu0 %3328, %v2170_v1   ;;  %v2066_v1 = vmul.f32 %v1928_v57, %v5557_v28  ;;  %v4499_v20 = vmul.f32 %v3355_v16, %v1897_v3  ;;  %v1861_v16 = vld [vmem:[%s4446_s22 + $0x28] sm:$0xff]  ;;  %v1898_v3 = vld [vmem:[%s4446_s22 + $0x150] sm:$0xff]  ;;  %3366 = vrsqrt.f32 %v1762_v29  ;;  %v1728_v45 = vadd.f32 0.001, %v1659_v10 }
 0x264   : > { %v4488_v56 = vpop.xlane.xlu1 %1581  ;;  %v1763_v44 = vadd.f32 0.001, %v1694_v26 }
 0x265   : > { %v4490_v25 = vpop.xlane.xlu0 %1476  ;;  %v2135_v31 = vsub.f32 %v1997_v21, %v2066_v1 }
 0x266   : > { %2802 = vperm.xlu1 %3329, %v2169_v47   ;;  %v3357_v47 = vpop.eup %3356 }
 0x267   : > { %2637 = vperm.xlu0 %3328, %v2136_v41   ;;  %v2172_v41 = vsub.f32 %v2034_v19, %v2103_v39  ;;  %v3359_v34 = vpop.eup %3358  ;;  %v1930_v1 = vmul.f32 %v3357_v47, %v1861_v16  ;;  %v1899_v19 = vld [vmem:[%s4446_s22 + $0x158] sm:$0xff]  ;;  %v2102_v47 = vmul.f32 %v4476_v33, %v4136_v53 }
 0x268   : > { %v4494_v63 = vpop.xlane.xlu1 %1479  ;;  %v4521_v39 = vmul.f32 %v3359_v34, %v1898_v3  ;;  %v3361_v11 = vpop.eup %3360  ;;  %v2033_v16 = vld [vmem:[%s4455_s25 + $0x138] sm:$0xff]  ;;  %v1864_v3 = vld [vmem:[%s4446_s22 + $0x40] sm:$0xff] }
 0x269   : > { %v4496_v46 = vpop.xlane.xlu0 %1584  ;;  %v3363_v34 = vpop.eup %3362  ;;  %v2171_v33 = vsub.f32 %v2033_v16, %v2102_v47  ;;  %v2068_v10 = vmul.f32 %v1930_v1, %v4146_v0  ;;  %v1999_v47 = vld [vmem:[%s4455_s25 + $0x28] sm:$0xff] }
 0x26a   : > { %2223 = vperm.xlu1 %3329, %v1929_v49   ;;  %v2000_v49 = vld [vmem:[%s4455_s25 + $0x30] sm:$0xff] }
 0x26b   : > { %2408 = vperm.xlu0 %3328, %v4499_v20   ;;  %v2138_v21 = vsub.f32 %v2000_v49, %v2069_v48  ;;  %v2105_v48 = vmul.f32 %v4521_v39, %v4158_v58  ;;  %v2036_v49 = vld [vmem:[%s4455_s25 + $0x150] sm:$0xff]  ;;  %v4544_v58 = vmul.f32 %v3363_v34, %v1864_v3  ;;  %v2002_v34 = vld [vmem:[%s4455_s25 + $0x40] sm:$0xff]  ;;  %v1696_v3 = vmul.f32 0.020408163, %v4496_v46 }
 0x26c   : > { %v4507_v62 = vpop.xlane.xlu1 %1587 }
 0x26d   : > { %v4509_v57 = vpop.xlane.xlu0 %1482  ;;  %v2174_v26 = vsub.f32 %v2036_v49, %v2105_v48  ;;  %v2071_v16 = vmul.f32 %v4544_v58, %v4168_v12  ;;  %v1863_v12 = vld [vmem:[%s4446_s22 + $0x38] sm:$0xff]  ;;  %v1765_v46 = vadd.f32 0.001, %v1696_v3 }
 0x26e   : > { %2632 = vperm.xlu1 %3329, %v2135_v31   ;;  %v1725_v31 = vadd.f32 0.001, %v1656_v55  ;;  %v1660_v55 = vmul.f32 0.020408163, %v4490_v25 }
 0x26f   : > { %2817 = vperm.xlu0 %3328, %v2172_v41   ;;  %v4531_v41 = vmul.f32 %v3361_v11, %v1899_v19  ;;  %v1695_v11 = vmul.f32 0.020408163, %v4488_v56  ;;  %v1900_v56 = vld [vmem:[%s4446_s22 + $0x160] sm:$0xff] }
 0x270   : > { %v4517_v59 = vpop.xlane.xlu1 %1485  ;;  %3368 = vrsqrt.f32 %v1725_v31  ;;  %v1729_v19 = vadd.f32 0.001, %v1660_v55 }
 0x271   : > { %v4519_v28 = vpop.xlane.xlu0 %1590  ;;  %3370 = vrsqrt.f32 %v1763_v44  ;;  %v1764_v49 = vadd.f32 0.001, %v1695_v11 }
 0x272   : > { %2228 = vperm.xlu1 %3329, %v1930_v1   ;;  %3372 = vrsqrt.f32 %v1728_v45  ;;  %v2137_v45 = vsub.f32 %v1999_v47, %v2068_v10 }
 0x273   : > { %2647 = vperm.xlu0 %3328, %v2138_v21   ;;  %v1865_v21 = vld [vmem:[%s4446_s22 + $0x48] sm:$0xff]  ;;  %3374 = vrsqrt.f32 %v1729_v19 }
 0x274   : > { %v4525_v38 = vpop.xlane.xlu1 %1593  ;;  %3376 = vrsqrt.f32 %v1764_v49  ;;  %v1662_v49 = vmul.f32 0.020408163, %v4509_v57  ;;  %v1697_v57 = vmul.f32 0.020408163, %v4507_v62 }
 0x275   : > { %v4527_v17 = vpop.xlane.xlu0 %1488  ;;  %3378 = vrsqrt.f32 %v1765_v46 }
 0x276   : > { %2403 = vperm.xlu1 %3329, %v1965_v27   ;;  %v3365_v27 = vpop.eup %3364  ;;  %v1766_v62 = vadd.f32 0.001, %v1697_v57 }
 0x277   : > { %2418 = vperm.xlu0 %3328, %v4531_v41   ;;  %v4553_v44 = vmul.f32 %v3365_v27, %v1865_v21  ;;  %v3367_v48 = vpop.eup %3366  ;;  %v1901_v27 = vld [vmem:[%s4446_s22 + $0x168] sm:$0xff]  ;;  %v1661_v21 = vmul.f32 0.020408163, %v4494_v63 }
 0x278   : > { %v4540_v29 = vpop.xlane.xlu1 %1491 }
 0x279   : > { %v4542_v53 = vpop.xlane.xlu0 %1596  ;;  %v1730_v63 = vadd.f32 0.001, %v1661_v21  ;;  %v1731_v21 = vadd.f32 0.001, %v1662_v49 }
 0x27a   : > { %2812 = vperm.xlu1 %3329, %v2171_v33   ;;  %v3369_v55 = vpop.eup %3368  ;;  %v2140_v33 = vsub.f32 %v2002_v34, %v2071_v16  ;;  %v2038_v34 = vld [vmem:[%s4455_s25 + $0x160] sm:$0xff] }
 0x27b   : > { %2827 = vperm.xlu0 %3328, %v2174_v26   ;;  %v4568_v26 = vmul.f32 %v3367_v48, %v1900_v56  ;;  %v1932_v10 = vmul.f32 %v3369_v55, %v1863_v12  ;;  %v1866_v56 = vld [vmem:[%s4446_s22 + $0x50] sm:$0xff]  ;;  %v2104_v55 = vmul.f32 %v4499_v20, %v4156_v6  ;;  %3380 = vrsqrt.f32 %v1730_v63 }
 0x27c   : > { %v4548_v25 = vpop.xlane.xlu1 %1599  ;;  %3382 = vrsqrt.f32 %v1731_v21 }
 0x27d   : > { %v4550_v31 = vpop.xlane.xlu0 %1494  ;;  %v2107_v16 = vmul.f32 %v4568_v26, %v4178_v18  ;;  %v2035_v18 = vld [vmem:[%s4455_s25 + $0x148] sm:$0xff]  ;;  %3384 = vrsqrt.f32 %v1766_v62 }
 0x27e   : > { %2233 = vperm.xlu1 %3329, %v4503_v52   ;;  %v3371_v52 = vpop.eup %3370  ;;  %v2173_v6 = vsub.f32 %v2035_v18, %v2104_v55  ;;  %v2070_v55 = vmul.f32 %v1932_v10, %v4166_v7  ;;  %v2001_v18 = vld [vmem:[%s4455_s25 + $0x38] sm:$0xff] }
 0x27f   : > { %2248 = vperm.xlu0 %3328, %v4553_v44   ;;  %v4576_v47 = vmul.f32 %v3371_v52, %v1901_v27  ;;  %v3373_v48 = vpop.eup %3372  ;;  %v1867_v27 = vld [vmem:[%s4446_s22 + $0x58] sm:$0xff] }
 0x280   : > { %v4563_v0 = vpop.xlane.xlu1 %1497  ;;  %v4591_v12 = vmul.f32 %v3373_v48, %v1866_v56  ;;  %v3375_v52 = vpop.eup %3374  ;;  %v1698_v56 = vmul.f32 0.020408163, %v4519_v28  ;;  %v1663_v28 = vmul.f32 0.020408163, %v4517_v59  ;;  %v2139_v7 = vsub.f32 %v2001_v18, %v2070_v55 }
 0x281   : > { %v4565_v1 = vpop.xlane.xlu0 %1602  ;;  %v4600_v20 = vmul.f32 %v3375_v52, %v1867_v27  ;;  %v3377_v48 = vpop.eup %3376  ;;  %v1903_v27 = vld [vmem:[%s4446_s22 + $0x178] sm:$0xff]  ;;  %v2106_v55 = vmul.f32 %v4531_v41, %v4176_v13 }
 0x282   : > { %2642 = vperm.xlu1 %3329, %v2137_v45   ;;  %v3379_v52 = vpop.eup %3378  ;;  %v1767_v57 = vadd.f32 0.001, %v1698_v56  ;;  %v1732_v59 = vadd.f32 0.001, %v1663_v28 }
 0x283   : > { %2657 = vperm.xlu0 %3328, %v2140_v33   ;;  %v2176_v33 = vsub.f32 %v2038_v34, %v2107_v16  ;;  %v2073_v16 = vmul.f32 %v4591_v12, %v4188_v35  ;;  %v1902_v34 = vld [vmem:[%s4446_s22 + $0x170] sm:$0xff] }
 0x284   : > { %v4572_v11 = vpop.xlane.xlu1 %1605  ;;  %v4614_v35 = vmul.f32 %v3377_v48, %v1902_v34  ;;  %3386 = vrsqrt.f32 %v1767_v57  ;;  %v1664_v34 = vmul.f32 0.020408163, %v4527_v17  ;;  %v1699_v17 = vmul.f32 0.020408163, %v4525_v38 }
 0x285   : > { %v4574_v19 = vpop.xlane.xlu0 %1500  ;;  %v3381_v48 = vpop.eup %3380  ;;  %3388 = vrsqrt.f32 %v1732_v59 }
 0x286   : > { %2238 = vperm.xlu1 %3329, %v1932_v10   ;;  %v4623_v10 = vmul.f32 %v3379_v52, %v1903_v27  ;;  %v3383_v52 = vpop.eup %3382  ;;  %v1869_v27 = vld [vmem:[%s4446_s22 + $0x68] sm:$0xff]  ;;  %v1733_v28 = vadd.f32 0.001, %v1664_v34  ;;  %v1768_v38 = vadd.f32 0.001, %v1699_v17 }
 0x287   : > { %2428 = vperm.xlu0 %3328, %v4576_v47   ;;  %v4647_v41 = vmul.f32 %v3383_v52, %v1869_v27  ;;  %v1905_v27 = vld [vmem:[%s4446_s22 + $0x188] sm:$0xff] }
 0x288   : > { %v4584_v3 = vpop.xlane.xlu1 %1503  ;;  %3390 = vrsqrt.f32 %v1733_v28 }
 0x289   : > { %v4586_v45 = vpop.xlane.xlu0 %1608  ;;  %3392 = vrsqrt.f32 %v1768_v38 }
 0x28a   : > { %2413 = vperm.xlu1 %3329, %v4521_v39   ;;  %v2004_v39 = vld [vmem:[%s4455_s25 + $0x50] sm:$0xff] }
 0x28b   : > { %2837 = vperm.xlu0 %3328, %v2176_v33   ;;  %v2142_v33 = vsub.f32 %v2004_v39, %v2073_v16  ;;  %v2109_v16 = vmul.f32 %v4614_v35, %v4198_v8  ;;  %v1868_v39 = vld [vmem:[%s4446_s22 + $0x60] sm:$0xff]  ;;  %v2037_v8 = vld [vmem:[%s4455_s25 + $0x158] sm:$0xff] }
 0x28c   : > { %v4596_v46 = vpop.xlane.xlu1 %1611  ;;  %v4638_v18 = vmul.f32 %v3381_v48, %v1868_v39  ;;  %v2175_v13 = vsub.f32 %v2037_v8, %v2106_v55  ;;  %v3385_v48 = vpop.eup %3384  ;;  %v1700_v39 = vmul.f32 0.020408163, %v4542_v53  ;;  %v2072_v55 = vmul.f32 %v4553_v44, %v4186_v24 }
 0x28d   : > { %v4598_v2 = vpop.xlane.xlu0 %1506  ;;  %v1665_v53 = vmul.f32 0.020408163, %v4540_v29 }
 0x28e   : > { %2822 = vperm.xlu1 %3329, %v2173_v6   ;;  %v3387_v52 = vpop.eup %3386  ;;  %v1769_v17 = vadd.f32 0.001, %v1700_v39 }
 0x28f   : > { %2258 = vperm.xlu0 %3328, %v4600_v20   ;;  %v4671_v44 = vmul.f32 %v3387_v52, %v1905_v27  ;;  %v1734_v29 = vadd.f32 0.001, %v1665_v53  ;;  %v1871_v27 = vld [vmem:[%s4446_s22 + $0x78] sm:$0xff] }
 0x290   : > { %v4608_v63 = vpop.xlane.xlu1 %1509  ;;  %3394 = vrsqrt.f32 %v1769_v17 }
 0x291   : > { %v4610_v49 = vpop.xlane.xlu0 %1614  ;;  %3396 = vrsqrt.f32 %v1734_v29 }
 0x292   : > { %2243 = vperm.xlu1 %3329, %v4544_v58   ;;  %v2040_v58 = vld [vmem:[%s4455_s25 + $0x170] sm:$0xff] }
 0x293   : > { %2667 = vperm.xlu0 %3328, %v2142_v33   ;;  %v2178_v33 = vsub.f32 %v2040_v58, %v2109_v16  ;;  %v2075_v16 = vmul.f32 %v4638_v18, %v4208_v30  ;;  %v1904_v58 = vld [vmem:[%s4446_s22 + $0x180] sm:$0xff]  ;;  %v2003_v30 = vld [vmem:[%s4455_s25 + $0x48] sm:$0xff] }
 0x294   : > { %v4619_v21 = vpop.xlane.xlu1 %1617  ;;  %v4662_v8 = vmul.f32 %v3385_v48, %v1904_v58  ;;  %v2141_v24 = vsub.f32 %v2003_v30, %v2072_v55  ;;  %v3389_v48 = vpop.eup %3388  ;;  %v1666_v58 = vmul.f32 0.020408163, %v4550_v31  ;;  %v2108_v55 = vmul.f32 %v4576_v47, %v4196_v9 }
 0x295   : > { %v4621_v6 = vpop.xlane.xlu0 %1512  ;;  %v3391_v52 = vpop.eup %3390  ;;  %v1701_v31 = vmul.f32 0.020408163, %v4548_v25 }
 0x296   : > { %2652 = vperm.xlu1 %3329, %v2139_v7   ;;  %v1735_v53 = vadd.f32 0.001, %v1666_v58  ;;  %v4695_v47 = vmul.f32 %v3391_v52, %v1871_v27  ;;  %v1907_v27 = vld [vmem:[%s4446_s22 + $0x198] sm:$0xff] }
 0x297   : > { %2438 = vperm.xlu0 %3328, %v4623_v10   ;;  %v1770_v25 = vadd.f32 0.001, %v1701_v31 }
 0x298   : > { %v4631_v62 = vpop.xlane.xlu1 %1515  ;;  %3398 = vrsqrt.f32 %v1735_v53 }
 0x299   : > { %v4633_v56 = vpop.xlane.xlu0 %1620  ;;  %3400 = vrsqrt.f32 %v1770_v25  ;;  %v2110_v25 = vmul.f32 %v4623_v10, %v4216_v37 }
 0x29a   : > { %2423 = vperm.xlu1 %3329, %v4568_v26   ;;  %v2006_v26 = vld [vmem:[%s4455_s25 + $0x60] sm:$0xff] }
 0x29b   : > { %2847 = vperm.xlu0 %3328, %v2178_v33   ;;  %v2144_v33 = vsub.f32 %v2006_v26, %v2075_v16  ;;  %v2111_v16 = vmul.f32 %v4662_v8, %v4218_v42  ;;  %v1870_v26 = vld [vmem:[%s4446_s22 + $0x70] sm:$0xff]  ;;  %v2039_v42 = vld [vmem:[%s4455_s25 + $0x168] sm:$0xff] }
 0x29c   : > { %v4643_v57 = vpop.xlane.xlu1 %1623  ;;  %v4686_v30 = vmul.f32 %v3389_v48, %v1870_v26  ;;  %v2177_v9 = vsub.f32 %v2039_v42, %v2108_v55  ;;  %v3393_v48 = vpop.eup %3392  ;;  %v1702_v26 = vmul.f32 0.020408163, %v4565_v1  ;;  %v2074_v55 = vmul.f32 %v4600_v20, %v4206_v36 }
 0x29d   : > { %v4645_v7 = vpop.xlane.xlu0 %1518  ;;  %v3395_v52 = vpop.eup %3394  ;;  %v1667_v1 = vmul.f32 0.020408163, %v4563_v0 }
 0x29e   : > { %2832 = vperm.xlu1 %3329, %v2175_v13   ;;  %v1771_v31 = vadd.f32 0.001, %v1702_v26  ;;  %v4719_v20 = vmul.f32 %v3395_v52, %v1907_v27  ;;  %v1873_v52 = vld [vmem:[%s4446_s22 + $0x88] sm:$0xff] }
 0x29f   : > { %2268 = vperm.xlu0 %3328, %v4647_v41   ;;  %v1736_v0 = vadd.f32 0.001, %v1667_v1 }
 0x2a0   : > { %v4655_v59 = vpop.xlane.xlu1 %1521  ;;  %3402 = vrsqrt.f32 %v1771_v31 }
 0x2a1   : > { %v4657_v34 = vpop.xlane.xlu0 %1626  ;;  %3404 = vrsqrt.f32 %v1736_v0 }
 0x2a2   : > { %2253 = vperm.xlu1 %3329, %v4591_v12   ;;  %v2042_v12 = vld [vmem:[%s4455_s25 + $0x180] sm:$0xff] }
 0x2a3   : > { %2677 = vperm.xlu0 %3328, %v2144_v33   ;;  %v2180_v33 = vsub.f32 %v2042_v12, %v2111_v16  ;;  %v2077_v16 = vmul.f32 %v4686_v30, %v4228_v50  ;;  %v1906_v12 = vld [vmem:[%s4446_s22 + $0x190] sm:$0xff]  ;;  %v2005_v50 = vld [vmem:[%s4455_s25 + $0x58] sm:$0xff] }
 0x2a4   : > { %v4667_v28 = vpop.xlane.xlu1 %1629  ;;  %v4710_v42 = vmul.f32 %v3393_v48, %v1906_v12  ;;  %v3397_v48 = vpop.eup %3396  ;;  %v1668_v12 = vmul.f32 0.020408163, %v4574_v19  ;;  %v1703_v19 = vmul.f32 0.020408163, %v4572_v11  ;;  %v1704_v11 = vmul.f32 0.020408163, %v4586_v45 }
 0x2a5   : > { %v4669_v13 = vpop.xlane.xlu0 %1524 }
 0x2a6   : > { %2662 = vperm.xlu1 %3329, %v2141_v24   ;;  %v1737_v1 = vadd.f32 0.001, %v1668_v12  ;;  %v1773_v45 = vadd.f32 0.001, %v1704_v11 }
 0x2a7   : > { %2448 = vperm.xlu0 %3328, %v4671_v44  }
 0x2a8   : > { %v4679_v38 = vpop.xlane.xlu1 %1527  ;;  %3406 = vrsqrt.f32 %v1737_v1 }
 0x2a9   : > { %v4681_v39 = vpop.xlane.xlu0 %1632 }
 0x2aa   : > { %2433 = vperm.xlu1 %3329, %v4614_v35   ;;  %v2008_v35 = vld [vmem:[%s4455_s25 + $0x70] sm:$0xff] }
 0x2ab   : > { %2857 = vperm.xlu0 %3328, %v2180_v33   ;;  %v2146_v33 = vsub.f32 %v2008_v35, %v2077_v16  ;;  %v2113_v16 = vmul.f32 %v4710_v42, %v4238_v60  ;;  %v1872_v35 = vld [vmem:[%s4446_s22 + $0x80] sm:$0xff] }
 0x2ac   : > { %v4691_v17 = vpop.xlane.xlu1 %1635  ;;  %v4732_v60 = vmul.f32 %v3397_v48, %v1872_v35  ;;  %v2076_v35 = vmul.f32 %v4647_v41, %v4226_v43 }
 0x2ad   : > { %v4693_v24 = vpop.xlane.xlu0 %1530 }
 0x2ae   : > { %2842 = vperm.xlu1 %3329, %v2177_v9   ;;  %v2143_v9 = vsub.f32 %v2005_v50, %v2074_v55  ;;  %v3399_v50 = vpop.eup %3398  ;;  %v2079_v31 = vmul.f32 %v4732_v60, %v4248_v4  ;;  %v2007_v4 = vld [vmem:[%s4455_s25 + $0x68] sm:$0xff] }
 0x2af   : > { %2278 = vperm.xlu0 %3328, %v4695_v47   ;;  %v4739_v10 = vmul.f32 %v3399_v50, %v1873_v52  ;;  %v1669_v50 = vmul.f32 0.020408163, %v4584_v3  ;;  %v2145_v52 = vsub.f32 %v2007_v4, %v2076_v35  ;;  %v2112_v3 = vmul.f32 %v4671_v44, %v4236_v51  ;;  %v1875_v4 = vld [vmem:[%s4446_s22 + $0x98] sm:$0xff] }
 0x2b0   : > { %v4703_v29 = vpop.xlane.xlu1 %1533  ;;  %v1705_v51 = vmul.f32 0.020408163, %v4596_v46  ;;  %v2012_v46 = vld [vmem:[%s4455_s25 + $0x90] sm:$0xff] }
 0x2b1   : > { %v4705_v58 = vpop.xlane.xlu0 %1638 }
 0x2b2   : > { %2263 = vperm.xlu1 %3329, %v4638_v18   ;;  %v2044_v18 = vld [vmem:[%s4455_s25 + $0x190] sm:$0xff] }
 0x2b3   : > { %2687 = vperm.xlu0 %3328, %v2146_v33   ;;  %v2182_v55 = vsub.f32 %v2044_v18, %v2113_v16  ;;  %v2041_v33 = vld [vmem:[%s4455_s25 + $0x178] sm:$0xff]  ;;  %v2010_v16 = vld [vmem:[%s4455_s25 + $0x80] sm:$0xff]  ;;  %v1772_v18 = vadd.f32 0.001, %v1703_v19 }
 0x2b4   : > { %v4715_v53 = vpop.xlane.xlu1 %1641  ;;  %v2179_v37 = vsub.f32 %v2041_v33, %v2110_v25  ;;  %v2148_v12 = vsub.f32 %v2010_v16, %v2079_v31  ;;  %v1909_v33 = vld [vmem:[%s4446_s22 + $0x1a8] sm:$0xff]  ;;  %v1874_v31 = vld [vmem:[%s4446_s22 + $0x90] sm:$0xff]  ;;  %v1670_v16 = vmul.f32 0.020408163, %v4598_v2  ;;  %v5558_v2 = vld [vmem:[#allocation2_spill] sm:$0xff] }
 0x2b5   : > { %v4717_v36 = vpop.xlane.xlu0 %1536  ;;  %3408 = vrsqrt.f32 %v1772_v18 }
 0x2b6   : > { %2672 = vperm.xlu1 %3329, %v2143_v9   ;;  %v3401_v9 = vpop.eup %3400  ;;  %3410 = vrsqrt.f32 %v1773_v45  ;;  %v1739_v44 = vadd.f32 0.001, %v1670_v16 }
 0x2b7   : > { %2458 = vperm.xlu0 %3328, %v4719_v20  }
 0x2b8   : > { %v4729_v26 = vpop.xlane.xlu1 %1539 }
 0x2b9   : > { %v4736_v27 = vpop.xlane.xlu0 %1644 }
 0x2ba   : > { %2443 = vperm.xlu1 %3329, %v4662_v8   ;;  %v1908_v8 = vld [vmem:[%s4446_s22 + $0x1a0] sm:$0xff] }
 0x2bb   : > { %2867 = vperm.xlu0 %3328, %v2182_v55   ;;  %v4754_v25 = vmul.f32 %v3401_v9, %v1908_v8  ;;  %v3403_v55 = vpop.eup %3402  ;;  %v1738_v9 = vadd.f32 0.001, %v1669_v50  ;;  %v2043_v8 = vld [vmem:[%s4455_s25 + $0x188] sm:$0xff] }
 0x2bc   : > { %v4745_v48 = vpop.xlane.xlu1 %1647  ;;  %v4761_v19 = vmul.f32 %v3403_v55, %v1909_v33  ;;  %v2181_v55 = vsub.f32 %v2043_v8, %v2112_v3  ;;  %v1706_v3 = vmul.f32 0.020408163, %v4610_v49  ;;  %v1671_v49 = vmul.f32 0.020408163, %v4608_v63 }
 0x2bd   : > { %v4751_v0 = vpop.xlane.xlu0 %1542  ;;  %v2115_v1 = vmul.f32 %v4754_v25, %v4258_v14  ;;  %3412 = vrsqrt.f32 %v1738_v9  ;;  %v5559_v9 = vld [vmem:[#allocation3_spill] sm:$0xff] }
 0x2be   : > { %2852 = vperm.xlu1 %3329, %v2179_v37   ;;  %v3405_v37 = vpop.eup %3404  ;;  %3414 = vrsqrt.f32 %v1739_v44 }
 0x2bf   : > { %2288 = vperm.xlu0 %3328, %v4739_v10   ;;  %v4772_v14 = vmul.f32 %v3405_v37, %v1874_v31  ;;  %v1774_v31 = vadd.f32 0.001, %v1705_v51  ;;  %v5560_v51 = vld [vmem:[#allocation5_spill] sm:$0xff] }
 0x2c0   : > { %v4759_v43 = vpop.xlane.xlu1 %1545 }
 0x2c1   : > { %3416 = vrsqrt.f32 %v1774_v31  ;;  %v5561_v31 = vld [vmem:[#allocation4_spill] sm:$0xff] }
 0x2c2   : > { %2273 = vperm.xlu1 %3329, %v4686_v30   ;;  %v2046_v30 = vld [vmem:[%s4455_s25 + $0x1a0] sm:$0xff] }
 0x2c3   : > { %2697 = vperm.xlu0 %3328, %v2148_v12   ;;  %v2184_v35 = vsub.f32 %v2046_v30, %v2115_v1  ;;  %v3407_v12 = vpop.eup %3406  ;;  %v1910_v30 = vld [vmem:[%s4446_s22 + $0x1b0] sm:$0xff] }
 0x2c4   : > { %v3409_v1 = vpop.eup %3408 }
 0x2c5   : > { %v2204_v41 = vpop.permute.xlu0 %2203 }
 0x2c6   : > { %2682 = vperm.xlu1 %3329, %v2145_v52   ;;  %v2546_v33 = vmul.f32 %v2204_v41, %v5558_v2  ;;  %v2081_v52 = vmul.f32 %v4772_v14, %v4268_v22  ;;  %v2078_v41 = vmul.f32 %v4695_v47, %v4246_v61  ;;  %v1911_v61 = vld [vmem:[%s4446_s22 + $0x1b8] sm:$0xff]  ;;  %v1775_v47 = vadd.f32 0.001, %v1706_v3 }
 0x2c7   : > { %2468 = vperm.xlu0 %3328, %v4761_v19  }
 0x2c8   : > { %v2150_v8 = vsub.f32 %v2012_v46, %v2081_v52  ;;  %v1876_v46 = vld [vmem:[%s4446_s22 + $0xa0] sm:$0xff]  ;;  %3418 = vrsqrt.f32 %v1775_v47 }
 0x2c9   : > { %v2209_v18 = vpop.permute.xlu1 %2208  ;;  %v2379_v11 = vpop.permute.xlu0 %2378 }
 0x2ca   : > { %2453 = vperm.xlu1 %3329, %v4710_v42   ;;  %v4784_v42 = vmul.f32 %v3407_v12, %v1875_v4  ;;  %v2581_v16 = vmul.f32 %v2379_v11, %v5559_v9  ;;  %v4798_v12 = vmul.f32 %v3409_v1, %v1910_v30  ;;  %v3411_v4 = vpop.eup %3410  ;;  %v1740_v30 = vadd.f32 0.001, %v1671_v49 }
 0x2cb   : > { %2877 = vperm.xlu0 %3328, %v2184_v35   ;;  %v2009_v35 = vld [vmem:[%s4455_s25 + $0x78] sm:$0xff]  ;;  %v2547_v3 = vmul.f32 %v2209_v18, %v5561_v31  ;;  %v1707_v18 = vmul.f32 0.020408163, %v4619_v21  ;;  %v1912_v21 = vld [vmem:[%s4446_s22 + $0x1c0] sm:$0xff] }
 0x2cc   : > { %v2147_v11 = vsub.f32 %v2009_v35, %v2078_v41  ;;  %v2117_v52 = vmul.f32 %v4798_v12, %v4278_v32  ;;  %v1672_v41 = vmul.f32 0.020408163, %v4621_v6  ;;  %v5562_v32 = vld [vmem:[#allocation6_spill] sm:$0xff]  ;;  %v1877_v6 = vld [vmem:[%s4446_s22 + $0xa8] sm:$0xff]  ;;  %3420 = vrsqrt.f32 %v1740_v30  ;;  %v5563_v30 = vld [vmem:[#allocation8_spill] sm:$0xff] }
 0x2cd   : > { %v2384_v50 = vpop.permute.xlu1 %2383  ;;  %v2618_v45 = vpop.permute.xlu0 %2617 }
 0x2ce   : > { %v2960_v37 = vadd.f32 %v2618_v45, %v2546_v33  ;;  %2862 = vperm.xlu1 %3329, %v2181_v55   ;;  %v2582_v44 = vmul.f32 %v2384_v50, %v5560_v51  ;;  %v4808_v45 = vmul.f32 %v3411_v4, %v1911_v61  ;;  %v2114_v50 = vmul.f32 %v4719_v20, %v4256_v5 }
 0x2cf   : > { %2298 = vperm.xlu0 %3328, %v4784_v42   ;;  %v1741_v61 = vadd.f32 0.001, %v1672_v41 }
 0x2d0   : > { %3029 = vst.msk [vmem:[%s4782_s28] sm:$0xff] %vm1027_vm1, %v2960_v37  ;;  %v2048_v37 = vld [vmem:[%s4455_s25 + $0x1b0] sm:$0xff] }
 0x2d1   : > { %v2793_v22 = vpop.permute.xlu1 %2792  ;;  %3422 = vrsqrt.f32 %v1741_v61 }
 0x2d2   : > { %v2995_v55 = vadd.f32 %v2793_v22, %v2581_v16  ;;  %v4800_v2 = vpop.permute.xlu0 %2388  ;;  %2283 = vperm.xlu1 %3329, %v4732_v60   ;;  %v3413_v60 = vpop.eup %3412  ;;  %v2186_v22 = vsub.f32 %v2048_v37, %v2117_v52  ;;  %v2080_v52 = vmul.f32 %v4739_v10, %v4266_v15  ;;  %v2011_v37 = vld [vmem:[%s4455_s25 + $0x88] sm:$0xff]  ;;  %v1673_v15 = vmul.f32 0.020408163, %v4631_v62 }
 0x2d3   : > { %2707 = vperm.xlu0 %3328, %v2150_v8   ;;  %v2045_v8 = vld [vmem:[%s4455_s25 + $0x198] sm:$0xff]  ;;  %v4823_v35 = vmul.f32 %v3413_v60, %v1876_v46  ;;  %v3415_v4 = vpop.eup %3414  ;;  %v1776_v60 = vadd.f32 0.001, %v1707_v18  ;;  %v1674_v18 = vmul.f32 0.020408163, %v4645_v7 }
 0x2d4   : > { %3064 = vst.msk [vmem:[%s4782_s28 + $0x118] sm:$0xff] %vm1027_vm1, %v2995_v55  ;;  %v2183_v49 = vsub.f32 %v2045_v8, %v2114_v50  ;;  %v3417_v51 = vpop.eup %3416  ;;  %v2149_v10 = vsub.f32 %v2011_v37, %v2080_v52  ;;  %v1709_v7 = vmul.f32 0.020408163, %v4643_v57  ;;  %v2016_v57 = vld [vmem:[%s4455_s25 + $0xb0] sm:$0xff] }
 0x2d5   : > { %v2214_v33 = vpop.permute.xlu1 %2213  ;;  %v3419_v50 = vpop.eup %3418  ;;  %3424 = vrsqrt.f32 %v1776_v60  ;;  %v1879_v60 = vld [vmem:[%s4446_s22 + $0xb8] sm:$0xff] }
 0x2d6   : > { %v2798_v1 = vpop.permute.xlu0 %2797  ;;  %2692 = vperm.xlu1 %3329, %v2147_v11   ;;  %v2548_v9 = vmul.f32 %v2214_v33, %v5562_v32  ;;  %v4832_v11 = vmul.f32 %v3415_v4, %v1877_v6  ;;  %v2014_v33 = vld [vmem:[%s4455_s25 + $0xa0] sm:$0xff]  ;;  %v5564_v32 = vld [vmem:[#allocation7_spill] sm:$0xff]  ;;  %v3421_v4 = vpop.eup %3420  ;;  %v1878_v6 = vld [vmem:[%s4446_s22 + $0xb0] sm:$0xff] }
 0x2d7   : > { %v2996_v63 = vadd.f32 %v2798_v1, %v2582_v44  ;;  %2478 = vperm.xlu0 %3328, %v4808_v45   ;;  %v1708_v1 = vmul.f32 0.020408163, %v4633_v56 }
 0x2d9   : > { %3065 = vst.msk [vmem:[%s4782_s28 + $0x120] sm:$0xff] %vm1027_vm1, %v2996_v63  ;;  %v2623_v16 = vpop.permute.xlu1 %2622  ;;  %v1777_v56 = vadd.f32 0.001, %v1708_v1  ;;  %v5566_v1 = vld [vmem:[#allocation9_spill] sm:$0xff] }
 0x2da   : > { %v2961_v55 = vadd.f32 %v2623_v16, %v2547_v3  ;;  %v2628_v5 = vpop.permute.xlu0 %2627  ;;  %2463 = vperm.xlu1 %3329, %v4754_v25   ;;  %v2083_v25 = vmul.f32 %v4823_v35, %v4288_v40  ;;  %v4845_v40 = vmul.f32 %v3417_v51, %v1912_v21  ;;  %v1913_v3 = vld [vmem:[%s4446_s22 + $0x1c8] sm:$0xff] }
 0x2db   : > { %v2962_v20 = vadd.f32 %v2628_v5, %v2548_v9  ;;  %2887 = vperm.xlu0 %3328, %v2186_v22   ;;  %v2583_v9 = vmul.f32 %v4800_v2, %v5564_v32  ;;  %v4853_v8 = vmul.f32 %v3419_v50, %v1913_v3  ;;  %v2050_v5 = vld [vmem:[%s4455_s25 + $0x1c0] sm:$0xff]  ;;  %v2116_v2 = vmul.f32 %v4761_v19, %v4276_v23  ;;  %v3423_v51 = vpop.eup %3422 }
 0x2dc   : > { %3030 = vst.msk [vmem:[%s4782_s28 + $0x8] sm:$0xff] %vm1027_vm1, %v2961_v55  ;;  %v2152_v63 = vsub.f32 %v2014_v33, %v2083_v25  ;;  %3426 = vrsqrt.f32 %v1777_v56  ;;  %v4868_v25 = vmul.f32 %v3421_v4, %v1878_v6  ;;  %v5565_v33 = vld [vmem:[#allocation10_spill] sm:$0xff]  ;;  %v1743_v19 = vadd.f32 0.001, %v1674_v18  ;;  %v5568_v56 = vld [vmem:[#allocation75_spill] sm:$0xff]  ;;  %v5569_v18 = vld [vmem:[#allocation80_spill] sm:$0xff] }
 0x2dd   : > { %3031 = vst.msk [vmem:[%s4782_s28 + $0x10] sm:$0xff] %vm1027_vm1, %v2962_v20  ;;  %v2219_v47 = vpop.permute.xlu1 %2218  ;;  %v1742_v20 = vadd.f32 0.001, %v1673_v15  ;;  %v4877_v50 = vmul.f32 %v3423_v51, %v1879_v60  ;;  %v1914_v15 = vld [vmem:[%s4446_s22 + $0x1d0] sm:$0xff]  ;;  %v2082_v32 = vmul.f32 %v4784_v42, %v5568_v56 }
 0x2de   : > { %v4836_v44 = vpop.permute.xlu0 %2398  ;;  %2872 = vperm.xlu1 %3329, %v2183_v49   ;;  %v2549_v37 = vmul.f32 %v2219_v47, %v5566_v1  ;;  %v1778_v47 = vadd.f32 0.001, %v1709_v7  ;;  %v5572_v7 = vld [vmem:[#allocation11_spill] sm:$0xff] }
 0x2df   : > { %2308 = vperm.xlu0 %3328, %v4832_v11   ;;  %3428 = vrsqrt.f32 %v1742_v20 }
 0x2e0   : > { %3430 = vrsqrt.f32 %v1743_v19  ;;  %v2585_v19 = vmul.f32 %v4836_v44, %v5572_v7 }
 0x2e1   : > { %v2394_v46 = vpop.permute.xlu1 %2393  ;;  %3432 = vrsqrt.f32 %v1778_v47  ;;  %v5573_v47 = vld [vmem:[#allocation82_spill] sm:$0xff] }
 0x2e2   : > { %v2584_v41 = vmul.f32 %v2394_v46, %v5563_v30  ;;  %v2808_v31 = vpop.permute.xlu0 %2807  ;;  %2293 = vperm.xlu1 %3329, %v4772_v14   ;;  %v2119_v14 = vmul.f32 %v4845_v40, %v4298_v54  ;;  %v2047_v54 = vld [vmem:[%s4455_s25 + $0x1a8] sm:$0xff]  ;;  %v5567_v30 = vld [vmem:[#allocation78_spill] sm:$0xff] }
 0x2e3   : > { %2717 = vperm.xlu0 %3328, %v2152_v63   ;;  %v2185_v23 = vsub.f32 %v2047_v54, %v2116_v2 }
 0x2e4   : > { %v2998_v16 = vadd.f32 %v2808_v31, %v2584_v41  ;;  %v2188_v49 = vsub.f32 %v2050_v5, %v2119_v14  ;;  %v2085_v41 = vmul.f32 %v4868_v25, %v5567_v30  ;;  %v1675_v5 = vmul.f32 0.020408163, %v4655_v59  ;;  %v1880_v59 = vld [vmem:[%s4446_s22 + $0xc0] sm:$0xff] }
 0x2e5   : > { %v2803_v22 = vpop.permute.xlu1 %2802 }
 0x2e6   : > { %3067 = vst.msk [vmem:[%s4782_s28 + $0x130] sm:$0xff] %vm1027_vm1, %v2998_v16  ;;  %v2997_v62 = vadd.f32 %v2803_v22, %v2583_v9  ;;  %v2638_v55 = vpop.permute.xlu0 %2637  ;;  %2702 = vperm.xlu1 %3329, %v2149_v10   ;;  %v1710_v10 = vmul.f32 0.020408163, %v4657_v34  ;;  %v2154_v16 = vsub.f32 %v2016_v57, %v2085_v41  ;;  %v2013_v22 = vld [vmem:[%s4455_s25 + $0x98] sm:$0xff] }
 0x2e7   : > { %2488 = vperm.xlu0 %3328, %v4853_v8   ;;  %v2151_v6 = vsub.f32 %v2013_v22, %v2082_v32  ;;  %v5574_v32 = vld [vmem:[#allocation14_spill] sm:$0xff] }
 0x2e8   : > { %3066 = vst.msk [vmem:[%s4782_s28 + $0x128] sm:$0xff] %vm1027_vm1, %v2997_v62  ;;  %v1779_v34 = vadd.f32 0.001, %v1710_v10  ;;  %v1916_v22 = vld [vmem:[%s4446_s22 + $0x1e0] sm:$0xff] }
 0x2e9   : > { %v2224_v61 = vpop.permute.xlu1 %2223 }
 0x2ea   : > { %v2550_v21 = vmul.f32 %v2224_v61, %v5565_v33  ;;  %v4871_v52 = vpop.permute.xlu0 %2408  ;;  %2473 = vperm.xlu1 %3329, %v4798_v12   ;;  %v3425_v12 = vpop.eup %3424  ;;  %v5570_v61 = vld [vmem:[#allocation12_spill] sm:$0xff]  ;;  %v1744_v33 = vadd.f32 0.001, %v1675_v5  ;;  %3434 = vrsqrt.f32 %v1779_v34  ;;  %v1712_v34 = vmul.f32 0.020408163, %v4681_v39  ;;  %v1917_v39 = vld [vmem:[%s4446_s22 + $0x1e8] sm:$0xff] }
 0x2eb   : > { %2897 = vperm.xlu0 %3328, %v2188_v49   ;;  %v4892_v14 = vmul.f32 %v3425_v12, %v1914_v15  ;;  %v3427_v4 = vpop.eup %3426 }
 0x2ec   : > { %v2964_v46 = vadd.f32 %v2638_v55, %v2550_v21  ;;  %v1915_v55 = vld [vmem:[%s4446_s22 + $0x1d8] sm:$0xff]  ;;  %v3429_v20 = vpop.eup %3428  ;;  %v5571_v21 = vld [vmem:[#allocation76_spill] sm:$0xff]  ;;  %3436 = vrsqrt.f32 %v1744_v33 }
 0x2ed   : > { %v2633_v63 = vpop.permute.xlu1 %2632  ;;  %v4897_v2 = vmul.f32 %v3427_v4, %v1915_v55  ;;  %v2121_v54 = vmul.f32 %v4892_v14, %v5569_v18  ;;  %v2118_v60 = vmul.f32 %v4808_v45, %v5571_v21  ;;  %v4913_v30 = vmul.f32 %v3429_v20, %v1880_v59  ;;  %v3431_v41 = vpop.eup %3430  ;;  %v5575_v55 = vld [vmem:[#allocation77_spill] sm:$0xff] }
 0x2ee   : > { %3033 = vst.msk [vmem:[%s4782_s28 + $0x20] sm:$0xff] %vm1027_vm1, %v2964_v46  ;;  %v2963_v31 = vadd.f32 %v2633_v63, %v2549_v37  ;;  %v2818_v3 = vpop.permute.xlu0 %2817  ;;  %2882 = vperm.xlu1 %3329, %v2185_v23   ;;  %v1676_v23 = vmul.f32 0.020408163, %v4669_v13  ;;  %v2049_v63 = vld [vmem:[%s4455_s25 + $0x1b8] sm:$0xff]  ;;  %v1881_v13 = vld [vmem:[%s4446_s22 + $0xc8] sm:$0xff]  ;;  %v3433_v56 = vpop.eup %3432  ;;  %v2084_v5 = vmul.f32 %v4832_v11, %v5575_v55 }
 0x2ef   : > { %2318 = vperm.xlu0 %3328, %v4877_v50   ;;  %v1711_v45 = vmul.f32 0.020408163, %v4667_v28  ;;  %v4924_v15 = vmul.f32 %v3431_v41, %v1881_v13  ;;  %v2087_v10 = vmul.f32 %v4913_v30, %v5573_v47  ;;  %v2018_v28 = vld [vmem:[%s4455_s25 + $0xc0] sm:$0xff]  ;;  %v1677_v11 = vmul.f32 0.020408163, %v4679_v38  ;;  %v1882_v38 = vld [vmem:[%s4446_s22 + $0xd0] sm:$0xff] }
 0x2f0   : > { %3032 = vst.msk [vmem:[%s4782_s28 + $0x18] sm:$0xff] %vm1027_vm1, %v2963_v31  ;;  %v1745_v44 = vadd.f32 0.001, %v1676_v23  ;;  %v5577_v23 = vld [vmem:[#allocation84_spill] sm:$0xff]  ;;  %v1678_v41 = vmul.f32 0.020408163, %v4693_v24 }
 0x2f1   : > { %v2229_v9 = vpop.permute.xlu1 %2228  ;;  %v1780_v4 = vadd.f32 0.001, %v1711_v45  ;;  %v1713_v24 = vmul.f32 0.020408163, %v4691_v17  ;;  %v2020_v17 = vld [vmem:[%s4455_s25 + $0xd0] sm:$0xff] }
 0x2f2   : > { %v2648_v62 = vpop.permute.xlu0 %2647  ;;  %2303 = vperm.xlu1 %3329, %v4823_v35   ;;  %v2052_v35 = vld [vmem:[%s4455_s25 + $0x1d0] sm:$0xff]  ;;  %3438 = vrsqrt.f32 %v1745_v44 }
 0x2f3   : > { %2727 = vperm.xlu0 %3328, %v2154_v16   ;;  %v2190_v46 = vsub.f32 %v2052_v35, %v2121_v54  ;;  %v2156_v54 = vsub.f32 %v2018_v28, %v2087_v10  ;;  %3440 = vrsqrt.f32 %v1780_v4 }
 0x2f4   : > { %v3435_v35 = vpop.eup %3434 }
 0x2f5   : > { %v2404_v42 = vpop.permute.xlu1 %2403 }
 0x2f6   : > { %v2586_v49 = vmul.f32 %v2404_v42, %v5570_v61  ;;  %v4902_v51 = vpop.permute.xlu0 %2418  ;;  %2712 = vperm.xlu1 %3329, %v2151_v6   ;;  %v5576_v6 = vld [vmem:[#allocation13_spill] sm:$0xff]  ;;  %v2015_v61 = vld [vmem:[%s4455_s25 + $0xa8] sm:$0xff] }
 0x2f7   : > { %2498 = vperm.xlu0 %3328, %v4897_v2   ;;  %v2551_v20 = vmul.f32 %v2229_v9, %v5576_v6  ;;  %v1781_v9 = vadd.f32 0.001, %v1712_v34 }
 0x2f8   : > { %v3000_v1 = vadd.f32 %v2818_v3, %v2586_v49  ;;  %v2187_v3 = vsub.f32 %v2049_v63, %v2118_v60  ;;  %v4939_v49 = vmul.f32 %v3433_v56, %v1916_v22  ;;  %v4950_v60 = vmul.f32 %v3435_v35, %v1917_v39  ;;  %v1883_v56 = vld [vmem:[%s4446_s22 + $0xd8] sm:$0xff] }
 0x2f9   : > { %v2813_v37 = vpop.permute.xlu1 %2812  ;;  %3442 = vrsqrt.f32 %v1781_v9  ;;  %v5583_v9 = vld [vmem:[#allocation18_spill] sm:$0xff] }
 0x2fa   : > { %3069 = vst.msk [vmem:[%s4782_s28 + $0x140] sm:$0xff] %vm1027_vm1, %v3000_v1  ;;  %v2999_v12 = vadd.f32 %v2813_v37, %v2585_v19  ;;  %v4917_v31 = vpop.permute.xlu0 %2827  ;;  %2483 = vperm.xlu1 %3329, %v4845_v40   ;;  %v2123_v7 = vmul.f32 %v4939_v49, %v5577_v23  ;;  %v3437_v19 = vpop.eup %3436  ;;  %v1746_v37 = vadd.f32 0.001, %v1677_v11 }
 0x2fb   : > { %2907 = vperm.xlu0 %3328, %v2190_v46   ;;  %v5578_v46 = vld [vmem:[#allocation79_spill] sm:$0xff]  ;;  %v4963_v44 = vmul.f32 %v3437_v19, %v1882_v38 }
 0x2fc   : > { %3068 = vst.msk [vmem:[%s4782_s28 + $0x138] sm:$0xff] %vm1027_vm1, %v2999_v12  ;;  %v2120_v63 = vmul.f32 %v4853_v8, %v5578_v46  ;;  %v2051_v12 = vld [vmem:[%s4455_s25 + $0x1c8] sm:$0xff]  ;;  %3444 = vrsqrt.f32 %v1746_v37 }
 0x2fd   : > { %v2234_v57 = vpop.permute.xlu1 %2233 }
 0x2fe   : > { %v2552_v40 = vmul.f32 %v2234_v57, %v5574_v32  ;;  %v4929_v16 = vpop.permute.xlu0 %2248  ;;  %2892 = vperm.xlu1 %3329, %v2187_v3   ;;  %v3439_v3 = vpop.eup %3438  ;;  %v5579_v57 = vld [vmem:[#allocation16_spill] sm:$0xff]  ;;  %v2189_v8 = vsub.f32 %v2051_v12, %v2120_v63  ;;  %v1747_v32 = vadd.f32 0.001, %v1678_v41 }
 0x2ff   : > { %2328 = vperm.xlu0 %3328, %v4924_v15   ;;  %v4974_v55 = vmul.f32 %v3439_v3, %v1883_v56  ;;  %v3441_v34 = vpop.eup %3440  ;;  %v2053_v56 = vld [vmem:[%s4455_s25 + $0x1d8] sm:$0xff] }
 0x300   : > { %v2966_v42 = vadd.f32 %v2648_v62, %v2552_v40  ;;  %v2153_v62 = vsub.f32 %v2015_v61, %v2084_v5  ;;  %v5580_v40 = vld [vmem:[#allocation15_spill] sm:$0xff]  ;;  %3446 = vrsqrt.f32 %v1747_v32  ;;  %v2017_v61 = vld [vmem:[%s4455_s25 + $0xb8] sm:$0xff] }
 0x301   : > { %v2643_v18 = vpop.permute.xlu1 %2642  ;;  %v2587_v28 = vmul.f32 %v4871_v52, %v5580_v40  ;;  %v1918_v52 = vld [vmem:[%s4446_s22 + $0x1f0] sm:$0xff] }
 0x302   : > { %3035 = vst.msk [vmem:[%s4782_s28 + $0x30] sm:$0xff] %vm1027_vm1, %v2966_v42  ;;  %v2965_v59 = vadd.f32 %v2643_v18, %v2551_v20  ;;  %v4943_v33 = vpop.permute.xlu0 %2657  ;;  %2313 = vperm.xlu1 %3329, %v4868_v25   ;;  %v2054_v25 = vld [vmem:[%s4455_s25 + $0x1e0] sm:$0xff]  ;;  %v1782_v18 = vadd.f32 0.001, %v1713_v24  ;;  %v4991_v39 = vmul.f32 %v3441_v34, %v1918_v52  ;;  %v5588_v34 = vld [vmem:[#allocation19_spill] sm:$0xff] }
 0x303   : > { %2737 = vperm.xlu0 %3328, %v2156_v54   ;;  %v2192_v45 = vsub.f32 %v2054_v25, %v2123_v7  ;;  %v1714_v54 = vmul.f32 0.020408163, %v4705_v58  ;;  %v3443_v11 = vpop.eup %3442  ;;  %v1679_v7 = vmul.f32 0.020408163, %v4703_v29  ;;  %v5584_v25 = vld [vmem:[#allocation17_spill] sm:$0xff] }
 0x304   : > { %3034 = vst.msk [vmem:[%s4782_s28 + $0x28] sm:$0xff] %vm1027_vm1, %v2965_v59  ;;  %3448 = vrsqrt.f32 %v1782_v18 }
 0x305   : > { %v2239_v21 = vpop.permute.xlu1 %2238  ;;  %v1783_v19 = vadd.f32 0.001, %v1714_v54  ;;  %v1748_v3 = vadd.f32 0.001, %v1679_v7 }
 0x306   : > { %v4954_v1 = vpop.permute.xlu0 %2428  ;;  %2722 = vperm.xlu1 %3329, %v2153_v62   ;;  %v2553_v38 = vmul.f32 %v2239_v21, %v5584_v25  ;;  %v3445_v46 = vpop.eup %3444  ;;  %v1884_v21 = vld [vmem:[%s4446_s22 + $0xe0] sm:$0xff] }
 0x307   : > { %2508 = vperm.xlu0 %3328, %v4950_v60   ;;  %3450 = vrsqrt.f32 %v1783_v19  ;;  %v5018_v32 = vmul.f32 %v3445_v46, %v1884_v21  ;;  %v5591_v19 = vld [vmem:[#allocation22_spill] sm:$0xff] }
 0x308   : > { %3452 = vrsqrt.f32 %v1748_v3 }
 0x309   : > { %v2414_v13 = vpop.permute.xlu1 %2413 }
 0x30a   : > { %v2588_v47 = vmul.f32 %v2414_v13, %v5579_v57  ;;  %v4966_v10 = vpop.permute.xlu0 %2837  ;;  %2493 = vperm.xlu1 %3329, %v4892_v14   ;;  %v5581_v14 = vld [vmem:[#allocation86_spill] sm:$0xff]  ;;  %v3447_v40 = vpop.eup %3446 }
 0x30b   : > { %2917 = vperm.xlu0 %3328, %v2192_v45   ;;  %v2089_v5 = vmul.f32 %v4963_v44, %v5581_v14  ;;  %v2056_v45 = vld [vmem:[%s4455_s25 + $0x1f0] sm:$0xff]  ;;  %v1885_v14 = vld [vmem:[%s4446_s22 + $0xe8] sm:$0xff] }
 0x30c   : > { %v3002_v22 = vadd.f32 %v4917_v31, %v2588_v47  ;;  %v5582_v31 = vld [vmem:[#allocation81_spill] sm:$0xff]  ;;  %v1680_v47 = vmul.f32 0.020408163, %v4717_v36 }
 0x30d   : > { %v2823_v4 = vpop.permute.xlu1 %2822  ;;  %v2086_v42 = vmul.f32 %v4877_v50, %v5582_v31  ;;  %v2158_v59 = vsub.f32 %v2020_v17, %v2089_v5  ;;  %v1919_v50 = vld [vmem:[%s4446_s22 + $0x1f8] sm:$0xff]  ;;  %v5029_v31 = vmul.f32 %v3447_v40, %v1885_v14  ;;  %v2055_v40 = vld [vmem:[%s4455_s25 + $0x1e8] sm:$0xff] }
 0x30e   : > { %3071 = vst.msk [vmem:[%s4782_s28 + $0x150] sm:$0xff] %vm1027_vm1, %v3002_v22  ;;  %v3001_v6 = vadd.f32 %v2823_v4, %v2587_v28  ;;  %v4980_v20 = vpop.permute.xlu0 %2258  ;;  %2902 = vperm.xlu1 %3329, %v2189_v8   ;;  %v5001_v41 = vmul.f32 %v3443_v11, %v1919_v50  ;;  %v5587_v28 = vld [vmem:[#allocation20_spill] sm:$0xff]  ;;  %v1749_v5 = vadd.f32 0.001, %v1680_v47  ;;  %v3449_v18 = vpop.eup %3448  ;;  %v1716_v11 = vmul.f32 0.020408163, %v4736_v27 }
 0x30f   : > { %2338 = vperm.xlu0 %3328, %v4974_v55   ;;  %v2155_v58 = vsub.f32 %v2017_v61, %v2086_v42  ;;  %v1886_v47 = vld [vmem:[%s4446_s22 + $0xf0] sm:$0xff] }
 0x310   : > { %3070 = vst.msk [vmem:[%s4782_s28 + $0x148] sm:$0xff] %vm1027_vm1, %v3001_v6  ;;  %v2589_v6 = vmul.f32 %v4902_v51, %v5588_v34  ;;  %v1920_v51 = vld [vmem:[%s4446_s22 + $0x200] sm:$0xff]  ;;  %3454 = vrsqrt.f32 %v1749_v5  ;;  %v1785_v46 = vadd.f32 0.001, %v1716_v11  ;;  %v1887_v34 = vld [vmem:[%s4446_s22 + $0xf8] sm:$0xff] }
 0x311   : > { %v2244_v35 = vpop.permute.xlu1 %2243  ;;  %v5046_v7 = vmul.f32 %v3449_v18, %v1920_v51 }
 0x312   : > { %v2554_v62 = vmul.f32 %v2244_v35, %v5583_v9  ;;  %v4994_v23 = vpop.permute.xlu0 %2667  ;;  %2323 = vperm.xlu1 %3329, %v4913_v30   ;;  %v5585_v30 = vld [vmem:[#allocation88_spill] sm:$0xff]  ;;  %v2019_v9 = vld [vmem:[%s4455_s25 + $0xc8] sm:$0xff] }
 0x313   : > { %2747 = vperm.xlu0 %3328, %v2158_v59   ;;  %v2125_v12 = vmul.f32 %v4991_v39, %v5585_v30 }
 0x314   : > { %v2968_v37 = vadd.f32 %v4943_v33, %v2554_v62  ;;  %v5586_v33 = vld [vmem:[#allocation83_spill] sm:$0xff] }
 0x315   : > { %v2653_v63 = vpop.permute.xlu1 %2652  ;;  %v2122_v57 = vmul.f32 %v4897_v2, %v5586_v33  ;;  %v2194_v24 = vsub.f32 %v2056_v45, %v2125_v12  ;;  %v1715_v2 = vmul.f32 0.020408163, %v4715_v53  ;;  %v2022_v53 = vld [vmem:[%s4455_s25 + $0xe0] sm:$0xff] }
 0x316   : > { %3037 = vst.msk [vmem:[%s4782_s28 + $0x40] sm:$0xff] %vm1027_vm1, %v2968_v37  ;;  %v2967_v29 = vadd.f32 %v2653_v63, %v2553_v38  ;;  %v5007_v13 = vpop.permute.xlu0 %2438  ;;  %2732 = vperm.xlu1 %3329, %v2155_v58   ;;  %v3451_v58 = vpop.eup %3450  ;;  %v1681_v37 = vmul.f32 0.020408163, %v4729_v26  ;;  %v5592_v63 = vld [vmem:[#allocation21_spill] sm:$0xff] }
 0x317   : > { %2518 = vperm.xlu0 %3328, %v5001_v41   ;;  %v2191_v36 = vsub.f32 %v2053_v56, %v2122_v57  ;;  %v1784_v59 = vadd.f32 0.001, %v1715_v2  ;;  %v2555_v30 = vmul.f32 %v4929_v16, %v5592_v63  ;;  %v2058_v57 = vld [vmem:[%s4455_s25 + $0x200] sm:$0xff]  ;;  %v5594_v56 = vld [vmem:[#allocation87_spill] sm:$0xff]  ;;  %v5595_v2 = vld [vmem:[#allocation24_spill] sm:$0xff] }
 0x318   : > { %3036 = vst.msk [vmem:[%s4782_s28 + $0x38] sm:$0xff] %vm1027_vm1, %v2967_v29  ;;  %v3453_v29 = vpop.eup %3452  ;;  %v1750_v16 = vadd.f32 0.001, %v1681_v37 }
 0x319   : > { %v2424_v8 = vpop.permute.xlu1 %2423  ;;  %3456 = vrsqrt.f32 %v1784_v59  ;;  %v5075_v14 = vmul.f32 %v3453_v29, %v1886_v47  ;;  %v5598_v59 = vld [vmem:[#allocation89_spill] sm:$0xff] }
 0x31a   : > { %v2590_v22 = vmul.f32 %v2424_v8, %v5587_v28  ;;  %v5021_v4 = vpop.permute.xlu0 %2847  ;;  %2503 = vperm.xlu1 %3329, %v4939_v49   ;;  %v5589_v49 = vld [vmem:[#allocation90_spill] sm:$0xff]  ;;  %v2124_v8 = vmul.f32 %v4950_v60, %v5594_v56  ;;  %3458 = vrsqrt.f32 %v1785_v46  ;;  %v2090_v11 = vmul.f32 %v4974_v55, %v5598_v59  ;;  %v5600_v46 = vld [vmem:[#allocation25_spill] sm:$0xff] }
 0x31b   : > { %2927 = vperm.xlu0 %3328, %v2194_v24   ;;  %v2091_v42 = vmul.f32 %v5018_v32, %v5589_v49  ;;  %v1683_v24 = vmul.f32 0.020408163, %v4759_v43  ;;  %3460 = vrsqrt.f32 %v1750_v16  ;;  %v2557_v55 = vmul.f32 %v4980_v20, %v5600_v46  ;;  %v2060_v20 = vld [vmem:[%s4455_s25 + $0x210] sm:$0xff] }
 0x31c   : > { %v3004_v17 = vadd.f32 %v4966_v10, %v2590_v22  ;;  %v5590_v10 = vld [vmem:[#allocation85_spill] sm:$0xff]  ;;  %v2193_v43 = vsub.f32 %v2055_v40, %v2124_v8 }
 0x31d   : > { %v2833_v52 = vpop.permute.xlu1 %2832  ;;  %v2088_v35 = vmul.f32 %v4924_v15, %v5590_v10  ;;  %v2160_v50 = vsub.f32 %v2022_v53, %v2091_v42  ;;  %v1921_v15 = vld [vmem:[%s4446_s22 + $0x208] sm:$0xff]  ;;  %v2057_v8 = vld [vmem:[%s4455_s25 + $0x1f8] sm:$0xff] }
 0x31e   : > { %3073 = vst.msk [vmem:[%s4782_s28 + $0x160] sm:$0xff] %vm1027_vm1, %v3004_v17  ;;  %v3003_v54 = vadd.f32 %v2833_v52, %v2589_v6  ;;  %v5035_v61 = vpop.permute.xlu0 %2268  ;;  %2912 = vperm.xlu1 %3329, %v2191_v36   ;;  %v5057_v21 = vmul.f32 %v3451_v58, %v1921_v15  ;;  %v3455_v36 = vpop.eup %3454  ;;  %v1717_v6 = vmul.f32 0.020408163, %v4745_v48  ;;  %v1752_v17 = vadd.f32 0.001, %v1683_v24  ;;  %v5596_v52 = vld [vmem:[#allocation23_spill] sm:$0xff] }
 0x31f   : > { %2348 = vperm.xlu0 %3328, %v5029_v31   ;;  %v2157_v27 = vsub.f32 %v2019_v9, %v2088_v35  ;;  %v2591_v49 = vmul.f32 %v4954_v1, %v5596_v52  ;;  %v2024_v48 = vld [vmem:[%s4455_s25 + $0xf0] sm:$0xff]  ;;  %v5605_v52 = vld [vmem:[#allocation98_spill] sm:$0xff] }
 0x320   : > { %3072 = vst.msk [vmem:[%s4782_s28 + $0x158] sm:$0xff] %vm1027_vm1, %v3003_v54  ;;  %v5086_v54 = vmul.f32 %v3455_v36, %v1887_v34  ;;  %v1922_v1 = vld [vmem:[%s4446_s22 + $0x210] sm:$0xff]  ;;  %v5604_v34 = vld [vmem:[#allocation27_spill] sm:$0xff] }
 0x321   : > { %v2254_v62 = vpop.permute.xlu1 %2253 }
 0x322   : > { %v2556_v25 = vmul.f32 %v2254_v62, %v5591_v19  ;;  %v5049_v38 = vpop.permute.xlu0 %2677  ;;  %2333 = vperm.xlu1 %3329, %v4963_v44   ;;  %v5593_v44 = vld [vmem:[#allocation92_spill] sm:$0xff] }
 0x323   : > { %2757 = vperm.xlu0 %3328, %v2160_v50   ;;  %v2127_v3 = vmul.f32 %v5046_v7, %v5593_v44  ;;  %v3457_v51 = vpop.eup %3456  ;;  %v2021_v50 = vld [vmem:[%s4455_s25 + $0xd8] sm:$0xff]  ;;  %v5601_v44 = vld [vmem:[#allocation96_spill] sm:$0xff] }
 0x324   : > { %v2970_v12 = vadd.f32 %v4994_v23, %v2556_v25  ;;  %v1682_v23 = vmul.f32 0.020408163, %v4751_v0  ;;  %v5102_v58 = vmul.f32 %v3457_v51, %v1922_v1  ;;  %v3459_v19 = vpop.eup %3458  ;;  %v5599_v25 = vld [vmem:[#allocation26_spill] sm:$0xff]  ;;  %v2023_v1 = vld [vmem:[%s4455_s25 + $0xe8] sm:$0xff] }
 0x325   : > { %v2663_v45 = vpop.permute.xlu1 %2662  ;;  %v2196_v22 = vsub.f32 %v2058_v57, %v2127_v3  ;;  %v1888_v57 = vld [vmem:[%s4446_s22 + $0x100] sm:$0xff] }
 0x326   : > { %3039 = vst.msk [vmem:[%s4782_s28 + $0x50] sm:$0xff] %vm1027_vm1, %v2970_v12  ;;  %v2969_v26 = vadd.f32 %v2663_v45, %v2555_v30  ;;  %v5063_v33 = vpop.permute.xlu0 %2448  ;;  %2742 = vperm.xlu1 %3329, %v2157_v27   ;;  %v1751_v60 = vadd.f32 0.001, %v1682_v23  ;;  %v1923_v27 = vld [vmem:[%s4446_s22 + $0x218] sm:$0xff]  ;;  %v2159_v30 = vsub.f32 %v2021_v50, %v2090_v11  ;;  %v3461_v12 = vpop.eup %3460  ;;  %v2129_v3 = vmul.f32 %v5102_v58, %v5601_v44  ;;  %v5611_v44 = vld [vmem:[#allocation95_spill] sm:$0xff] }
 0x327   : > { %2528 = vperm.xlu0 %3328, %v5057_v21   ;;  %v5110_v45 = vmul.f32 %v3459_v19, %v1923_v27  ;;  %v5126_v24 = vmul.f32 %v3461_v12, %v1888_v57  ;;  %v2028_v19 = vld [vmem:[%s4455_s25 + $0x110] sm:$0xff] }
 0x328   : > { %3038 = vst.msk [vmem:[%s4782_s28 + $0x48] sm:$0xff] %vm1027_vm1, %v2969_v26  ;;  %3462 = vrsqrt.f32 %v1751_v60  ;;  %v2198_v56 = vsub.f32 %v2060_v20, %v2129_v3  ;;  %v5612_v20 = vld [vmem:[#allocation32_spill] sm:$0xff] }
 0x329   : > { %v2434_v28 = vpop.permute.xlu1 %2433  ;;  %3464 = vrsqrt.f32 %v1752_v17 }
 0x32a   : > { %v2592_v5 = vmul.f32 %v2434_v28, %v5595_v2  ;;  %v5078_v0 = vpop.permute.xlu0 %2857  ;;  %2513 = vperm.xlu1 %3329, %v4991_v39   ;;  %v5597_v39 = vld [vmem:[#allocation94_spill] sm:$0xff]  ;;  %v5603_v28 = vld [vmem:[#allocation28_spill] sm:$0xff]  ;;  %v1889_v2 = vld [vmem:[%s4446_s22 + $0x108] sm:$0xff] }
 0x32b   : > { %2937 = vperm.xlu0 %3328, %v2196_v22   ;;  %v2093_v53 = vmul.f32 %v5075_v14, %v5597_v39 }
 0x32c   : > { %v3006_v42 = vadd.f32 %v5021_v4, %v2592_v5  ;;  %v1786_v4 = vadd.f32 0.001, %v1717_v6  ;;  %v1890_v5 = vld [vmem:[%s4446_s22 + $0x110] sm:$0xff] }
 0x32d   : > { %v2843_v18 = vpop.permute.xlu1 %2842  ;;  %v2162_v62 = vsub.f32 %v2024_v48, %v2093_v53  ;;  %v5606_v53 = vld [vmem:[#allocation93_spill] sm:$0xff] }
 0x32e   : > { %3075 = vst.msk [vmem:[%s4782_s28 + $0x170] sm:$0xff] %vm1027_vm1, %v3006_v42  ;;  %v3005_v10 = vadd.f32 %v2843_v18, %v2591_v49  ;;  %v5092_v35 = vpop.permute.xlu0 %2278  ;;  %2922 = vperm.xlu1 %3329, %v2193_v43   ;;  %3466 = vrsqrt.f32 %v1786_v4  ;;  %v2095_v49 = vmul.f32 %v5126_v24, %v5605_v52  ;;  %v2092_v51 = vmul.f32 %v5029_v31, %v5606_v53  ;;  %v5607_v4 = vld [vmem:[#allocation102_spill] sm:$0xff]  ;;  %v5619_v53 = vld [vmem:[#allocation101_spill] sm:$0xff] }
 0x32f   : > { %2358 = vperm.xlu0 %3328, %v5086_v54  }
 0x330   : > { %3074 = vst.msk [vmem:[%s4782_s28 + $0x168] sm:$0xff] %vm1027_vm1, %v3005_v10  ;;  %v2161_v27 = vsub.f32 %v2023_v1, %v2092_v51 }
 0x331   : > { %v2264_v9 = vpop.permute.xlu1 %2263 }
 0x332   : > { %v2558_v15 = vmul.f32 %v2264_v9, %v5599_v25  ;;  %v2688_v37 = vpop.permute.xlu0 %2687  ;;  %2343 = vperm.xlu1 %3329, %v5018_v32   ;;  %v3463_v16 = vpop.eup %3462  ;;  %v5608_v9 = vld [vmem:[#allocation30_spill] sm:$0xff]  ;;  %v5609_v25 = vld [vmem:[#allocation29_spill] sm:$0xff] }
 0x333   : > { %2767 = vperm.xlu0 %3328, %v2162_v62   ;;  %v3465_v40 = vpop.eup %3464  ;;  %v5135_v17 = vmul.f32 %v3463_v16, %v1889_v2  ;;  %v2559_v31 = vmul.f32 %v5035_v61, %v5609_v25  ;;  %v2128_v61 = vmul.f32 %v5057_v21, %v5611_v44  ;;  %v2025_v2 = vld [vmem:[%s4455_s25 + $0xf8] sm:$0xff] }
 0x334   : > { %v2972_v63 = vadd.f32 %v5049_v38, %v2558_v15  ;;  %v5602_v38 = vld [vmem:[#allocation91_spill] sm:$0xff]  ;;  %v5622_v25 = vld [vmem:[#allocation37_spill] sm:$0xff] }
 0x335   : > { %v2673_v29 = vpop.permute.xlu1 %2672  ;;  %v2126_v47 = vmul.f32 %v5001_v41, %v5602_v38  ;;  %v2593_v41 = vmul.f32 %v5007_v13, %v5604_v34  ;;  %v2026_v13 = vld [vmem:[%s4455_s25 + $0x100] sm:$0xff]  ;;  %v2096_v51 = vmul.f32 %v5135_v17, %v5619_v53 }
 0x336   : > { %3041 = vst.msk [vmem:[%s4782_s28 + $0x60] sm:$0xff] %vm1027_vm1, %v2972_v63  ;;  %v2971_v32 = vadd.f32 %v2673_v29, %v2557_v55  ;;  %v5116_v26 = vpop.permute.xlu0 %2458  ;;  %2752 = vperm.xlu1 %3329, %v2159_v30   ;;  %v2164_v48 = vsub.f32 %v2026_v13, %v2095_v49  ;;  %v5610_v63 = vld [vmem:[#allocation100_spill] sm:$0xff] }
 0x337   : > { %2538 = vperm.xlu0 %3328, %v5110_v45   ;;  %v2195_v43 = vsub.f32 %v2057_v8, %v2126_v47  ;;  %v5613_v47 = vld [vmem:[#allocation31_spill] sm:$0xff] }
 0x338   : > { %3040 = vst.msk [vmem:[%s4782_s28 + $0x58] sm:$0xff] %vm1027_vm1, %v2971_v32  ;;  %v3467_v42 = vpop.eup %3466  ;;  %v2059_v32 = vld [vmem:[%s4455_s25 + $0x208] sm:$0xff]  ;;  %v2595_v16 = vmul.f32 %v5063_v33, %v5613_v47  ;;  %v5626_v47 = vld [vmem:[#allocation41_spill] sm:$0xff] }
 0x339   : > { %v2444_v23 = vpop.permute.xlu1 %2443 }
 0x33a   : > { %v2594_v22 = vmul.f32 %v2444_v23, %v5603_v28  ;;  %v2868_v36 = vpop.permute.xlu0 %2867  ;;  %2523 = vperm.xlu1 %3329, %v5046_v7   ;;  %v5139_v7 = vmul.f32 %v3465_v40, %v1890_v5  ;;  %v5614_v28 = vld [vmem:[#allocation97_spill] sm:$0xff]  ;;  %v5615_v5 = vld [vmem:[#allocation34_spill] sm:$0xff] }
 0x33b   : > { %2947 = vperm.xlu0 %3328, %v2198_v56   ;;  %v2197_v56 = vsub.f32 %v2059_v32, %v2128_v61 }
 0x33c   : > { %v3008_v60 = vadd.f32 %v5078_v0, %v2594_v22  ;;  %v1924_v0 = vld [vmem:[%s4446_s22 + $0x220] sm:$0xff]  ;;  %v2097_v59 = vmul.f32 %v5139_v7, %v5607_v4  ;;  %v2094_v22 = vmul.f32 %v5086_v54, %v5614_v28  ;;  %v5627_v28 = vld [vmem:[#allocation44_spill] sm:$0xff] }
 0x33d   : > { %v2853_v6 = vpop.permute.xlu1 %2852  ;;  %v1993_v11 = vmul.f32 %v3467_v42, %v1924_v0  ;;  %v5617_v42 = vld [vmem:[#allocation36_spill] sm:$0xff] }
 0x33e   : > { %3077 = vst.msk [vmem:[%s4782_s28 + $0x180] sm:$0xff] %vm1027_vm1, %v3008_v60  ;;  %v3007_v18 = vadd.f32 %v2853_v6, %v2593_v41  ;;  %v5143_v39 = vpop.permute.xlu0 %2288  ;;  %2932 = vperm.xlu1 %3329, %v2195_v43   ;;  %v2166_v55 = vsub.f32 %v2028_v19, %v2097_v59  ;;  %v2163_v43 = vsub.f32 %v2025_v2, %v2094_v22  ;;  %v5628_v2 = vld [vmem:[#allocation43_spill] sm:$0xff] }
 0x33f   : > { %2368 = vperm.xlu0 %3328, %v5135_v17   ;;  %v2131_v30 = vmul.f32 %v1993_v11, %v5610_v63  ;;  %v5623_v63 = vld [vmem:[#allocation40_spill] sm:$0xff] }
 0x340   : > { %3076 = vst.msk [vmem:[%s4782_s28 + $0x178] sm:$0xff] %vm1027_vm1, %v3007_v18 }
 0x341   : > { %v2274_v10 = vpop.permute.xlu1 %2273 }
 0x342   : > { %v2560_v62 = vmul.f32 %v2274_v10, %v5608_v9  ;;  %v2698_v50 = vpop.permute.xlu0 %2697  ;;  %2353 = vperm.xlu1 %3329, %v5075_v14   ;;  %v2062_v14 = vld [vmem:[%s4455_s25 + $0x220] sm:$0xff] }
 0x343   : > { %2777 = vperm.xlu0 %3328, %v2164_v48   ;;  %v2200_v3 = vsub.f32 %v2062_v14, %v2131_v30  ;;  %v2027_v48 = vld [vmem:[%s4455_s25 + $0x108] sm:$0xff] }
 0x344   : > { %v2974_v15 = vadd.f32 %v2688_v37, %v2560_v62  ;;  %v2165_v59 = vsub.f32 %v2027_v48, %v2096_v51  ;;  %v2061_v62 = vld [vmem:[%s4455_s25 + $0x218] sm:$0xff]  ;;  %v5624_v14 = vld [vmem:[#allocation39_spill] sm:$0xff] }
 0x345   : > { %v2683_v46 = vpop.permute.xlu1 %2682  ;;  %v5632_v51 = vld [vmem:[#allocation47_spill] sm:$0xff] }
 0x346   : > { %3043 = vst.msk [vmem:[%s4782_s28 + $0x70] sm:$0xff] %vm1027_vm1, %v2974_v15  ;;  %v2973_v12 = vadd.f32 %v2683_v46, %v2559_v31  ;;  %v5163_v29 = vpop.permute.xlu0 %2468  ;;  %2762 = vperm.xlu1 %3329, %v2161_v27   ;;  %v2563_v31 = vmul.f32 %v5143_v39, %v5622_v25 }
 0x347   : > { %2787 = vperm.xlu0 %3328, %v2166_v55   ;;  %v2599_v44 = vmul.f32 %v5163_v29, %v5624_v14 }
 0x348   : > { %3042 = vst.msk [vmem:[%s4782_s28 + $0x68] sm:$0xff] %vm1027_vm1, %v2973_v12 }
 0x349   : > { %v2454_v37 = vpop.permute.xlu1 %2453 }
 0x34a   : > { %v2596_v57 = vmul.f32 %v2454_v37, %v5612_v20  ;;  %v2878_v38 = vpop.permute.xlu0 %2877  ;;  %2533 = vperm.xlu1 %3329, %v5102_v58   ;;  %v5625_v20 = vld [vmem:[#allocation42_spill] sm:$0xff] }
 0x34b   : > { %2957 = vperm.xlu0 %3328, %v2200_v3  }
 0x34c   : > { %v3010_v23 = vadd.f32 %v2868_v36, %v2596_v57  ;;  %v5616_v36 = vld [vmem:[#allocation33_spill] sm:$0xff] }
 0x34d   : > { %v2863_v8 = vpop.permute.xlu1 %2862  ;;  %v2561_v41 = vmul.f32 %v5092_v35, %v5616_v36  ;;  %v5618_v35 = vld [vmem:[#allocation35_spill] sm:$0xff] }
 0x34e   : > { %3079 = vst.msk [vmem:[%s4782_s28 + $0x190] sm:$0xff] %vm1027_vm1, %v3010_v23  ;;  %v3009_v21 = vadd.f32 %v2863_v8, %v2595_v16  ;;  %v2299_v40 = vpop.permute.xlu0 %2298  ;;  %2942 = vperm.xlu1 %3329, %v2197_v56   ;;  %v2597_v13 = vmul.f32 %v5116_v26, %v5618_v35 }
 0x34f   : > { %v2565_v16 = vmul.f32 %v2299_v40, %v5626_v47 }
 0x350   : > { %3078 = vst.msk [vmem:[%s4782_s28 + $0x188] sm:$0xff] %vm1027_vm1, %v3009_v21 }
 0x351   : > { %v2284_v58 = vpop.permute.xlu1 %2283 }
 0x352   : > { %v2562_v34 = vmul.f32 %v2284_v58, %v5615_v5  ;;  %v2708_v33 = vpop.permute.xlu0 %2707  ;;  %2363 = vperm.xlu1 %3329, %v5126_v24  }
 0x354   : > { %v2976_v60 = vadd.f32 %v2698_v50, %v2562_v34  ;;  %v5621_v50 = vld [vmem:[#allocation38_spill] sm:$0xff] }
 0x355   : > { %v2693_v6 = vpop.permute.xlu1 %2692 }
 0x356   : > { %3045 = vst.msk [vmem:[%s4782_s28 + $0x80] sm:$0xff] %vm1027_vm1, %v2976_v60  ;;  %v2975_v52 = vadd.f32 %v2693_v6, %v2561_v41  ;;  %v2479_v49 = vpop.permute.xlu0 %2478  ;;  %2772 = vperm.xlu1 %3329, %v2163_v43   ;;  %v5629_v60 = vld [vmem:[#allocation46_spill] sm:$0xff] }
 0x357   : > { %v2601_v5 = vmul.f32 %v2479_v49, %v5628_v2 }
 0x358   : > { %3044 = vst.msk [vmem:[%s4782_s28 + $0x78] sm:$0xff] %vm1027_vm1, %v2975_v52  ;;  %v5630_v52 = vld [vmem:[#allocation45_spill] sm:$0xff] }
 0x359   : > { %v2464_v54 = vpop.permute.xlu1 %2463 }
 0x35a   : > { %v2598_v18 = vmul.f32 %v2464_v54, %v5617_v42  ;;  %v2888_v24 = vpop.permute.xlu0 %2887  ;;  %2543 = vperm.xlu1 %3329, %v1993_v11   ;;  %v5620_v11 = vld [vmem:[#allocation99_spill] sm:$0xff] }
 0x35b   : > { %v2130_v26 = vmul.f32 %v5110_v45, %v5620_v11 }
 0x35c   : > { %v3012_v0 = vadd.f32 %v2878_v38, %v2598_v18 }
 0x35d   : > { %v2873_v10 = vpop.permute.xlu1 %2872  ;;  %v2199_v27 = vsub.f32 %v2061_v62, %v2130_v26  ;;  %v5633_v26 = vld [vmem:[#allocation50_spill] sm:$0xff] }
 0x35e   : > { %3081 = vst.msk [vmem:[%s4782_s28 + $0x1a0] sm:$0xff] %vm1027_vm1, %v3012_v0  ;;  %v3011_v1 = vadd.f32 %v2873_v10, %v2597_v13  ;;  %v2309_v4 = vpop.permute.xlu0 %2308  ;;  %2373 = vperm.xlu1 %3329, %v5139_v7   ;;  %v5631_v13 = vld [vmem:[#allocation48_spill] sm:$0xff] }
 0x35f   : > { %v2567_v54 = vmul.f32 %v2309_v4, %v5630_v52 }
 0x360   : > { %3080 = vst.msk [vmem:[%s4782_s28 + $0x198] sm:$0xff] %vm1027_vm1, %v3011_v1 }
 0x361   : > { %v2294_v9 = vpop.permute.xlu1 %2293 }
 0x362   : > { %v2564_v17 = vmul.f32 %v2294_v9, %v5621_v50  ;;  %v2718_v19 = vpop.permute.xlu0 %2717  ;;  %2782 = vperm.xlu1 %3329, %v2165_v59   ;;  %v5634_v50 = vld [vmem:[#allocation49_spill] sm:$0xff] }
 0x364   : > { %v2978_v15 = vadd.f32 %v2708_v33, %v2564_v17 }
 0x365   : > { %v2703_v7 = vpop.permute.xlu1 %2702 }
 0x366   : > { %3047 = vst.msk [vmem:[%s4782_s28 + $0x90] sm:$0xff] %vm1027_vm1, %v2978_v15  ;;  %v2977_v46 = vadd.f32 %v2703_v7, %v2563_v31  ;;  %v2489_v55 = vpop.permute.xlu0 %2488  ;;  %2952 = vperm.xlu1 %3329, %v2199_v27   ;;  %v5635_v7 = vld [vmem:[#allocation52_spill] sm:$0xff] }
 0x367   : > { %v2603_v10 = vmul.f32 %v2489_v55, %v5632_v51 }
 0x368   : > { %3046 = vst.msk [vmem:[%s4782_s28 + $0x88] sm:$0xff] %vm1027_vm1, %v2977_v46 }
 0x369   : > { %v2474_v45 = vpop.permute.xlu1 %2473 }
 0x36a   : > { %v2600_v30 = vmul.f32 %v2474_v45, %v5623_v63  ;;  %v2898_v12 = vpop.permute.xlu0 %2897  ;;  %v5636_v45 = vld [vmem:[#allocation51_spill] sm:$0xff] }
 0x36c   : > { %v3014_v39 = vadd.f32 %v2888_v24, %v2600_v30 }
 0x36d   : > { %v2883_v61 = vpop.permute.xlu1 %2882 }
 0x36e   : > { %3083 = vst.msk [vmem:[%s4782_s28 + $0x1b0] sm:$0xff] %vm1027_vm1, %v3014_v39  ;;  %v3013_v37 = vadd.f32 %v2883_v61, %v2599_v44  ;;  %v2319_v3 = vpop.permute.xlu0 %2318  ;;  %v5637_v61 = vld [vmem:[#allocation54_spill] sm:$0xff] }
 0x36f   : > { %v2569_v17 = vmul.f32 %v2319_v3, %v5634_v50 }
 0x370   : > { %3082 = vst.msk [vmem:[%s4782_s28 + $0x1a8] sm:$0xff] %vm1027_vm1, %v3013_v37 }
 0x371   : > { %v2304_v32 = vpop.permute.xlu1 %2303 }
 0x372   : > { %v2566_v57 = vmul.f32 %v2304_v32, %v5625_v20  ;;  %v2728_v38 = vpop.permute.xlu0 %2727  ;;  %v5638_v32 = vld [vmem:[#allocation53_spill] sm:$0xff] }
 0x374   : > { %v2980_v23 = vadd.f32 %v2718_v19, %v2566_v57 }
 0x375   : > { %v2713_v56 = vpop.permute.xlu1 %2712 }
 0x376   : > { %3049 = vst.msk [vmem:[%s4782_s28 + $0xa0] sm:$0xff] %vm1027_vm1, %v2980_v23  ;;  %v2979_v29 = vadd.f32 %v2713_v56, %v2565_v16  ;;  %v2499_v8 = vpop.permute.xlu0 %2498  ;;  %v5639_v56 = vld [vmem:[#allocation56_spill] sm:$0xff] }
 0x377   : > { %v2605_v63 = vmul.f32 %v2499_v8, %v5636_v45  ;;  %v5649_v45 = vld [vmem:[#allocation66_spill] sm:$0xff] }
 0x378   : > { %3048 = vst.msk [vmem:[%s4782_s28 + $0x98] sm:$0xff] %vm1027_vm1, %v2979_v29 }
 0x379   : > { %v2484_v21 = vpop.permute.xlu1 %2483 }
 0x37a   : > { %v2602_v22 = vmul.f32 %v2484_v21, %v5627_v28  ;;  %v2908_v58 = vpop.permute.xlu0 %2907  ;;  %v5640_v21 = vld [vmem:[#allocation55_spill] sm:$0xff] }
 0x37c   : > { %v3016_v34 = vadd.f32 %v2898_v12, %v2602_v22 }
 0x37d   : > { %v2893_v33 = vpop.permute.xlu1 %2892 }
 0x37e   : > { %3085 = vst.msk [vmem:[%s4782_s28 + $0x1c0] sm:$0xff] %vm1027_vm1, %v3016_v34  ;;  %v3015_v40 = vadd.f32 %v2893_v33, %v2601_v5  ;;  %v2329_v36 = vpop.permute.xlu0 %2328  ;;  %v5641_v33 = vld [vmem:[#allocation58_spill] sm:$0xff] }
 0x37f   : > { %v2571_v20 = vmul.f32 %v2329_v36, %v5638_v32  ;;  %v5642_v36 = vld [vmem:[#allocation57_spill] sm:$0xff] }
 0x380   : > { %3084 = vst.msk [vmem:[%s4782_s28 + $0x1b8] sm:$0xff] %vm1027_vm1, %v3015_v40 }
 0x381   : > { %v2314_v41 = vpop.permute.xlu1 %2313 }
 0x382   : > { %v2568_v43 = vmul.f32 %v2314_v41, %v5629_v60  ;;  %v2738_v6 = vpop.permute.xlu0 %2737 }
 0x384   : > { %v2982_v42 = vadd.f32 %v2728_v38, %v2568_v43 }
 0x385   : > { %v2723_v18 = vpop.permute.xlu1 %2722 }
 0x386   : > { %3051 = vst.msk [vmem:[%s4782_s28 + $0xb0] sm:$0xff] %vm1027_vm1, %v2982_v42  ;;  %v2981_v49 = vadd.f32 %v2723_v18, %v2567_v54  ;;  %v2509_v24 = vpop.permute.xlu0 %2508  ;;  %v5643_v42 = vld [vmem:[#allocation60_spill] sm:$0xff] }
 0x387   : > { %v2607_v28 = vmul.f32 %v2509_v24, %v5640_v21 }
 0x388   : > { %3050 = vst.msk [vmem:[%s4782_s28 + $0xa8] sm:$0xff] %vm1027_vm1, %v2981_v49  ;;  %v5644_v49 = vld [vmem:[#allocation59_spill] sm:$0xff] }
 0x389   : > { %v2494_v35 = vpop.permute.xlu1 %2493 }
 0x38a   : > { %v2604_v0 = vmul.f32 %v2494_v35, %v5631_v13  ;;  %v2918_v53 = vpop.permute.xlu0 %2917 }
 0x38c   : > { %v3018_v48 = vadd.f32 %v2908_v58, %v2604_v0 }
 0x38d   : > { %v2903_v1 = vpop.permute.xlu1 %2902 }
 0x38e   : > { %3087 = vst.msk [vmem:[%s4782_s28 + $0x1d0] sm:$0xff] %vm1027_vm1, %v3018_v48  ;;  %v3017_v4 = vadd.f32 %v2903_v1, %v2603_v10  ;;  %v2339_v59 = vpop.permute.xlu0 %2338  ;;  %v5645_v10 = vld [vmem:[#allocation62_spill] sm:$0xff] }
 0x38f   : > { %v2573_v41 = vmul.f32 %v2339_v59, %v5642_v36 }
 0x390   : > { %3086 = vst.msk [vmem:[%s4782_s28 + $0x1c8] sm:$0xff] %vm1027_vm1, %v3017_v4  ;;  %v5646_v4 = vld [vmem:[#allocation61_spill] sm:$0xff] }
 0x391   : > { %v2324_v11 = vpop.permute.xlu1 %2323 }
 0x392   : > { %v2570_v9 = vmul.f32 %v2324_v11, %v5633_v26  ;;  %v2748_v62 = vpop.permute.xlu0 %2747 }
 0x394   : > { %v2984_v19 = vadd.f32 %v2738_v6, %v2570_v9 }
 0x395   : > { %v2733_v25 = vpop.permute.xlu1 %2732 }
 0x396   : > { %3053 = vst.msk [vmem:[%s4782_s28 + $0xc0] sm:$0xff] %vm1027_vm1, %v2984_v19  ;;  %v2983_v31 = vadd.f32 %v2733_v25, %v2569_v17  ;;  %v2519_v15 = vpop.permute.xlu0 %2518  ;;  %v5647_v17 = vld [vmem:[#allocation64_spill] sm:$0xff]  ;;  %v5648_v25 = vld [vmem:[#allocation63_spill] sm:$0xff] }
 0x397   : > { %v2609_v24 = vmul.f32 %v2519_v15, %v5644_v49 }
 0x398   : > { %3052 = vst.msk [vmem:[%s4782_s28 + $0xb8] sm:$0xff] %vm1027_vm1, %v2983_v31 }
 0x399   : > { %v2504_v27 = vpop.permute.xlu1 %2503 }
 0x39a   : > { %v2606_v46 = vmul.f32 %v2504_v27, %v5635_v7  ;;  %v2928_v55 = vpop.permute.xlu0 %2927 }
 0x39c   : > { %v3020_v30 = vadd.f32 %v2918_v53, %v2606_v46 }
 0x39d   : > { %v2913_v12 = vpop.permute.xlu1 %2912 }
 0x39e   : > { %3089 = vst.msk [vmem:[%s4782_s28 + $0x1e0] sm:$0xff] %vm1027_vm1, %v3020_v30  ;;  %v3019_v14 = vadd.f32 %v2913_v12, %v2605_v63  ;;  %v2349_v44 = vpop.permute.xlu0 %2348  ;;  %v5650_v30 = vld [vmem:[#allocation65_spill] sm:$0xff] }
 0x39f   : > { %v2575_v59 = vmul.f32 %v2349_v44, %v5646_v4 }
 0x3a0   : > { %3088 = vst.msk [vmem:[%s4782_s28 + $0x1d8] sm:$0xff] %vm1027_vm1, %v3019_v14 }
 0x3a1   : > { %v2334_v39 = vpop.permute.xlu1 %2333 }
 0x3a2   : > { %v2572_v37 = vmul.f32 %v2334_v39, %v5637_v61  ;;  %v2758_v3 = vpop.permute.xlu0 %2757 }
 0x3a4   : > { %v2986_v57 = vadd.f32 %v2748_v62, %v2572_v37 }
 0x3a5   : > { %v2743_v38 = vpop.permute.xlu1 %2742 }
 0x3a6   : > { %3055 = vst.msk [vmem:[%s4782_s28 + $0xd0] sm:$0xff] %vm1027_vm1, %v2986_v57  ;;  %v2985_v47 = vadd.f32 %v2743_v38, %v2571_v20  ;;  %v2529_v16 = vpop.permute.xlu0 %2528 }
 0x3a7   : > { %v2611_v31 = vmul.f32 %v2529_v16, %v5648_v25 }
 0x3a8   : > { %3054 = vst.msk [vmem:[%s4782_s28 + $0xc8] sm:$0xff] %vm1027_vm1, %v2985_v47  ;;  %v5652_v47 = vld [vmem:[#allocation70_spill] sm:$0xff] }
 0x3a9   : > { %v2514_v23 = vpop.permute.xlu1 %2513 }
 0x3aa   : > { %v2608_v29 = vmul.f32 %v2514_v23, %v5639_v56  ;;  %v2938_v8 = vpop.permute.xlu0 %2937  ;;  %v5653_v23 = vld [vmem:[#allocation69_spill] sm:$0xff] }
 0x3ac   : > { %v3022_v22 = vadd.f32 %v2928_v55, %v2608_v29 }
 0x3ad   : > { %v2923_v58 = vpop.permute.xlu1 %2922 }
 0x3ae   : > { %3091 = vst.msk [vmem:[%s4782_s28 + $0x1f0] sm:$0xff] %vm1027_vm1, %v3022_v22  ;;  %v3021_v2 = vadd.f32 %v2923_v58, %v2607_v28  ;;  %v2359_v5 = vpop.permute.xlu0 %2358  ;;  %v5654_v28 = vld [vmem:[#allocation67_spill] sm:$0xff] }
 0x3af   : > { %v2577_v12 = vmul.f32 %v2359_v5, %v5650_v30 }
 0x3b0   : > { %3090 = vst.msk [vmem:[%s4782_s28 + $0x1e8] sm:$0xff] %vm1027_vm1, %v3021_v2 }
 0x3b1   : > { %v2344_v34 = vpop.permute.xlu1 %2343 }
 0x3b2   : > { %v2574_v40 = vmul.f32 %v2344_v34, %v5641_v33  ;;  %v2768_v52 = vpop.permute.xlu0 %2767 }
 0x3b4   : > { %v2988_v60 = vadd.f32 %v2758_v3, %v2574_v40  ;;  %v5651_v3 = vld [vmem:[#allocation68_spill] sm:$0xff] }
 0x3b5   : > { %v2753_v43 = vpop.permute.xlu1 %2752 }
 0x3b6   : > { %3057 = vst.msk [vmem:[%s4782_s28 + $0xe0] sm:$0xff] %vm1027_vm1, %v2988_v60  ;;  %v2987_v6 = vadd.f32 %v2753_v43, %v2573_v41  ;;  %v2539_v13 = vpop.permute.xlu0 %2538 }
 0x3b7   : > { %v2613_v22 = vmul.f32 %v2539_v13, %v5654_v28 }
 0x3b8   : > { %3056 = vst.msk [vmem:[%s4782_s28 + $0xd8] sm:$0xff] %vm1027_vm1, %v2987_v6 }
 0x3b9   : > { %v2524_v54 = vpop.permute.xlu1 %2523 }
 0x3ba   : > { %v2610_v18 = vmul.f32 %v2524_v54, %v5643_v42  ;;  %v2948_v1 = vpop.permute.xlu0 %2947 }
 0x3bc   : > { %v3024_v35 = vadd.f32 %v2938_v8, %v2610_v18 }
 0x3bd   : > { %v2933_v0 = vpop.permute.xlu1 %2932 }
 0x3be   : > { %3093 = vst.msk [vmem:[%s4782_s28 + $0x200] sm:$0xff] %vm1027_vm1, %v3024_v35  ;;  %v3023_v53 = vadd.f32 %v2933_v0, %v2609_v24  ;;  %v2369_v62 = vpop.permute.xlu0 %2368 }
 0x3bf   : > { %v2579_v56 = vmul.f32 %v2369_v62, %v5653_v23 }
 0x3c0   : > { %3092 = vst.msk [vmem:[%s4782_s28 + $0x1f8] sm:$0xff] %vm1027_vm1, %v3023_v53 }
 0x3c1   : > { %v2354_v51 = vpop.permute.xlu1 %2353 }
 0x3c2   : > { %v2576_v48 = vmul.f32 %v2354_v51, %v5645_v10  ;;  %v2778_v46 = vpop.permute.xlu0 %2777 }
 0x3c4   : > { %v2990_v11 = vadd.f32 %v2768_v52, %v2576_v48 }
 0x3c5   : > { %v2763_v26 = vpop.permute.xlu1 %2762 }
 0x3c6   : > { %3059 = vst.msk [vmem:[%s4782_s28 + $0xf0] sm:$0xff] %vm1027_vm1, %v2990_v11  ;;  %v2989_v9 = vadd.f32 %v2763_v26, %v2575_v59  ;;  %v2788_v44 = vpop.permute.xlu0 %2787 }
 0x3c8   : > { %3058 = vst.msk [vmem:[%s4782_s28 + $0xe8] sm:$0xff] %vm1027_vm1, %v2989_v9 }
 0x3c9   : > { %v2534_v50 = vpop.permute.xlu1 %2533 }
 0x3ca   : > { %v2612_v19 = vmul.f32 %v2534_v50, %v5647_v17  ;;  %v2958_v20 = vpop.permute.xlu0 %2957 }
 0x3cc   : > { %v3026_v15 = vadd.f32 %v2948_v1, %v2612_v19 }
 0x3cd   : > { %v2943_v27 = vpop.permute.xlu1 %2942 }
 0x3ce   : > { %3095 = vst.msk [vmem:[%s4782_s28 + $0x210] sm:$0xff] %vm1027_vm1, %v3026_v15  ;;  %v3025_v7 = vadd.f32 %v2943_v27, %v2611_v31 }
 0x3d0   : > { %3094 = vst.msk [vmem:[%s4782_s28 + $0x208] sm:$0xff] %vm1027_vm1, %v3025_v7 }
 0x3d1   : > { %v2364_v55 = vpop.permute.xlu1 %2363 }
 0x3d2   : > { %v2578_v63 = vmul.f32 %v2364_v55, %v5649_v45 }
 0x3d4   : > { %v2992_v14 = vadd.f32 %v2778_v46, %v2578_v63 }
 0x3d5   : > { %v2773_v39 = vpop.permute.xlu1 %2772 }
 0x3d6   : > { %3061 = vst.msk [vmem:[%s4782_s28 + $0x100] sm:$0xff] %vm1027_vm1, %v2992_v14  ;;  %v2991_v61 = vadd.f32 %v2773_v39, %v2577_v12 }
 0x3d8   : > { %3060 = vst.msk [vmem:[%s4782_s28 + $0xf8] sm:$0xff] %vm1027_vm1, %v2991_v61 }
 0x3d9   : > { %v2544_v37 = vpop.permute.xlu1 %2543 }
 0x3da   : > { %v2614_v32 = vmul.f32 %v2544_v37, %v5651_v3 }
 0x3dc   : > { %v3028_v57 = vadd.f32 %v2958_v20, %v2614_v32 }
 0x3dd   : > { %v2374_v38 = vpop.permute.xlu1 %2373 }
 0x3de   : > { %3097 = vst.msk [vmem:[%s4782_s28 + $0x220] sm:$0xff] %vm1027_vm1, %v3028_v57  ;;  %v2580_v16 = vmul.f32 %v2374_v38, %v5652_v47 }
 0x3e0   : > { %v2994_v29 = vadd.f32 %v2788_v44, %v2580_v16 }
 0x3e1   : > { %v2783_v8 = vpop.permute.xlu1 %2782 }
 0x3e2   : > { %3063 = vst.msk [vmem:[%s4782_s28 + $0x110] sm:$0xff] %vm1027_vm1, %v2994_v29  ;;  %v2993_v21 = vadd.f32 %v2783_v8, %v2579_v56 }
 0x3e4   : > { %3062 = vst.msk [vmem:[%s4782_s28 + $0x108] sm:$0xff] %vm1027_vm1, %v2993_v21 }
 0x3e5   : > { %v2953_v58 = vpop.permute.xlu1 %2952 }
 0x3e6   : > { %v3027_v2 = vadd.f32 %v2953_v58, %v2613_v22 }
 0x3e8   : > { %3096 = vst.msk [vmem:[%s4782_s28 + $0x218] sm:$0xff] %vm1027_vm1, %v3027_v2 }
 0x3e9 PF: > { %s14_s15 = sadd.s32 1, %s3474_s15  }
 0x3ea   : > { %p11_p4 = scmp.ge.s32.totalorder %s14_s15, 4  }
 0x3ec   :  { %13 = sbr.rel (!%p11_p4) target bundleno = 1 (0x1), region = 72 }

</bundles_post_ra>
